<compile_context>
chip_gen: v7x
topology: tpu7x:2x2x1
jax: 0.10.0
libtpu: 0.0.40
codegen_flags: <defaults>
</compile_context>

<pallas_src>
import functools
import math

import numpy as np
import jax
import jax.numpy as jnp
from jax import lax
from jax.experimental import pallas as pl
from jax.experimental.pallas import tpu as pltpu


def _up2x2_kernel(x_ref, g_ref, b_ref, o_ref, *, chunk):
    # x_ref: (1, Cin, Tg, r*W)       VMEM  input window (NCHW-native, r rows folded into lanes)
    # g_ref: (Cin, r*W, Cout*r*4W)   VMEM  folded weight+scatter matrices (resident)
    # b_ref: (Cout,)                 SMEM  bias
    # o_ref: (1, Cout, Tg, r*4W)     VMEM  2r interleaved output rows per folded input row
    cin = x_ref.shape[1]
    cout = o_ref.shape[1]
    tg = x_ref.shape[2]
    r4w = o_ref.shape[3]
    nchunks = tg // chunk

    def do_chunk(row):
        # MXU contraction over the folded input lanes; Cin accumulated in f32.
        acc = jnp.dot(x_ref[0, 0, pl.ds(row, chunk), :], g_ref[0],
                      preferred_element_type=jnp.float32,
                      precision=lax.Precision.HIGHEST)
        for ci in range(1, cin):
            acc = acc + jnp.dot(x_ref[0, ci, pl.ds(row, chunk), :], g_ref[ci],
                                preferred_element_type=jnp.float32,
                                precision=lax.Precision.HIGHEST)
        # Stream stores per output channel: static lane slices of acc, store
        # issue spread through the kernel (no terminal store burst).
        for co in range(cout):
            o_ref[0, co, pl.ds(row, chunk), :] = (
                acc[:, co * r4w:(co + 1) * r4w] + b_ref[co]
            ).astype(o_ref.dtype)

    if nchunks == 1:
        do_chunk(0)
    else:
        def body(c, carry):
            do_chunk(pl.multiple_of(c * chunk, chunk))
            return carry
        lax.fori_loop(0, nchunks, body, 0)


def _pick_row_fold(H, W):
    """Smallest r dividing H so the per-channel output row is lane dense (r*4W >= 128)."""
    if 4 * W >= 128:
        return 1
    need = -(-128 // (4 * W))          # ceil(128 / 4W)
    for r in range(need, H + 1):
        if H % r == 0:
            return r
    return H


def _pick_tiles(N, Hg, rW, Cin, Cout, budget_bytes):
    """Pick (row-group tile, in-kernel row chunk, working-set bytes).

    Largest tile that divides Hg, satisfies the (8,128) block rule and fits the
    VMEM budget (double-buffered in/out blocks + double-buffered G); prefers a
    grid with >= 2 total steps (v7x has 2 TensorCores)."""
    r4W = 4 * rW
    g_bytes = 2 * Cin * rW * Cout * r4W * 4                  # 2x: pipeline buffers
    blk = lambda tg: 2 * 4 * tg * (Cin * rW + Cout * r4W)    # 2x double-buffer, f32

    cands = [d for d in range(Hg, 0, -1)
             if Hg % d == 0 and (d == Hg or d % 8 == 0)]
    multi = [d for d in cands if N * (Hg // d) >= 2]
    ordered = multi if multi else cands

    tile = None
    for d in ordered:
        if g_bytes + blk(d) <= budget_bytes:
            tile = d
            break
    if tile is None:         # nothing fits the budget: take the smallest tile and
        tile = ordered[-1]   # size vmem_limit_bytes from the real working set below.

    chunk = tile
    for c in (32, 16, 8):    # 8-32 sublanes keeps vreg pressure flat
        if tile % c == 0:
            chunk = c
            break

    return tile, chunk, g_bytes + blk(tile)


def conv_transpose_2x2(x, weight, bias, *, vmem_budget_bytes=40 << 20):
    """ConvTranspose2d(kernel_size=2, stride=2) forward.

    x:      (N, Cin, H, W)      NCHW (PyTorch layout, consumed natively)
    weight: (Cin, Cout, 2, 2)   PyTorch ConvTranspose2d weight layout
    bias:   (Cout,)
    returns (N, Cout, 2H, 2W)   NCHW
    """
    N, Cin, H, W = x.shape
    Cout = weight.shape[1]

    r = _pick_row_fold(H, W)
    Hg, rW = H // r, r * W
    r4W = 4 * rW

    # Trace-time fold of weights into per-input-channel scatter matrices:
    #   G[ci, ri*W + w, co*r4W + ri*4W + kh*2W + 2w + kw] = weight[ci, co, kh, kw]
    # T is a constant 0/1 placement tensor; the einsum (precision=HIGHEST so the
    # weights are never bf16-truncated) fills in the weight values.
    T = np.zeros((rW, 2, 2, r4W), np.float32)
    for ri in range(r):
        for w in range(W):
            for kh in range(2):
                for kw in range(2):
                    T[ri * W + w, kh, kw, ri * 4 * W + kh * 2 * W + 2 * w + kw] = 1.0
    G = jnp.einsum("cokl,pklq->cpoq", weight.astype(jnp.float32), jnp.asarray(T),
                   precision=lax.Precision.HIGHEST)
    G = G.reshape(Cin, rW, Cout * r4W)
    bias = bias.astype(jnp.float32)

    tile, chunk, need_bytes = _pick_tiles(N, Hg, rW, Cin, Cout, vmem_budget_bytes)
    # Derived from the actual working set; capped at 48 MiB so v7x (64 MiB/TC)
    # keeps headroom for compiler scratch.
    vmem_limit = int(min(48 << 20, max(16 << 20, need_bytes + (4 << 20))))

    x_v = x.reshape(N, Cin, Hg, rW)            # free row-major view

    out = pl.pallas_call(
        functools.partial(_up2x2_kernel, chunk=chunk),
        out_shape=jax.ShapeDtypeStruct((N, Cout, Hg, r4W), x.dtype),
        grid=(N, Hg // tile),
        in_specs=[
            pl.BlockSpec((1, Cin, tile, rW), lambda n, j: (n, 0, j, 0)),
            pl.BlockSpec((Cin, rW, Cout * r4W), lambda n, j: (0, 0, 0)),
            pl.BlockSpec(memory_space=pltpu.MemorySpace.SMEM),
        ],
        out_specs=pl.BlockSpec((1, Cout, tile, r4W), lambda n, j: (n, 0, j, 0)),
        compiler_params=pltpu.CompilerParams(
            dimension_semantics=("parallel", "parallel"),
            vmem_limit_bytes=vmem_limit),
    )(x_v, G, bias)

    # (N, Cout, Hg, r*4W) -> (N, Cout, 2H, 2W): row-major identical => free view.
    return out.reshape(N, Cout, 2 * H, 2 * W)


def up_forward(x, params):
    """Full `Up` module: chain of 4 ConvTranspose2d(k=2, s=2) layers."""
    for w, b in params:
        x = conv_transpose_2x2(x, w, b)
    return x


# ---------------- pure-JAX reference ----------------
def _reference_layer(x, weight, bias):
    N, Cin, H, W = x.shape
    Cout = weight.shape[1]
    # y[n, co, 2h+kh, 2w+kw] = sum_ci x[n,ci,h,w] * W[ci,co,kh,kw] + b[co]
    y = jnp.einsum("nchw,cokl->nohkwl", x, weight, precision=lax.Precision.HIGHEST)
    return y.reshape(N, Cout, 2 * H, 2 * W) + bias[None, :, None, None]


def _reference(x, params):
    for w, b in params:
        x = _reference_layer(x, w, b)
    return x


if __name__ == "__main__":
    # `Up(in_channels)` requires in_channels divisible by 8; smallest valid = 8.
    N, in_channels, H, W = 2, 8, 16, 16
    chans = [in_channels, in_channels // 2, in_channels // 4, in_channels // 8, 1]

    key = jax.random.PRNGKey(0)
    key, kx = jax.random.split(key)
    x = jax.random.normal(kx, (N, in_channels, H, W), dtype=jnp.float32)

    params = []
    for cin, cout in zip(chans[:-1], chans[1:]):
        key, kw_, kb_ = jax.random.split(key, 3)
        bound = 1.0 / math.sqrt(cin * 2 * 2)   # PyTorch-like uniform init
        w = jax.random.uniform(kw_, (cin, cout, 2, 2), jnp.float32, -bound, bound)
        b = jax.random.uniform(kb_, (cout,), jnp.float32, -bound, bound)
        params.append((w, b))

    out = up_forward(x, params)
    out = jax.block_until_ready(out)

    ref = _reference(x, params)
    assert out.shape == (N, 1, H * 16, W * 16), out.shape
    err = float(jnp.max(jnp.abs(out - ref)))
    assert jnp.allclose(out, ref, atol=1e-3, rtol=1e-3), err

    print("KERNEL_OK")
</pallas_src>

<mosaic_0001>
module attributes {stable_mosaic.version = 11 : i64} {
  func.func @_up2x2_kernel(%arg0: i32, %arg1: i32, %arg2: memref<1x8x8x32xf32, #tpu.memory_space<vmem>>, %arg3: memref<8x32x512xf32, #tpu.memory_space<vmem>>, %arg4: memref<4xf32, #tpu.memory_space<smem>>, %arg5: memref<1x4x8x128xf32, #tpu.memory_space<vmem>>) attributes {dimension_semantics = [#tpu.dimension_semantics<parallel>, #tpu.dimension_semantics<parallel>], iteration_bounds = array<i64: 2, 1>, scalar_prefetch = 0 : i64, scratch_operands = 0 : i64, tpu.core_type = #tpu.core_type<tc>, window_params = [{transform_indices = @transform_0, window_bounds = array<i64: 1, 8, 8, 32>}, {pipeline_mode = #tpu.pipeline_mode<synchronous>, transform_indices = @transform_1, window_bounds = array<i64: 8, 32, 512>}, {transform_indices = @transform_2, window_bounds = array<i64: 4>}, {transform_indices = @transform_3, window_bounds = array<i64: 1, 4, 8, 128>}]} {
    %c0 = arith.constant 0 : index
    %c0_0 = arith.constant 0 : index
    %c0_1 = arith.constant 0 : index
    %c0_2 = arith.constant 0 : index
    %0 = vector.load %arg2[%c0, %c0_0, %c0_1, %c0_2] : memref<1x8x8x32xf32, #tpu.memory_space<vmem>>, vector<1x1x8x32xf32>
    %1 = vector.shape_cast %0 : vector<1x1x8x32xf32> to vector<8x32xf32>
    %c0_3 = arith.constant 0 : index
    %c0_4 = arith.constant 0 : index
    %c0_5 = arith.constant 0 : index
    %2 = vector.load %arg3[%c0_3, %c0_4, %c0_5] : memref<8x32x512xf32, #tpu.memory_space<vmem>>, vector<1x32x512xf32>
    %3 = vector.shape_cast %2 : vector<1x32x512xf32> to vector<32x512xf32>
    %cst = arith.constant dense<0.000000e+00> : vector<8x512xf32>
    %4 = tpu.matmul %1, %3, %cst {dimension_numbers = #tpu.dot_dimension_numbers<[1], [0], [0], [1], [0, 0, 1, 1], [], []>, precision = #tpu.contract_precision<fp32>} : vector<8x32xf32>, vector<32x512xf32>, vector<8x512xf32> -> vector<8x512xf32>
    %c0_6 = arith.constant 0 : index
    %c1 = arith.constant 1 : index
    %c0_7 = arith.constant 0 : index
    %c0_8 = arith.constant 0 : index
    %5 = vector.load %arg2[%c0_6, %c1, %c0_7, %c0_8] : memref<1x8x8x32xf32, #tpu.memory_space<vmem>>, vector<1x1x8x32xf32>
    %6 = vector.shape_cast %5 : vector<1x1x8x32xf32> to vector<8x32xf32>
    %c1_9 = arith.constant 1 : index
    %c0_10 = arith.constant 0 : index
    %c0_11 = arith.constant 0 : index
    %7 = vector.load %arg3[%c1_9, %c0_10, %c0_11] : memref<8x32x512xf32, #tpu.memory_space<vmem>>, vector<1x32x512xf32>
    %8 = vector.shape_cast %7 : vector<1x32x512xf32> to vector<32x512xf32>
    %cst_12 = arith.constant dense<0.000000e+00> : vector<8x512xf32>
    %9 = tpu.matmul %6, %8, %cst_12 {dimension_numbers = #tpu.dot_dimension_numbers<[1], [0], [0], [1], [0, 0, 1, 1], [], []>, precision = #tpu.contract_precision<fp32>} : vector<8x32xf32>, vector<32x512xf32>, vector<8x512xf32> -> vector<8x512xf32>
    %10 = arith.addf %4, %9 : vector<8x512xf32>
    %c0_13 = arith.constant 0 : index
    %c2 = arith.constant 2 : index
    %c0_14 = arith.constant 0 : index
    %c0_15 = arith.constant 0 : index
    %11 = vector.load %arg2[%c0_13, %c2, %c0_14, %c0_15] : memref<1x8x8x32xf32, #tpu.memory_space<vmem>>, vector<1x1x8x32xf32>
    %12 = vector.shape_cast %11 : vector<1x1x8x32xf32> to vector<8x32xf32>
    %c2_16 = arith.constant 2 : index
    %c0_17 = arith.constant 0 : index
    %c0_18 = arith.constant 0 : index
    %13 = vector.load %arg3[%c2_16, %c0_17, %c0_18] : memref<8x32x512xf32, #tpu.memory_space<vmem>>, vector<1x32x512xf32>
    %14 = vector.shape_cast %13 : vector<1x32x512xf32> to vector<32x512xf32>
    %cst_19 = arith.constant dense<0.000000e+00> : vector<8x512xf32>
    %15 = tpu.matmul %12, %14, %cst_19 {dimension_numbers = #tpu.dot_dimension_numbers<[1], [0], [0], [1], [0, 0, 1, 1], [], []>, precision = #tpu.contract_precision<fp32>} : vector<8x32xf32>, vector<32x512xf32>, vector<8x512xf32> -> vector<8x512xf32>
    %16 = arith.addf %10, %15 : vector<8x512xf32>
    %c0_20 = arith.constant 0 : index
    %c3 = arith.constant 3 : index
    %c0_21 = arith.constant 0 : index
    %c0_22 = arith.constant 0 : index
    %17 = vector.load %arg2[%c0_20, %c3, %c0_21, %c0_22] : memref<1x8x8x32xf32, #tpu.memory_space<vmem>>, vector<1x1x8x32xf32>
    %18 = vector.shape_cast %17 : vector<1x1x8x32xf32> to vector<8x32xf32>
    %c3_23 = arith.constant 3 : index
    %c0_24 = arith.constant 0 : index
    %c0_25 = arith.constant 0 : index
    %19 = vector.load %arg3[%c3_23, %c0_24, %c0_25] : memref<8x32x512xf32, #tpu.memory_space<vmem>>, vector<1x32x512xf32>
    %20 = vector.shape_cast %19 : vector<1x32x512xf32> to vector<32x512xf32>
    %cst_26 = arith.constant dense<0.000000e+00> : vector<8x512xf32>
    %21 = tpu.matmul %18, %20, %cst_26 {dimension_numbers = #tpu.dot_dimension_numbers<[1], [0], [0], [1], [0, 0, 1, 1], [], []>, precision = #tpu.contract_precision<fp32>} : vector<8x32xf32>, vector<32x512xf32>, vector<8x512xf32> -> vector<8x512xf32>
    %22 = arith.addf %16, %21 : vector<8x512xf32>
    %c0_27 = arith.constant 0 : index
    %c4 = arith.constant 4 : index
    %c0_28 = arith.constant 0 : index
    %c0_29 = arith.constant 0 : index
    %23 = vector.load %arg2[%c0_27, %c4, %c0_28, %c0_29] : memref<1x8x8x32xf32, #tpu.memory_space<vmem>>, vector<1x1x8x32xf32>
    %24 = vector.shape_cast %23 : vector<1x1x8x32xf32> to vector<8x32xf32>
    %c4_30 = arith.constant 4 : index
    %c0_31 = arith.constant 0 : index
    %c0_32 = arith.constant 0 : index
    %25 = vector.load %arg3[%c4_30, %c0_31, %c0_32] : memref<8x32x512xf32, #tpu.memory_space<vmem>>, vector<1x32x512xf32>
    %26 = vector.shape_cast %25 : vector<1x32x512xf32> to vector<32x512xf32>
    %cst_33 = arith.constant dense<0.000000e+00> : vector<8x512xf32>
    %27 = tpu.matmul %24, %26, %cst_33 {dimension_numbers = #tpu.dot_dimension_numbers<[1], [0], [0], [1], [0, 0, 1, 1], [], []>, precision = #tpu.contract_precision<fp32>} : vector<8x32xf32>, vector<32x512xf32>, vector<8x512xf32> -> vector<8x512xf32>
    %28 = arith.addf %22, %27 : vector<8x512xf32>
    %c0_34 = arith.constant 0 : index
    %c5 = arith.constant 5 : index
    %c0_35 = arith.constant 0 : index
    %c0_36 = arith.constant 0 : index
    %29 = vector.load %arg2[%c0_34, %c5, %c0_35, %c0_36] : memref<1x8x8x32xf32, #tpu.memory_space<vmem>>, vector<1x1x8x32xf32>
    %30 = vector.shape_cast %29 : vector<1x1x8x32xf32> to vector<8x32xf32>
    %c5_37 = arith.constant 5 : index
    %c0_38 = arith.constant 0 : index
    %c0_39 = arith.constant 0 : index
    %31 = vector.load %arg3[%c5_37, %c0_38, %c0_39] : memref<8x32x512xf32, #tpu.memory_space<vmem>>, vector<1x32x512xf32>
    %32 = vector.shape_cast %31 : vector<1x32x512xf32> to vector<32x512xf32>
    %cst_40 = arith.constant dense<0.000000e+00> : vector<8x512xf32>
    %33 = tpu.matmul %30, %32, %cst_40 {dimension_numbers = #tpu.dot_dimension_numbers<[1], [0], [0], [1], [0, 0, 1, 1], [], []>, precision = #tpu.contract_precision<fp32>} : vector<8x32xf32>, vector<32x512xf32>, vector<8x512xf32> -> vector<8x512xf32>
    %34 = arith.addf %28, %33 : vector<8x512xf32>
    %c0_41 = arith.constant 0 : index
    %c6 = arith.constant 6 : index
    %c0_42 = arith.constant 0 : index
    %c0_43 = arith.constant 0 : index
    %35 = vector.load %arg2[%c0_41, %c6, %c0_42, %c0_43] : memref<1x8x8x32xf32, #tpu.memory_space<vmem>>, vector<1x1x8x32xf32>
    %36 = vector.shape_cast %35 : vector<1x1x8x32xf32> to vector<8x32xf32>
    %c6_44 = arith.constant 6 : index
    %c0_45 = arith.constant 0 : index
    %c0_46 = arith.constant 0 : index
    %37 = vector.load %arg3[%c6_44, %c0_45, %c0_46] : memref<8x32x512xf32, #tpu.memory_space<vmem>>, vector<1x32x512xf32>
    %38 = vector.shape_cast %37 : vector<1x32x512xf32> to vector<32x512xf32>
    %cst_47 = arith.constant dense<0.000000e+00> : vector<8x512xf32>
    %39 = tpu.matmul %36, %38, %cst_47 {dimension_numbers = #tpu.dot_dimension_numbers<[1], [0], [0], [1], [0, 0, 1, 1], [], []>, precision = #tpu.contract_precision<fp32>} : vector<8x32xf32>, vector<32x512xf32>, vector<8x512xf32> -> vector<8x512xf32>
    %40 = arith.addf %34, %39 : vector<8x512xf32>
    %c0_48 = arith.constant 0 : index
    %c7 = arith.constant 7 : index
    %c0_49 = arith.constant 0 : index
    %c0_50 = arith.constant 0 : index
    %41 = vector.load %arg2[%c0_48, %c7, %c0_49, %c0_50] : memref<1x8x8x32xf32, #tpu.memory_space<vmem>>, vector<1x1x8x32xf32>
    %42 = vector.shape_cast %41 : vector<1x1x8x32xf32> to vector<8x32xf32>
    %c7_51 = arith.constant 7 : index
    %c0_52 = arith.constant 0 : index
    %c0_53 = arith.constant 0 : index
    %43 = vector.load %arg3[%c7_51, %c0_52, %c0_53] : memref<8x32x512xf32, #tpu.memory_space<vmem>>, vector<1x32x512xf32>
    %44 = vector.shape_cast %43 : vector<1x32x512xf32> to vector<32x512xf32>
    %cst_54 = arith.constant dense<0.000000e+00> : vector<8x512xf32>
    %45 = tpu.matmul %42, %44, %cst_54 {dimension_numbers = #tpu.dot_dimension_numbers<[1], [0], [0], [1], [0, 0, 1, 1], [], []>, precision = #tpu.contract_precision<fp32>} : vector<8x32xf32>, vector<32x512xf32>, vector<8x512xf32> -> vector<8x512xf32>
    %46 = arith.addf %40, %45 : vector<8x512xf32>
    %47 = vector.extract_strided_slice %46 {offsets = [0, 0], sizes = [8, 128], strides = [1, 1]} : vector<8x512xf32> to vector<8x128xf32>
    %c0_55 = arith.constant 0 : index
    %48 = memref.load %arg4[%c0_55] : memref<4xf32, #tpu.memory_space<smem>>
    %49 = vector.broadcast %48 : f32 to vector<8x128xf32>
    %50 = arith.addf %47, %49 : vector<8x128xf32>
    %c0_56 = arith.constant 0 : index
    %c0_57 = arith.constant 0 : index
    %c0_58 = arith.constant 0 : index
    %c0_59 = arith.constant 0 : index
    %51 = vector.load %arg5[%c0_56, %c0_57, %c0_58, %c0_59] : memref<1x4x8x128xf32, #tpu.memory_space<vmem>>, vector<1x1x8x128xf32>
    %52 = vector.shape_cast %51 : vector<1x1x8x128xf32> to vector<8x128xf32>
    %53 = vector.shape_cast %50 : vector<8x128xf32> to vector<1x1x8x128xf32>
    tpu.vector_store %arg5[%c0_56, %c0_57, %c0_58, %c0_59], %53 {strides = array<i32>} : memref<1x4x8x128xf32, #tpu.memory_space<vmem>>, vector<1x1x8x128xf32>,
    %54 = vector.extract_strided_slice %46 {offsets = [0, 128], sizes = [8, 128], strides = [1, 1]} : vector<8x512xf32> to vector<8x128xf32>
    %c1_60 = arith.constant 1 : index
    %55 = memref.load %arg4[%c1_60] : memref<4xf32, #tpu.memory_space<smem>>
    %56 = vector.broadcast %55 : f32 to vector<8x128xf32>
    %57 = arith.addf %54, %56 : vector<8x128xf32>
    %c0_61 = arith.constant 0 : index
    %c1_62 = arith.constant 1 : index
    %c0_63 = arith.constant 0 : index
    %c0_64 = arith.constant 0 : index
    %58 = vector.load %arg5[%c0_61, %c1_62, %c0_63, %c0_64] : memref<1x4x8x128xf32, #tpu.memory_space<vmem>>, vector<1x1x8x128xf32>
    %59 = vector.shape_cast %58 : vector<1x1x8x128xf32> to vector<8x128xf32>
    %60 = vector.shape_cast %57 : vector<8x128xf32> to vector<1x1x8x128xf32>
    tpu.vector_store %arg5[%c0_61, %c1_62, %c0_63, %c0_64], %60 {strides = array<i32>} : memref<1x4x8x128xf32, #tpu.memory_space<vmem>>, vector<1x1x8x128xf32>,
    %61 = vector.extract_strided_slice %46 {offsets = [0, 256], sizes = [8, 128], strides = [1, 1]} : vector<8x512xf32> to vector<8x128xf32>
    %c2_65 = arith.constant 2 : index
    %62 = memref.load %arg4[%c2_65] : memref<4xf32, #tpu.memory_space<smem>>
    %63 = vector.broadcast %62 : f32 to vector<8x128xf32>
    %64 = arith.addf %61, %63 : vector<8x128xf32>
    %c0_66 = arith.constant 0 : index
    %c2_67 = arith.constant 2 : index
    %c0_68 = arith.constant 0 : index
    %c0_69 = arith.constant 0 : index
    %65 = vector.load %arg5[%c0_66, %c2_67, %c0_68, %c0_69] : memref<1x4x8x128xf32, #tpu.memory_space<vmem>>, vector<1x1x8x128xf32>
    %66 = vector.shape_cast %65 : vector<1x1x8x128xf32> to vector<8x128xf32>
    %67 = vector.shape_cast %64 : vector<8x128xf32> to vector<1x1x8x128xf32>
    tpu.vector_store %arg5[%c0_66, %c2_67, %c0_68, %c0_69], %67 {strides = array<i32>} : memref<1x4x8x128xf32, #tpu.memory_space<vmem>>, vector<1x1x8x128xf32>,
    %68 = vector.extract_strided_slice %46 {offsets = [0, 384], sizes = [8, 128], strides = [1, 1]} : vector<8x512xf32> to vector<8x128xf32>
    %c3_70 = arith.constant 3 : index
    %69 = memref.load %arg4[%c3_70] : memref<4xf32, #tpu.memory_space<smem>>
    %70 = vector.broadcast %69 : f32 to vector<8x128xf32>
    %71 = arith.addf %68, %70 : vector<8x128xf32>
    %c0_71 = arith.constant 0 : index
    %c3_72 = arith.constant 3 : index
    %c0_73 = arith.constant 0 : index
    %c0_74 = arith.constant 0 : index
    %72 = vector.load %arg5[%c0_71, %c3_72, %c0_73, %c0_74] : memref<1x4x8x128xf32, #tpu.memory_space<vmem>>, vector<1x1x8x128xf32>
    %73 = vector.shape_cast %72 : vector<1x1x8x128xf32> to vector<8x128xf32>
    %74 = vector.shape_cast %71 : vector<8x128xf32> to vector<1x1x8x128xf32>
    tpu.vector_store %arg5[%c0_71, %c3_72, %c0_73, %c0_74], %74 {strides = array<i32>} : memref<1x4x8x128xf32, #tpu.memory_space<vmem>>, vector<1x1x8x128xf32>,
    return
  }
  func.func @transform_0(%arg0: i32, %arg1: i32) -> (i32, i32, i32, i32) {
    %c0_i32 = arith.constant 0 : i32
    %c0_i32_0 = arith.constant 0 : i32
    %c0_i32_1 = arith.constant 0 : i32
    return %arg0, %c0_i32, %arg1, %c0_i32_0 : i32, i32, i32, i32
  }
  func.func @transform_1(%arg0: i32, %arg1: i32) -> (i32, i32, i32) {
    %c0_i32 = arith.constant 0 : i32
    %c0_i32_0 = arith.constant 0 : i32
    %c0_i32_1 = arith.constant 0 : i32
    %c0_i32_2 = arith.constant 0 : i32
    return %c0_i32, %c0_i32_0, %c0_i32_1 : i32, i32, i32
  }
  func.func @transform_2(%arg0: i32, %arg1: i32) -> i32 {
    %c0_i32 = arith.constant 0 : i32
    %c0_i32_0 = arith.constant 0 : i32
    return %c0_i32 : i32
  }
  func.func @transform_3(%arg0: i32, %arg1: i32) -> (i32, i32, i32, i32) {
    %c0_i32 = arith.constant 0 : i32
    %c0_i32_0 = arith.constant 0 : i32
    %c0_i32_1 = arith.constant 0 : i32
    return %arg0, %c0_i32, %arg1, %c0_i32_0 : i32, i32, i32, i32
  }
}

</mosaic_0001>

<bundles_post_ra>
// kernel: tpu_custom_call.1
= control target key start
LH: loop header
LB: loop body
LE: loop exit
PB: predicated region body
PF: predicated region fallthrough
CT: control target
= control target key end

     0   :  { %8 = vsyncpa [#allocation3], 0  ;;  %s12610_s0 = inlined_call_operand.hbm [shape: f32[2,8,8,32], index: 0, kind: input, shape index: {}]   ;;  %s12611_s1 = inlined_call_operand.hbm [shape: f32[8,32,512], index: 1, kind: input, shape index: {}]   ;;  %s12612_s2 = inlined_call_operand.vmem [shape: f32[4], index: 2, kind: input, shape index: {}]   ;;  %s12613_s3 = inlined_call_operand.hbm [shape: f32[2,4,8,128], index: 3, kind: output, shape index: {}]  }
   0x1   :  { %10 = vsyncpa [#allocation3 + $0x1], 0 }
   0x2   :  { %11 = vsyncpa [#allocation7], 0 }
   0x3   :  { %12 = vsyncpa [#allocation5], 0 }
   0x4   :  { %13 = vsyncpa [#allocation4], 0 }
   0x5   :  { %15 = vsyncpa [#allocation4 + $0x1], 0  ;;  %s10539_s12 = smov 0   ;;  %s10541_s13 = smov 0  }
   0x6   :  { %s10543_s14 = smov 0   ;;  %s10545_s15 = smov 0  }
   0x7   :  { %s10547_s16 = smov 0   ;;  %s10549_s17 = smov 0  }
   0x8 LB: > { %s9263_s18 = sadd.s32 4294967295, %s10506_s17   ;;  %s9264_s19 = sadd.s32 4294967294, %s10506_s17   ;;  %s10506_s17 = sphi %s10549_s17, %s21_s17   ;;  %s10502_s16 = sphi %s10547_s16, %s12734_s16   ;;  %s10498_s15 = sphi %s10545_s15, %s12733_s15   ;;  %s10494_s14 = sphi %s10543_s14, %s12732_s14   ;;  %s10490_s13 = sphi %s10541_s13, %s12731_s13   ;;  %s10486_s12 = sphi %s10539_s12, %s12730_s12  }
   0x9   : > { %p55_p0 = scmp.ne.s32.totalorder %s10490_s13, %s10486_s12  ;;  %p10573_p1 = scmp.eq.s32.totalorder %s9263_s18, 0 }
   0xa   : > { %p10577_p2 = scmp.eq.s32.totalorder %s9263_s18, 1  ;;  %p129_p3 = scmp.eq.s32.totalorder %s9264_s19, 1 }
   0xb   : > { %s12667_s20 = scalar_select %p10573_p1, 1, 0 }
   0xc   : > { %s12668_s21 = scalar_select %p10577_p2, 1, 0 }
   0xd   : > { %p10583_p4 = por %p10573_p1, %p55_p0  ;;  %p9265_p5 = scmp.ge.s32.totalorder %s10506_s17, 1 }
   0xe   : > { %p10588_p6 = por %p129_p3, %p55_p0  ;;  %p136_p7 = scmp.lt.s32.totalorder %s10506_s17, 3 }
   0xf   : > { %s12669_s22 = scalar_select %p10583_p4, 1, 0 }
  0x10   : > { %s12670_s23 = scalar_select %p10588_p6, 1, 0 }
  0x11   : > { %p10593_p8 = pnand %p9265_p5, %p136_p7  ;;  %s10508_s25 = smov [#allocation6]  }
  0x12   : > { %s148_s26 = sshll.u32 %s10508_s25, 4  ;;  %s162_s29 = sshll.u32 %s12612_s2, 4  ;;  %s149_s26 = int_to_ptr.vmem [resolvable:$true] %s148_s26  ;;  %s10609_s29 = int_to_ptr.vmem [resolvable:$true] %s162_s29 }
  0x13   : > { %s12671_s24 = scalar_select %p10593_p8, 1, 0 }
  0x14   : > { %p10265_p9 = pneg %p10593_p8  ;;  %s10343_s6 = scalar_lea.hbm %s12611_s1, 16384 }
  0x15   : > { %p10344_p12 = scmp.ne.s32.totalorder %s12611_s1, %s10343_s6  ;;  %p10350_p5 = scmp.lt.u32.totalorder %s10343_s6, %s12611_s1 }
  0x16   : > { %p10605_p11 = pnand %p10265_p9, %p10573_p1 }
  0x18   : > { %p10345_p13 = pneg %p10605_p11 }
  0x1a   : > { %p10346_p0 = pnand %p10345_p13, %p10344_p12 }
  0x1c   : > { %p10347_p3 = pneg %p10346_p0 }
  0x1e   : > { %p10352_p7 = pnand %p10350_p5, %p10347_p3 }
  0x20   : > { %10355 = shalt.err (!%p10352_p7)
}
  0x21   : > { %s10356_s11 = scalar_lea.vmem %s149_s26, 16384  ;;  %p10364_p1 = scmp.lt.s32.totalorder %s149_s26, %s149_s26 }
  0x22   : > { %p10357_p9 = scmp.ne.s32.totalorder %s149_s26, %s10356_s11  ;;  %p10365_p4 = scmp.lt.s32.totalorder %s10356_s11, %s10356_s11 }
  0x24   : > { %p10359_p10 = pnand %p10357_p9, %p10345_p13  ;;  %p10366_p8 = por %p10365_p4, %p10364_p1 }
  0x26   : > { %p10360_p6 = pneg %p10359_p10 }
  0x28   : > { %p10367_p2 = pnand %p10366_p8, %p10360_p6 }
  0x2a   : > { %10370 = shalt.err (!%p10367_p2)
}
  0x2b   : > { %s10509_s18 = smov 512   ;;  %s10510_s19 = smov 32  }
  0x2c   : > { %10268 = dma.hbm_to_vmem [thread:$0]  (!%p10605_p11), %s12611_s1, 16384, %s149_s26, [#allocation7], %s10509_s18, %s10509_s18, %s10510_s19  }
  0x2d   : > { %s10371_s28 = scalar_lea.vmem %s10609_s29, 16  ;;  %p10379_p2 = scmp.lt.s32.totalorder %s10609_s29, %s10609_s29 }
  0x2e   : > { %p10372_p12 = scmp.ne.s32.totalorder %s10609_s29, %s10371_s28  ;;  %p10380_p4 = scmp.lt.s32.totalorder %s10371_s28, %s10371_s28 }
  0x30   : > { %p10374_p10 = pnand %p10372_p12, %p10345_p13  ;;  %p10381_p6 = por %p10380_p4, %p10379_p2 }
  0x32   : > { %p10375_p1 = pneg %p10374_p10 }
  0x34   : > { %p10382_p8 = pnand %p10381_p6, %p10375_p1 }
  0x36   : > { %10385 = shalt.err (!%p10382_p8)
}
  0x37   : > { %s10511_s4 = smov [#allocation8]   ;;  %s33_s26 = sadd.s32 1, %s10502_s16 }
  0x38   : > { %10271 = dma.vmem_to_smem (!%p10605_p11), %s10609_s29, 16, %s10511_s4, [#allocation5]  }
  0x39   : > { %s42_s5 = sadd.s32 1, %s10494_s14  ;;  %p35_p13 = scmp.ge.s32.totalorder %s33_s26, 2 }
  0x3a   : > { %p49_p0 = scmp.ne.s32.totalorder %s10494_s14, %s10490_s13  ;;  %p50_p3 = scmp.eq.s32.totalorder %s10506_s17, 0 }
  0x3b   : > { %p10282_p5 = scmp.lt.s32.totalorder %s10506_s17, 2  ;;  %s12736_s26 = smov (%p35_p13, %s33_s26), 0 }
  0x3c   : > { %p51_p7 = por %p50_p3, %p49_p0  ;;  %p12673_p9 = scmp.ne.s32.totalorder %s12668_s21, 0 }
  0x3d   : > { %s37_s6 = ssub.s32 %s10502_s16, %s12736_s26  ;;  %s173_s7 = sand.u32 1, %s10494_s14  }
  0x3e   : > { %p10653_p12 = por %p12673_p9, %p49_p0  ;;  %p40_p10 = scmp.eq.s32.totalorder %s37_s6, 0 }
  0x3f   : > { %s9269_s29 = sshll.u32 %s173_s7, 6  ;;  %s9295_s8 = sshll.u32 %s10502_s16, 10 }
  0x40   : > { %s10662_s9 = scalar_select %p40_p10, %s10494_s14, %s42_s5  }
  0x41   : > { %s10667_s18 = scalar_lea.hbm %s12610_s0, %s9295_s8  ;;  %s177_s21 = scalar_lea.vmem [#allocation2], %s9269_s29 }
  0x42   : > { %s185_s19 = sshll.u32 %s177_s21, 4  ;;  %p10671_p11 = pnand %p10282_p5, %p51_p7  ;;  %s10675_s19 = int_to_ptr.vmem [resolvable:$true] %s185_s19 }
  0x43   : > { %s10677_s27 = scalar_lea.sflag [#allocation3], %s173_s7  ;;  %s10386_s28 = scalar_lea.hbm %s10667_s18, 1024 }
  0x44   : > { %p10387_p1 = scmp.ne.s32.totalorder %s10667_s18, %s10386_s28  ;;  %p10388_p2 = pneg %p10671_p11 }
  0x45   : > { %s10391_s6 = scalar_lea.hbm %s12610_s0, 2048  ;;  %p10392_p8 = scmp.lt.u32.totalorder %s10667_s18, %s12610_s0 }
  0x46   : > { %p10389_p4 = pnand %p10388_p2, %p10387_p1  ;;  %p10393_p13 = scmp.lt.u32.totalorder %s10391_s6, %s10386_s28 }
  0x47   : > { %p10395_p3 = scmp.lt.u32.totalorder %s10386_s28, %s10667_s18 }
  0x48   : > { %p10390_p6 = pneg %p10389_p4  ;;  %p10394_p0 = por %p10393_p13, %p10392_p8 }
  0x4a   : > { %p10396_p5 = por %p10395_p3, %p10394_p0 }
  0x4c   : > { %p10397_p7 = pnand %p10396_p5, %p10390_p6 }
  0x4e   : > { %10400 = shalt.err (!%p10397_p7)
}
  0x4f   : > { %s10401_s7 = scalar_lea.vmem %s10675_s19, 1024  ;;  %s10512_s10 = smov [#allocation2]  }
  0x50   : > { %p10402_p9 = scmp.ne.s32.totalorder %s10675_s19, %s10401_s7  ;;  %s10406_s11 = sshll.u32 %s10512_s10, 4  ;;  %s10407_s11 = int_to_ptr.vmem [resolvable:$false] %s10406_s11 }
  0x51   : > { %s10408_s21 = scalar_lea.vmem %s10407_s11, 2048  ;;  %p10409_p4 = scmp.lt.s32.totalorder %s10675_s19, %s10407_s11 }
  0x52   : > { %p10404_p10 = pnand %p10402_p9, %p10388_p2  ;;  %p10410_p8 = scmp.lt.s32.totalorder %s10408_s21, %s10401_s7 }
  0x54   : > { %p10405_p1 = pneg %p10404_p10  ;;  %p10411_p13 = por %p10410_p8, %p10409_p4 }
  0x56   : > { %p10412_p0 = pnand %p10411_p13, %p10405_p1 }
  0x58   : > { %10415 = shalt.err (!%p10412_p0)
}
  0x59   : > { %s10513_s28 = smov 128   ;;  %s10514_s4 = smov 8  }
  0x5a   : > { %10275 = dma.hbm_to_vmem [thread:$0]  (!%p10671_p11), %s10667_s18, 1024, %s10675_s19, %s10677_s27, %s10513_s28, %s10513_s28, %s10514_s4  }
  0x5b   : > { %p12676_p2 = scmp.ne.s32.totalorder %s12671_s24, 0 }
  0x5c   : > { %s10708_s5 = sand.u32 (!%p12676_p2), 1, %s10490_s13   ;;  %p12677_p6 = scmp.ne.s32.totalorder (!%p12676_p2), %s12669_s22, 0 }
  0x5d   : > { %197 = sbr.rel (%p12676_p2) target bundleno = 741 (0x2e5), region = 32  ;;  %s9273_s6 = sshll.u32 (!%p12676_p2), %s10708_s5, 6 }
  0x5e   : > { %s200_s29 = scalar_lea.sflag (!%p12676_p2), [#allocation3], %s10708_s5  ;;  %s10712_s8 = scalar_lea.vmem (!%p12676_p2), [#allocation2], %s9273_s6 }
  0x64   : > { %10469 = dma.done.wait (%p12677_p6), %s200_s29, 1024  }
  0x65   : > { %10471 = vsyncadd (%p12677_p6), %s200_s29, 4294966272  ;;  %p12678_p11 = scmp.ne.s32.totalorder %s12667_s20, 0 }
  0x67   : > { %10473 = dma.done.wait (%p12678_p11), [#allocation7], 16384  }
  0x68   : > { %10475 = vsyncadd (%p12678_p11), [#allocation7], 4294950912 }
  0x69   : > { %10477 = dma.done.wait (%p12678_p11), [#allocation5], 16  }
  0x6a   : > { %10479 = vsyncadd (%p12678_p11), [#allocation5], 4294967280 }
  0x6b   : > { %216 = sfence }
  0x6c   : > { %v256_v0 = vld [vmem:[#allocation6 + $0x88] sm:$0xff]  ;;  %v258_v2 = vld [vmem:[#allocation6 + $0x98] sm:$0xff]  ;;  %vm271_vm0 = vcmask 261120   ;;  %v255_v7 = vld [vmem:[#allocation6 + $0x80] sm:$0xff]  ;;  %v10515_v9 = vmov 0.0   ;;  %s9122_s20 = sld [smem:[#allocation8]] }
  0x6d   : > { %v260_v1 = vld [vmem:[#allocation6 + $0xa8] sm:$0xff]  ;;  %v275_v3 = vand.u32 4294901760, %v256_v0  ;;  %v262_v5 = vld [vmem:[#allocation6 + $0xb8] sm:$0xff]  ;;  %v818_v6 = vand.u32 4294901760, %v258_v2  ;;  %v259_v8 = vld [vmem:[#allocation6 + $0xa0] sm:$0xff]  ;;  %347 = vmatprep.mubr.f32.mxu0 %v10515_v9  ;;  %890 = vmatprep.mubr.f32.mxu1 %v10515_v9  ;;  %v277_v11 = vand.u32 4294901760, %v255_v7 }
  0x6e   : > { %v279_v4 = vand.u32 4294901760, %v260_v1  ;;  %v822_v10 = vand.u32 4294901760, %v262_v5  ;;  %v281_v12 = vand.u32 4294901760, %v259_v8  ;;  %v257_v13 = vld [vmem:[#allocation6 + $0x90] sm:$0xff]  ;;  %v264_v15 = vld [vmem:[#allocation6 + $0xc8] sm:$0xff]  ;;  %v266_v21 = vld [vmem:[#allocation6 + $0xd8] sm:$0xff] }
  0x6f   : > { %v261_v14 = vld [vmem:[#allocation6 + $0xb0] sm:$0xff]  ;;  %v10730_v17 = vsub.f32 %v256_v0, %v275_v3  ;;  %v10734_v19 = vsub.f32 %v258_v2, %v818_v6  ;;  %v268_v20 = vld [vmem:[#allocation6 + $0xe8] sm:$0xff]  ;;  %v270_v22 = vld [vmem:[#allocation6 + $0xf8] sm:$0xff]  ;;  %v10742_v26 = vsub.f32 %v255_v7, %v277_v11  ;;  %v820_v29 = vand.u32 4294901760, %v257_v13  ;;  %s9284_s22 = sld [smem:[#allocation8 + $0x1]]  ;;  %s9286_s24 = sld [smem:[#allocation8 + $0x2]] }
  0x70   : > { %v10728_v16 = vpack.c.bf16 %v279_v4, %v275_v3  ;;  %v10732_v18 = vsub.f32 %v260_v1, %v279_v4  ;;  %v10736_v23 = vpack.c.bf16 %v822_v10, %v818_v6  ;;  %v10738_v24 = vsub.f32 %v262_v5, %v822_v10  ;;  %v263_v27 = vld [vmem:[#allocation6 + $0xc0] sm:$0xff]  ;;  %v265_v37 = vld [vmem:[#allocation6 + $0xd0] sm:$0xff]  ;;  %v9277_v43 = vld [vmem:[%s10712_s8 + $0x8] sm:$0xff]  ;;  %s9276_s18 = sshll.u32 %s10708_s5, 5  ;;  %s9288_s19 = sld [smem:[#allocation8 + $0x3]] }
  0x71   : > { %v10740_v25 = vpack.c.bf16 %v281_v12, %v277_v11  ;;  %v10745_v28 = vsub.f32 %v259_v8, %v281_v12  ;;  %v824_v30 = vand.u32 4294901760, %v261_v14  ;;  %v283_v31 = vand.u32 4294901760, %v264_v15  ;;  %v267_v35 = vld [vmem:[#allocation6 + $0xe0] sm:$0xff]  ;;  %v269_v42 = vld [vmem:[#allocation6 + $0xf0] sm:$0xff]  ;;  %s234_s25 = scalar_lea.vmem [#allocation9], %s9276_s18  ;;  %s9296_s7 = sshll.u32 %s10498_s15, 9 }
  0x72   : > { %9298 = vmatprep.subr.bf16.mxu0 %v10728_v16  ;;  %9346 = vmatprep.subr.bf16.mxu1 %v10736_v23  ;;  %v287_v32 = vand.u32 4294901760, %v268_v20  ;;  %v826_v33 = vand.u32 4294901760, %v266_v21  ;;  %v830_v34 = vand.u32 4294901760, %v270_v22  ;;  %v285_v36 = vand.u32 4294901760, %v263_v27  ;;  %s9156_s27 = sshll.u32 %s234_s25, 4  ;;  %s12561_s21 = scalar_lea.hbm %s12613_s3, %s9296_s7  ;;  %s12556_s27 = int_to_ptr.vmem [resolvable:$true] %s9156_s27 }
  0x73   : > { %9300 = vmatpush1.bf16.msra.mxu0 %v10740_v25  ;;  %v10749_v38 = vpack.c.bf16 %v824_v30, %v820_v29  ;;  %v10751_v39 = vsub.f32 %v257_v13, %v820_v29  ;;  %v10753_v40 = vsub.f32 %v261_v14, %v824_v30  ;;  %v10755_v41 = vsub.f32 %v264_v15, %v283_v31  ;;  %s9142_s15 = scalar_lea.sflag [#allocation4], %s10708_s5  ;;  %s10416_s28 = scalar_lea.vmem %s12556_s27, 512 }
  0x74   : > { %v10758_v44 = vpack.c.bf16 %v287_v32, %v283_v31  ;;  %v10760_v45 = vsub.f32 %v268_v20, %v287_v32  ;;  %v10762_v46 = vpack.c.bf16 %v830_v34, %v826_v33  ;;  %v10764_v47 = vsub.f32 %v266_v21, %v826_v33  ;;  %p10417_p3 = scmp.ne.s32.totalorder %s12556_s27, %s10416_s28  ;;  %s10516_s4 = smov [#allocation9]  }
  0x75   : > { %9348 = vmatpush1.bf16.msra.mxu1 %v10749_v38  ;;  %v10767_v48 = vsub.f32 %v270_v22, %v830_v34  ;;  %v289_v49 = vand.u32 4294901760, %v267_v35  ;;  %v10769_v50 = vsub.f32 %v263_v27, %v285_v36  ;;  %v828_v51 = vand.u32 4294901760, %v265_v37  ;;  %s10420_s6 = sshll.u32 %s10516_s4, 4  ;;  %s10421_s6 = int_to_ptr.vmem [resolvable:$false] %s10420_s6 }
  0x76   : > { %9302 = vmatprep.subr.bf16.mxu0 %v10758_v44  ;;  %9350 = vmatprep.subr.bf16.mxu1 %v10762_v46  ;;  %v832_v52 = vand.u32 4294901760, %v269_v42  ;;  %v273_v53 = vsel %vm271_vm0, %v9277_v43, 0  ;;  %v361_v54 = vand.u32 4294901760, %v10730_v17  ;;  %v373_v55 = vand.u32 4294901760, %v10732_v18  ;;  %p10418_p5 = pnand %p10417_p3, %p10653_p12  ;;  %s10422_s29 = scalar_lea.vmem %s10421_s6, 1024 }
  0x77   : > { %v10776_v56 = vpack.c.bf16 %v289_v49, %v285_v36  ;;  %v10778_v57 = vsub.f32 %v267_v35, %v289_v49  ;;  %v10780_v58 = vsub.f32 %v265_v37, %v828_v51  ;;  %v10782_v59 = vand.u32 4294901760, %v273_v53  ;;  %p10423_p9 = scmp.lt.s32.totalorder %s12556_s27, %s10421_s6  ;;  %p10424_p10 = scmp.lt.s32.totalorder %s10422_s29, %s10416_s28 }
  0x78   : > { %v10784_v60 = vpack.c.bf16 %v832_v52, %v828_v51  ;;  %v10786_v61 = vsub.f32 %v269_v42, %v832_v52  ;;  %v362_v62 = vsub.f32 %v10730_v17, %v361_v54  ;;  %v374_v63 = vsub.f32 %v10732_v18, %v373_v55  ;;  %p10419_p7 = pneg %p10418_p5 }
  0x79   : > { %9304 = vmatpush1.bf16.msra.mxu0 %v10776_v56  ;;  %v10796_v0 = vsub.f32 %v273_v53, %v10782_v59  ;;  %v904_v1 = vand.u32 4294901760, %v10734_v19  ;;  %v916_v2 = vand.u32 4294901760, %v10738_v24  ;;  %v367_v3 = vand.u32 4294901760, %v10742_v26  ;;  %p10425_p1 = por %p10424_p10, %p10423_p9 }
  0x7a   : > { %9352 = vmatpush1.bf16.msra.mxu1 %v10784_v60  ;;  %v363_v4 = vand.u32 4294901760, %v362_v62  ;;  %v375_v5 = vand.u32 4294901760, %v374_v63  ;;  %v379_v6 = vand.u32 4294901760, %v10745_v28  ;;  %v910_v7 = vand.u32 4294901760, %v10751_v39 }
  0x7b   : > { %v10805_v8 = vand.u32 4294901760, %v10796_v0  ;;  %v905_v10 = vsub.f32 %v10734_v19, %v904_v1  ;;  %v917_v11 = vsub.f32 %v10738_v24, %v916_v2  ;;  %v368_v12 = vsub.f32 %v10742_v26, %v367_v3  ;;  %p10426_p4 = pnand %p10425_p1, %p10419_p7 }
  0x7c   : > { %v9305_v13 = vpack.c.bf16 %v375_v5, %v363_v4  ;;  %v380_v14 = vsub.f32 %v10745_v28, %v379_v6  ;;  %v911_v15 = vsub.f32 %v10751_v39, %v910_v7  ;;  %v922_v20 = vand.u32 4294901760, %v10753_v40 }
  0x7d   : > { %v351_v21 = vsub.f32 %v10796_v0, %v10805_v8  ;;  %v906_v22 = vand.u32 4294901760, %v905_v10  ;;  %v918_v27 = vand.u32 4294901760, %v917_v11  ;;  %v369_v29 = vand.u32 4294901760, %v368_v12 }
  0x7e   : > { %9306 = vmatprep.subr.bf16.mxu0 %v9305_v13  ;;  %v381_v30 = vand.u32 4294901760, %v380_v14  ;;  %v912_v31 = vand.u32 4294901760, %v911_v15  ;;  %v923_v32 = vsub.f32 %v10753_v40, %v922_v20  ;;  %v385_v33 = vand.u32 4294901760, %v10755_v41 }
  0x7f   : > { %v352_v34 = vand.u32 4294901760, %v351_v21  ;;  %v9353_v35 = vpack.c.bf16 %v918_v27, %v906_v22  ;;  %v397_v36 = vand.u32 4294901760, %v10760_v45  ;;  %v928_v37 = vand.u32 4294901760, %v10764_v47 }
  0x80   : > { %v9307_v42 = vpack.c.bf16 %v381_v30, %v369_v29  ;;  %v924_v43 = vand.u32 4294901760, %v923_v32  ;;  %v386_v49 = vsub.f32 %v10755_v41, %v385_v33  ;;  %v940_v51 = vand.u32 4294901760, %v10767_v48 }
  0x81   : > { %353 = vmatmul.mubr.f32.vlgmr.msra.gmra.mrb[0].mxu0 %v352_v34  ;;  %896 = vmatmul.mubr.f32.vlgmr.msra.gmra.mrb[0].mxu1 %v352_v34  ;;  %v398_v52 = vsub.f32 %v10760_v45, %v397_v36  ;;  %v929_v53 = vsub.f32 %v10764_v47, %v928_v37  ;;  %v391_v62 = vand.u32 4294901760, %v10769_v50  ;;  %v403_v63 = vand.u32 4294901760, %v10778_v57 }
  0x82   : > { %9354 = vmatprep.subr.bf16.mxu1 %v9353_v35  ;;  %9308 = vmatpush1.bf16.msra.mxu0 %v9307_v42  ;;  %v9355_v4 = vpack.c.bf16 %v924_v43, %v912_v31  ;;  %v387_v5 = vand.u32 4294901760, %v386_v49  ;;  %v941_v10 = vsub.f32 %v10767_v48, %v940_v51  ;;  %v934_v11 = vand.u32 4294901760, %v10780_v58 }
  0x83   : > { %v399_v12 = vand.u32 4294901760, %v398_v52  ;;  %v930_v13 = vand.u32 4294901760, %v929_v53  ;;  %v392_v14 = vsub.f32 %v10769_v50, %v391_v62  ;;  %v404_v15 = vsub.f32 %v10778_v57, %v403_v63  ;;  %463 = vmatprep.mubr.f32.mxu0 %v10515_v9  ;;  %1006 = vmatprep.mubr.f32.mxu1 %v10515_v9 }
  0x84   : > { %9356 = vmatpush1.bf16.msra.mxu1 %v9355_v4  ;;  %v942_v21 = vand.u32 4294901760, %v941_v10  ;;  %v935_v22 = vsub.f32 %v10780_v58, %v934_v11  ;;  %v946_v27 = vand.u32 4294901760, %v10786_v61  ;;  %v9313_v42 = vpack.c.bf16 %v10732_v18, %v10730_v17 }
  0x85   : > { %v9309_v29 = vpack.c.bf16 %v399_v12, %v387_v5  ;;  %v393_v30 = vand.u32 4294901760, %v392_v14  ;;  %v405_v31 = vand.u32 4294901760, %v404_v15  ;;  %v9361_v52 = vpack.c.bf16 %v10738_v24, %v10734_v19  ;;  %v237_v15 = vld [vmem:[#allocation6 + $0x8] sm:$0xff] }
  0x86   : > { %v9357_v32 = vpack.c.bf16 %v942_v21, %v930_v13  ;;  %v936_v34 = vand.u32 4294901760, %v935_v22  ;;  %v947_v35 = vsub.f32 %v10786_v61, %v946_v27  ;;  %v9315_v53 = vpack.c.bf16 %v10745_v28, %v10742_v26  ;;  %v241_v21 = vld [vmem:[#allocation6 + $0x28] sm:$0xff]  ;;  %v239_v22 = vld [vmem:[#allocation6 + $0x18] sm:$0xff] }
  0x87   : > { %9310 = vmatprep.subr.bf16.mxu0 %v9309_v29  ;;  %v9311_v43 = vpack.c.bf16 %v405_v31, %v393_v30  ;;  %v9317_v5 = vpack.c.bf16 %v10760_v45, %v10755_v41  ;;  %v9363_v10 = vpack.c.bf16 %v10753_v40, %v10751_v39  ;;  %v9365_v12 = vpack.c.bf16 %v10767_v48, %v10764_v47  ;;  %v243_v29 = vld [vmem:[#allocation6 + $0x38] sm:$0xff]  ;;  %v236_v31 = vld [vmem:[#allocation6] sm:$0xff] }
  0x88   : > { %9358 = vmatprep.subr.bf16.mxu1 %v9357_v32  ;;  %v948_v49 = vand.u32 4294901760, %v947_v35  ;;  %v9319_v13 = vpack.c.bf16 %v10778_v57, %v10769_v50  ;;  %v9367_v14 = vpack.c.bf16 %v10786_v61, %v10780_v58  ;;  %v9329_v30 = vpack.c.bf16 %v373_v55, %v361_v54  ;;  %v240_v32 = vld [vmem:[#allocation6 + $0x20] sm:$0xff]  ;;  %v242_v55 = vld [vmem:[#allocation6 + $0x30] sm:$0xff]  ;;  %v247_v47 = vld [vmem:[#allocation6 + $0x58] sm:$0xff] }
  0x89   : > { %9312 = vmatpush1.bf16.msra.mxu0 %v9311_v43  ;;  %v1368_v35 = vand.u32 4294901760, %v241_v21  ;;  %v9377_v43 = vpack.c.bf16 %v916_v2, %v904_v1  ;;  %v9331_v17 = vpack.c.bf16 %v379_v6, %v367_v3  ;;  %v1907_v18 = vand.u32 4294901760, %v239_v22  ;;  %v245_v1 = vld [vmem:[#allocation6 + $0x48] sm:$0xff] }
  0x8a   : > { %v9359_v4 = vpack.c.bf16 %v948_v49, %v936_v34  ;;  %9314 = vmatprep.subr.bf16.mxu0 %v9313_v42  ;;  %v1364_v34 = vand.u32 4294901760, %v237_v15  ;;  %v238_v42 = vld [vmem:[#allocation6 + $0x10] sm:$0xff]  ;;  %v1911_v54 = vand.u32 4294901760, %v243_v29  ;;  %v9379_v19 = vpack.c.bf16 %v922_v20, %v910_v7  ;;  %v249_v2 = vld [vmem:[#allocation6 + $0x68] sm:$0xff]  ;;  %v251_v20 = vld [vmem:[#allocation6 + $0x78] sm:$0xff] }
  0x8b   : > { %v9333_v24 = vpack.c.bf16 %v397_v36, %v385_v33  ;;  %v1366_v26 = vand.u32 4294901760, %v236_v31  ;;  %v1370_v28 = vand.u32 4294901760, %v240_v32  ;;  %v9381_v3 = vpack.c.bf16 %v940_v51, %v928_v37  ;;  %v244_v51 = vld [vmem:[#allocation6 + $0x40] sm:$0xff]  ;;  %v10946_v49 = vld [vmem:[#allocation6 + $0x50] sm:$0xff] }
  0x8c   : > { %9360 = vmatpush1.bf16.msra.mxu1 %v9359_v4  ;;  %465 = vmatmul.mubr.f32.vlgmr.msra.gmra.mrb[0].mxu0 %v10782_v59  ;;  %v9335_v39 = vpack.c.bf16 %v403_v63, %v391_v62  ;;  %v9383_v40 = vpack.c.bf16 %v946_v27, %v934_v11  ;;  %v1909_v41 = vand.u32 4294901760, %v238_v42  ;;  %v10926_v45 = vpack.c.bf16 %v1368_v35, %v1364_v34  ;;  %v248_v62 = vld [vmem:[#allocation6 + $0x60] sm:$0xff] }
  0x8d   : > { %9362 = vmatprep.subr.bf16.mxu1 %v9361_v52  ;;  %9316 = vmatpush1.bf16.msra.mxu0 %v9315_v53  ;;  %v10928_v6 = vsub.f32 %v237_v15, %v1364_v34  ;;  %v1913_v7 = vand.u32 4294901760, %v242_v55  ;;  %v10933_v50 = vsub.f32 %v241_v21, %v1368_v35  ;;  %v10935_v57 = vpack.c.bf16 %v1911_v54, %v1907_v18 }
  0x8e   : > { %9318 = vmatprep.subr.bf16.mxu0 %v9317_v5  ;;  %551 = vmatprep.mubr.f32.mxu0 %v10515_v9  ;;  %v1372_v58 = vand.u32 4294901760, %v245_v1  ;;  %v1376_v61 = vand.u32 4294901760, %v249_v2  ;;  %v10937_v33 = vsub.f32 %v239_v22, %v1907_v18  ;;  %v10939_v36 = vsub.f32 %v243_v29, %v1911_v54  ;;  %v10967_v22 = vld [vmem:[#allocation6 + $0x70] sm:$0xff] }
  0x8f   : > { %1008 = vmatmul.mubr.f32.vlgmr.msra.gmra.mrb[0].mxu1 %v10782_v59  ;;  %v10941_v37 = vpack.c.bf16 %v1370_v28, %v1366_v26  ;;  %v10944_v63 = vsub.f32 %v236_v31, %v1366_v26  ;;  %v1915_v11 = vand.u32 4294901760, %v247_v47  ;;  %v1919_v27 = vand.u32 4294901760, %v251_v20 }
  0x90   : > { %9364 = vmatpush1.bf16.msra.mxu1 %v9363_v10  ;;  %1094 = vmatprep.mubr.f32.mxu1 %v10515_v9  ;;  %v10951_v53 = vsub.f32 %v240_v32, %v1370_v28  ;;  %v10953_v4 = vpack.c.bf16 %v1913_v7, %v1909_v41  ;;  %v10955_v5 = vsub.f32 %v238_v42, %v1909_v41  ;;  %v1450_v15 = vand.u32 4294901760, %v10928_v6 }
  0x91   : > { %9366 = vmatprep.subr.bf16.mxu1 %v9365_v12  ;;  %9320 = vmatpush1.bf16.msra.mxu0 %v9319_v13  ;;  %v10957_v10 = vsub.f32 %v242_v55, %v1913_v7  ;;  %v10960_v12 = vpack.c.bf16 %v1376_v61, %v1372_v58  ;;  %v1374_v13 = vand.u32 4294901760, %v244_v51  ;;  %v10965_v21 = vsub.f32 %v249_v2, %v1376_v61 }
  0x92   : > { %9322 = vmatprep.subr.bf16.mxu0 %v10728_v16  ;;  %v1917_v29 = vand.u32 4294901760, %v10946_v49  ;;  %v10972_v31 = vpack.c.bf16 %v1919_v27, %v1915_v11  ;;  %v10974_v32 = vsub.f32 %v247_v47, %v1915_v11  ;;  %v10976_v34 = vsub.f32 %v251_v20, %v1919_v27 }
  0x93   : > { %v1993_v42 = vand.u32 4294901760, %v10937_v33  ;;  %v1468_v18 = vand.u32 4294901760, %v10951_v53  ;;  %v10988_v54 = vsub.f32 %v244_v51, %v1374_v13  ;;  %v1921_v55 = vand.u32 4294901760, %v10967_v22 }
  0x94   : > { %9368 = vmatpush1.bf16.msra.mxu1 %v9367_v14  ;;  %554 = vmatmul.mubr.f32.vlgmr.msra.gmra.mrb[0].mxu0 %v10796_v0  ;;  %v1378_v14 = vand.u32 4294901760, %v248_v62  ;;  %v12624_v7 = vand.u32 4294901760, %v10957_v10  ;;  %v12618_v47 = vand.u32 4294901760, %v10974_v32 }
  0x95   : > { %9370 = vmatprep.subr.bf16.mxu1 %v10736_v23  ;;  %9324 = vmatpush1.bf16.msra.mxu0 %v10740_v25  ;;  %v1994_v2 = vsub.f32 %v10937_v33, %v1993_v42 }
  0x96   : > { %9326 = vmatprep.subr.bf16.mxu0 %v10758_v44  ;;  %632 = vmatprep.mubr.f32.mxu0 %v10515_v9 }
  0x97   : > { %1097 = vmatmul.mubr.f32.vlgmr.msra.gmra.mrb[0].mxu1 %v10796_v0  ;;  %v235_v0 = vld [vmem:[%s10712_s8] sm:$0xff] }
  0x98   : > { %9372 = vmatpush1.bf16.msra.mxu1 %v10749_v38  ;;  %1175 = vmatprep.mubr.f32.mxu1 %v10515_v9  ;;  %v1362_v48 = vsel %vm271_vm0, %v235_v0, 0  ;;  %v1451_v0 = vsub.f32 %v10928_v6, %v1450_v15 }
  0x99   : > { %9374 = vmatprep.subr.bf16.mxu1 %v10762_v46  ;;  %9328 = vmatpush1.bf16.msra.mxu0 %v10776_v56  ;;  %v10948_v52 = vand.u32 4294901760, %v1362_v48 }
  0x9a   : > { %9330 = vmatprep.subr.bf16.mxu0 %v9329_v30  ;;  %v1462_v30 = vand.u32 4294901760, %v10933_v50  ;;  %v1452_v41 = vand.u32 4294901760, %v1451_v0 }
  0x9b   : > { %v10979_v35 = vsub.f32 %v1362_v48, %v10948_v52  ;;  %v12619_v48 = vand.u32 4294901760, %v10976_v34 }
  0x9c   : > { %9376 = vmatpush1.bf16.msra.mxu1 %v10784_v60  ;;  %636 = vmatmul.mubr.f32.vlgmr.msra.gmra.mrb[0].mxu0 %v10805_v8  ;;  %v1463_v26 = vsub.f32 %v10933_v50, %v1462_v30 }
  0x9d   : > { %9378 = vmatprep.subr.bf16.mxu1 %v9377_v43  ;;  %9332 = vmatpush1.bf16.msra.mxu0 %v9331_v17  ;;  %v2005_v43 = vand.u32 4294901760, %v10939_v36  ;;  %v1456_v17 = vand.u32 4294901760, %v10944_v63  ;;  %v11009_v28 = vand.u32 4294901760, %v10979_v35 }
  0x9e   : > { %9334 = vmatprep.subr.bf16.mxu0 %v9333_v24  ;;  %730 = vmatprep.mubr.f32.mxu0 %v10515_v9  ;;  %v11001_v24 = vsub.f32 %v10946_v49, %v1917_v29  ;;  %v1464_v20 = vand.u32 4294901760, %v1463_v26 }
  0x9f   : > { %1179 = vmatmul.mubr.f32.vlgmr.msra.gmra.mrb[0].mxu1 %v10805_v8  ;;  %v10963_v8 = vsub.f32 %v245_v1, %v1372_v58  ;;  %v12620_v1 = vand.u32 4294901760, %v10965_v21  ;;  %v12622_v58 = vand.u32 4294901760, %v10988_v54  ;;  %v1440_v61 = vsub.f32 %v10979_v35, %v11009_v28 }
  0xa0   : > { %9380 = vmatpush1.bf16.msra.mxu1 %v9379_v19  ;;  %1273 = vmatprep.mubr.f32.mxu1 %v10515_v9  ;;  %v10996_v19 = vsub.f32 %v248_v62, %v1378_v14  ;;  %v1995_v62 = vand.u32 4294901760, %v1994_v2  ;;  %v2023_v0 = vand.u32 4294901760, %v11001_v24 }
  0xa1   : > { %9382 = vmatprep.subr.bf16.mxu1 %v9381_v3  ;;  %9336 = vmatpush1.bf16.msra.mxu0 %v9335_v39  ;;  %v1457_v3 = vsub.f32 %v10944_v63, %v1456_v17  ;;  %v1469_v39 = vsub.f32 %v10951_v53, %v1468_v18  ;;  %v1481_v2 = vsub.f32 %v10988_v54, %v12622_v58 }
  0xa2   : > { %9338 = vmatprep.subr.bf16.mxu0 %v10728_v16  ;;  %v10986_v16 = vpack.c.bf16 %v1378_v14, %v1374_v13  ;;  %v2012_v14 = vsub.f32 %v10957_v10, %v12624_v7 }
  0xa3   : > { %v1458_v27 = vand.u32 4294901760, %v1457_v3  ;;  %v1470_v13 = vand.u32 4294901760, %v1469_v39  ;;  %v9401_v3 = vpack.c.bf16 %v1464_v20, %v1452_v41  ;;  %v2024_v41 = vsub.f32 %v11001_v24, %v2023_v0 }
  0xa4   : > { %9384 = vmatpush1.bf16.msra.mxu1 %v9383_v40  ;;  %732 = vmatmul.mubr.f32.vlgmr.msra.gmra.mrb[0].mxu0 %v10782_v59  ;;  %v11030_v40 = vsub.f32 %v10967_v22, %v1921_v55  ;;  %v2018_v22 = vsub.f32 %v10974_v32, %v12618_v47  ;;  %v2013_v7 = vand.u32 4294901760, %v2012_v14 }
  0xa5   : > { %9386 = vmatprep.subr.bf16.mxu1 %v10736_v23  ;;  %9340 = vmatpush1.bf16.msra.mxu0 %v10740_v25  ;;  %v1999_v23 = vand.u32 4294901760, %v10955_v5  ;;  %v12621_v25 = vand.u32 4294901760, %v10963_v8 }
  0xa6   : > { %9342 = vmatprep.subr.bf16.mxu0 %v10758_v44  ;;  %810 = vmatprep.mubr.f32.mxu0 %v10515_v9  ;;  %v2006_v44 = vsub.f32 %v10939_v36, %v2005_v43  ;;  %v2035_v26 = vand.u32 4294901760, %v11030_v40  ;;  %v2019_v49 = vand.u32 4294901760, %v2018_v22  ;;  %v9463_v14 = vpack.c.bf16 %v11030_v40, %v11001_v24  ;;  %v2454_v22 = vld [vmem:[#allocation6 + $0x108] sm:$0xff] }
  0xa7   : > { %1275 = vmatmul.mubr.f32.vlgmr.msra.gmra.mrb[0].mxu1 %v10782_v59  ;;  %v2000_v51 = vsub.f32 %v10955_v5, %v1999_v23 }
  0xa8   : > { %9388 = vmatpush1.bf16.msra.mxu1 %v10749_v38  ;;  %1353 = vmatprep.mubr.f32.mxu1 %v10515_v9  ;;  %v12623_v38 = vand.u32 4294901760, %v10996_v19  ;;  %v2007_v11 = vand.u32 4294901760, %v2006_v44 }
  0xa9   : > { %9390 = vmatprep.subr.bf16.mxu1 %v10762_v46  ;;  %9344 = vmatpush1.bf16.msra.mxu0 %v10776_v56  ;;  %v1475_v46 = vsub.f32 %v10963_v8, %v12621_v25  ;;  %v1487_v56 = vsub.f32 %v10965_v21, %v12620_v1  ;;  %v1441_v1 = vand.u32 4294901760, %v1440_v61  ;;  %v2001_v58 = vand.u32 4294901760, %v2000_v51 }
  0xaa   : > { %9394 = vmatprep.subr.bf16.mxu0 %v10926_v45  ;;  %v1493_v44 = vsub.f32 %v10996_v19, %v12623_v38  ;;  %v9449_v25 = vpack.c.bf16 %v2007_v11, %v1995_v62  ;;  %v9403_v38 = vpack.c.bf16 %v1470_v13, %v1458_v27  ;;  %v9409_v27 = vpack.c.bf16 %v10933_v50, %v10928_v6 }
  0xab   : > { %v1476_v39 = vand.u32 4294901760, %v1475_v46  ;;  %v1488_v47 = vand.u32 4294901760, %v1487_v56  ;;  %v9451_v51 = vpack.c.bf16 %v2013_v7, %v2001_v58  ;;  %v2025_v46 = vand.u32 4294901760, %v2024_v41  ;;  %v2457_v41 = vld [vmem:[#allocation6 + $0x120] sm:$0xff] }
  0xac   : > { %9392 = vmatpush1.bf16.msra.mxu1 %v10784_v60  ;;  %812 = vmatmul.mubr.f32.vlgmr.msra.gmra.mrb[0].mxu0 %v10782_v59  ;;  %v2030_v60 = vsub.f32 %v10976_v34, %v12619_v48  ;;  %v11077_v48 = vpack.c.bf16 %v1921_v55, %v1917_v29  ;;  %v1482_v55 = vand.u32 4294901760, %v1481_v2  ;;  %v1494_v20 = vand.u32 4294901760, %v1493_v44  ;;  %v2456_v2 = vld [vmem:[#allocation6 + $0x118] sm:$0xff] }
  0xad   : > { %9442 = vmatprep.subr.bf16.mxu1 %v10935_v57  ;;  %9396 = vmatpush1.bf16.msra.mxu0 %v10941_v37  ;;  %v9405_v61 = vpack.c.bf16 %v1488_v47, %v1476_v39  ;;  %v9457_v7 = vpack.c.bf16 %v10939_v36, %v10937_v33  ;;  %v9413_v47 = vpack.c.bf16 %v10965_v21, %v10963_v8  ;;  %v2453_v39 = vld [vmem:[#allocation6 + $0x100] sm:$0xff] }
  0xae   : > { %9398 = vmatprep.subr.bf16.mxu0 %v10960_v12  ;;  %1436 = vmatprep.mubr.f32.mxu0 %v10515_v9  ;;  %v2031_v29 = vand.u32 4294901760, %v2030_v60  ;;  %v9407_v11 = vpack.c.bf16 %v1494_v20, %v1482_v55  ;;  %v9461_v58 = vpack.c.bf16 %v10976_v34, %v10974_v32  ;;  %v2458_v60 = vld [vmem:[#allocation6 + $0x128] sm:$0xff]  ;;  %v9425_v44 = vpack.c.bf16 %v1462_v30, %v1450_v15  ;;  %v2455_v30 = vld [vmem:[#allocation6 + $0x110] sm:$0xff] }
  0xaf   : > { %1355 = vmatmul.mubr.f32.vlgmr.msra.gmra.mrb[0].mxu1 %v10782_v59  ;;  %v2036_v59 = vsub.f32 %v11030_v40, %v2035_v26  ;;  %v9473_v6 = vpack.c.bf16 %v2005_v43, %v1993_v42  ;;  %v9427_v50 = vpack.c.bf16 %v1468_v18, %v1456_v17  ;;  %v3015_v15 = vand.u32 4294901760, %v2456_v2  ;;  %v2462_v43 = vld [vmem:[#allocation6 + $0x148] sm:$0xff] }
  0xb0   : > { %9444 = vmatpush1.bf16.msra.mxu1 %v10953_v4  ;;  %1979 = vmatprep.mubr.f32.mxu1 %v10515_v9  ;;  %v9453_v62 = vpack.c.bf16 %v2031_v29, %v2019_v49  ;;  %v2476_v49 = vand.u32 4294901760, %v2458_v60  ;;  %v12679_v29 = vand.u32 4294901760, %v10957_v10  ;;  %v2474_v36 = vand.u32 4294901760, %v2453_v39 }
  0xb1   : > { %9446 = vmatprep.subr.bf16.mxu1 %v10972_v31  ;;  %9400 = vmatpush1.bf16.msra.mxu0 %v10986_v16  ;;  %v2037_v56 = vand.u32 4294901760, %v2036_v59  ;;  %v2472_v59 = vand.u32 4294901760, %v2454_v22  ;;  %v2478_v42 = vand.u32 4294901760, %v2457_v41  ;;  %v12681_v17 = vand.u32 4294901760, %v10965_v21 }
  0xb2   : > { %9402 = vmatprep.subr.bf16.mxu0 %v9401_v3  ;;  %v2460_v3 = vld [vmem:[#allocation6 + $0x138] sm:$0xff]  ;;  %v9475_v33 = vpack.c.bf16 %v12679_v29, %v1999_v23  ;;  %v12682_v20 = vand.u32 4294901760, %v10974_v32  ;;  %v2480_v24 = vand.u32 4294901760, %v2462_v43 }
  0xb3   : > { %v9455_v13 = vpack.c.bf16 %v2037_v56, %v2025_v46  ;;  %v3019_v55 = vand.u32 4294901760, %v2460_v3  ;;  %v9479_v46 = vpack.c.bf16 %v2035_v26, %v2023_v0  ;;  %v2466_v56 = vld [vmem:[#allocation6 + $0x168] sm:$0xff]  ;;  %v11158_v21 = vsub.f32 %v2454_v22, %v2472_v59 }
  0xb4   : > { %9448 = vmatpush1.bf16.msra.mxu1 %v11077_v48  ;;  %1442 = vmatmul.mubr.f32.vlgmr.msra.gmra.mrb[0].mxu0 %v1441_v1 }
  0xb5   : > { %9450 = vmatprep.subr.bf16.mxu1 %v9449_v25  ;;  %9404 = vmatpush1.bf16.msra.mxu0 %v9403_v38  ;;  %v9411_v25 = vpack.c.bf16 %v10951_v53, %v10944_v63  ;;  %v9415_v38 = vpack.c.bf16 %v10996_v19, %v10988_v54  ;;  %v9278_v63 = vld [vmem:[%s10712_s8 + $0x10] sm:$0xff]  ;;  %v12680_v53 = vand.u32 4294901760, %v10963_v8  ;;  %v11156_v8 = vpack.c.bf16 %v2476_v49, %v2472_v59 }
  0xb6   : > { %9406 = vmatprep.subr.bf16.mxu0 %v9405_v61  ;;  %1552 = vmatprep.mubr.f32.mxu0 %v10515_v9  ;;  %v12683_v61 = vand.u32 4294901760, %v10976_v34  ;;  %v2468_v34 = vld [vmem:[#allocation6 + $0x178] sm:$0xff]  ;;  %v2470_v40 = vsel %vm271_vm0, %v9278_v63, 0  ;;  %v11167_v0 = vpack.c.bf16 %v3019_v55, %v3015_v15  ;;  %v11169_v26 = vsub.f32 %v2460_v3, %v3019_v55 }
  0xb7   : > { %1985 = vmatmul.mubr.f32.vlgmr.msra.gmra.mrb[0].mxu1 %v1441_v1  ;;  %v9459_v1 = vpack.c.bf16 %v10957_v10, %v10955_v5  ;;  %v9429_v18 = vpack.c.bf16 %v12681_v17, %v12680_v53  ;;  %v12684_v5 = vand.u32 4294901760, %v10988_v54  ;;  %v12685_v10 = vand.u32 4294901760, %v10996_v19 }
  0xb8   : > { %9452 = vmatpush1.bf16.msra.mxu1 %v9451_v51  ;;  %2095 = vmatprep.mubr.f32.mxu1 %v10515_v9  ;;  %v9477_v51 = vpack.c.bf16 %v12683_v61, %v12682_v20  ;;  %v11162_v54 = vsub.f32 %v2458_v60, %v2476_v49  ;;  %v11164_v19 = vsub.f32 %v2456_v2, %v3015_v15  ;;  %v2558_v59 = vand.u32 4294901760, %v11158_v21 }
  0xb9   : > { %9454 = vmatprep.subr.bf16.mxu1 %v9453_v62  ;;  %9408 = vmatpush1.bf16.msra.mxu0 %v9407_v11  ;;  %v9431_v23 = vpack.c.bf16 %v12685_v10, %v12684_v5  ;;  %v3017_v62 = vand.u32 4294901760, %v2455_v30  ;;  %v2464_v11 = vld [vmem:[#allocation6 + $0x158] sm:$0xff]  ;;  %v11190_v3 = vsub.f32 %v2462_v43, %v2480_v24 }
  0xba   : > { %9410 = vmatprep.subr.bf16.mxu0 %v9409_v27  ;;  %v11171_v27 = vpack.c.bf16 %v2478_v42, %v2474_v36  ;;  %v2570_v15 = vand.u32 4294901760, %v11162_v54  ;;  %v2559_v17 = vsub.f32 %v11158_v21, %v2558_v59 }
  0xbb   : > { %v11183_v60 = vsub.f32 %v2455_v30, %v3017_v62 }
  0xbc   : > { %9456 = vmatpush1.bf16.msra.mxu1 %v9455_v13  ;;  %1554 = vmatmul.mubr.f32.vlgmr.msra.gmra.mrb[0].mxu0 %v10948_v52  ;;  %v2484_v13 = vand.u32 4294901760, %v2466_v56  ;;  %v2571_v61 = vsub.f32 %v11162_v54, %v2570_v15 }
  0xbd   : > { %9458 = vmatprep.subr.bf16.mxu1 %v9457_v7  ;;  %9412 = vmatpush1.bf16.msra.mxu0 %v9411_v25  ;;  %v2461_v7 = vld [vmem:[#allocation6 + $0x140] sm:$0xff] }
  0xbe   : > { %9414 = vmatprep.subr.bf16.mxu0 %v9413_v47  ;;  %1640 = vmatprep.mubr.f32.mxu0 %v10515_v9  ;;  %v2465_v25 = vld [vmem:[#allocation6 + $0x160] sm:$0xff]  ;;  %v11174_v47 = vsub.f32 %v2453_v39, %v2474_v36  ;;  %v2482_v39 = vand.u32 4294901760, %v2461_v7  ;;  %v11195_v49 = vsub.f32 %v2466_v56, %v2484_v13  ;;  %v3113_v36 = vand.u32 4294901760, %v11169_v26 }
  0xbf   : > { %2097 = vmatmul.mubr.f32.vlgmr.msra.gmra.mrb[0].mxu1 %v10948_v52 }
  0xc0   : > { %9460 = vmatpush1.bf16.msra.mxu1 %v9459_v1  ;;  %2183 = vmatprep.mubr.f32.mxu1 %v10515_v9  ;;  %v11176_v1 = vsub.f32 %v2457_v41, %v2478_v42  ;;  %v2486_v41 = vand.u32 4294901760, %v2465_v25  ;;  %v2564_v42 = vand.u32 4294901760, %v11174_v47  ;;  %v11218_v63 = vsub.f32 %v2461_v7, %v2482_v39 }
  0xc1   : > { %9462 = vmatprep.subr.bf16.mxu1 %v9461_v58  ;;  %9416 = vmatpush1.bf16.msra.mxu0 %v9415_v38  ;;  %v3023_v58 = vand.u32 4294901760, %v2464_v11  ;;  %v3027_v38 = vand.u32 4294901760, %v2468_v34  ;;  %v12627_v5 = vand.u32 4294901760, %v11195_v49 }
  0xc2   : > { %9418 = vmatprep.subr.bf16.mxu0 %v10926_v45  ;;  %v2576_v43 = vand.u32 4294901760, %v11176_v1 }
  0xc3   : > { %v11202_v30 = vpack.c.bf16 %v3027_v38, %v3023_v58  ;;  %v11206_v29 = vsub.f32 %v2468_v34, %v3027_v38  ;;  %v2572_v34 = vand.u32 4294901760, %v2571_v61 }
  0xc4   : > { %9464 = vmatpush1.bf16.msra.mxu1 %v9463_v14  ;;  %1643 = vmatmul.mubr.f32.vlgmr.msra.gmra.mrb[0].mxu0 %v10979_v35  ;;  %v11178_v14 = vld [vmem:[#allocation6 + $0x150] sm:$0xff] }
  0xc5   : > { %9466 = vmatprep.subr.bf16.mxu1 %v10935_v57  ;;  %9420 = vmatpush1.bf16.msra.mxu0 %v10941_v37 }
  0xc6   : > { %9422 = vmatprep.subr.bf16.mxu0 %v10960_v12  ;;  %1721 = vmatprep.mubr.f32.mxu0 %v10515_v9 }
  0xc7   : > { %2186 = vmatmul.mubr.f32.vlgmr.msra.gmra.mrb[0].mxu1 %v10979_v35  ;;  %v2459_v35 = vld [vmem:[#allocation6 + $0x130] sm:$0xff] }
  0xc8   : > { %9468 = vmatpush1.bf16.msra.mxu1 %v10953_v4  ;;  %2264 = vmatprep.mubr.f32.mxu1 %v10515_v9  ;;  %v3021_v32 = vand.u32 4294901760, %v2459_v35 }
  0xc9   : > { %9470 = vmatprep.subr.bf16.mxu1 %v10972_v31  ;;  %9424 = vmatpush1.bf16.msra.mxu0 %v10986_v16 }
  0xca   : > { %9426 = vmatprep.subr.bf16.mxu0 %v9425_v44  ;;  %v11181_v22 = vpack.c.bf16 %v3021_v32, %v3017_v62  ;;  %v11185_v2 = vsub.f32 %v2459_v35, %v3021_v32  ;;  %v11187_v44 = vand.u32 4294901760, %v2470_v40  ;;  %v11204_v35 = vsub.f32 %v2464_v11, %v3023_v58 }
  0xcb   : > { %v2560_v62 = vand.u32 4294901760, %v2559_v17 }
  0xcc   : > { %9472 = vmatpush1.bf16.msra.mxu1 %v11077_v48  ;;  %1725 = vmatmul.mubr.f32.vlgmr.msra.gmra.mrb[0].mxu0 %v11009_v28  ;;  %v11210_v55 = vsub.f32 %v2470_v40, %v11187_v44  ;;  %v12631_v32 = vand.u32 4294901760, %v11185_v2  ;;  %v12625_v11 = vand.u32 4294901760, %v11204_v35  ;;  %v12629_v40 = vand.u32 4294901760, %v11218_v63 }
  0xcd   : > { %9474 = vmatprep.subr.bf16.mxu1 %v9473_v6  ;;  %9428 = vmatpush1.bf16.msra.mxu0 %v9427_v50  ;;  %v11197_v6 = vld [vmem:[#allocation6 + $0x170] sm:$0xff]  ;;  %v3025_v50 = vand.u32 4294901760, %v11178_v14 }
  0xce   : > { %9430 = vmatprep.subr.bf16.mxu0 %v9429_v18  ;;  %1819 = vmatprep.mubr.f32.mxu0 %v10515_v9  ;;  %v3029_v53 = vand.u32 4294901760, %v11197_v6  ;;  %v11226_v18 = vsub.f32 %v2465_v25, %v2486_v41  ;;  %v11246_v10 = vand.u32 4294901760, %v11210_v55 }
  0xcf   : > { %2268 = vmatmul.mubr.f32.vlgmr.msra.gmra.mrb[0].mxu1 %v11009_v28  ;;  %v11193_v28 = vpack.c.bf16 %v2484_v13, %v2480_v24  ;;  %v11231_v20 = vsub.f32 %v11178_v14, %v3025_v50  ;;  %v12626_v24 = vand.u32 4294901760, %v11206_v29 }
  0xd0   : > { %9476 = vmatpush1.bf16.msra.mxu1 %v9475_v33  ;;  %2362 = vmatprep.mubr.f32.mxu1 %v10515_v9  ;;  %v3101_v33 = vand.u32 4294901760, %v11164_v19  ;;  %v11260_v56 = vsub.f32 %v11197_v6, %v3029_v53  ;;  %v2548_v25 = vsub.f32 %v11210_v55, %v11246_v10  ;;  %v3126_v6 = vsub.f32 %v11204_v35, %v12625_v11 }
  0xd1   : > { %9478 = vmatprep.subr.bf16.mxu1 %v9477_v51  ;;  %9432 = vmatpush1.bf16.msra.mxu0 %v9431_v23  ;;  %v12628_v51 = vand.u32 4294901760, %v11190_v3  ;;  %v2565_v23 = vsub.f32 %v11174_v47, %v2564_v42  ;;  %v3131_v17 = vand.u32 4294901760, %v11231_v20 }
  0xd2   : > { %9434 = vmatprep.subr.bf16.mxu0 %v10926_v45  ;;  %v11216_v45 = vpack.c.bf16 %v2486_v41, %v2482_v39  ;;  %v3120_v41 = vsub.f32 %v11185_v2, %v12631_v32  ;;  %v3143_v61 = vand.u32 4294901760, %v11260_v56  ;;  %v3127_v14 = vand.u32 4294901760, %v3126_v6  ;;  %v3566_v6 = vld [vmem:[#allocation6 + $0x188] sm:$0xff] }
  0xd3   : > { %v2566_v38 = vand.u32 4294901760, %v2565_v23  ;;  %v9497_v23 = vpack.c.bf16 %v2572_v34, %v2560_v62  ;;  %v3132_v62 = vsub.f32 %v11231_v20, %v3131_v17 }
  0xd4   : > { %9480 = vmatpush1.bf16.msra.mxu1 %v9479_v46  ;;  %1821 = vmatmul.mubr.f32.vlgmr.msra.gmra.mrb[0].mxu0 %v10948_v52  ;;  %v2577_v46 = vsub.f32 %v11176_v1, %v2576_v43  ;;  %v3121_v32 = vand.u32 4294901760, %v3120_v41  ;;  %v9559_v41 = vpack.c.bf16 %v11260_v56, %v11231_v20 }
  0xd5   : > { %9482 = vmatprep.subr.bf16.mxu1 %v10935_v57  ;;  %9436 = vmatpush1.bf16.msra.mxu0 %v10941_v37  ;;  %v3102_v57 = vsub.f32 %v11164_v19, %v3101_v33  ;;  %v3107_v37 = vand.u32 4294901760, %v11183_v60 }
  0xd6   : > { %9438 = vmatprep.subr.bf16.mxu0 %v10960_v12  ;;  %1899 = vmatprep.mubr.f32.mxu0 %v10515_v9  ;;  %v3114_v12 = vsub.f32 %v11169_v26, %v3113_v36  ;;  %v2578_v39 = vand.u32 4294901760, %v2577_v46 }
  0xd7   : > { %2364 = vmatmul.mubr.f32.vlgmr.msra.gmra.mrb[0].mxu1 %v10948_v52  ;;  %v3103_v13 = vand.u32 4294901760, %v3102_v57  ;;  %v3108_v7 = vsub.f32 %v11183_v60, %v3107_v37  ;;  %v2589_v57 = vsub.f32 %v11218_v63, %v12629_v40 }
  0xd8   : > { %9484 = vmatpush1.bf16.msra.mxu1 %v10953_v4  ;;  %2442 = vmatprep.mubr.f32.mxu1 %v10515_v9  ;;  %v12630_v4 = vand.u32 4294901760, %v11226_v18  ;;  %v3115_v58 = vand.u32 4294901760, %v3114_v12 }
  0xd9   : > { %9486 = vmatprep.subr.bf16.mxu1 %v10972_v31  ;;  %9440 = vmatpush1.bf16.msra.mxu0 %v10986_v16  ;;  %v2583_v31 = vsub.f32 %v11190_v3, %v12628_v51  ;;  %v2595_v16 = vsub.f32 %v11195_v49, %v12627_v5  ;;  %v2549_v5 = vand.u32 4294901760, %v2548_v25  ;;  %v3109_v40 = vand.u32 4294901760, %v3108_v7 }
  0xda   : > { %9490 = vmatprep.subr.bf16.mxu0 %v11156_v8  ;;  %v2601_v12 = vsub.f32 %v11226_v18, %v12630_v4  ;;  %v9545_v51 = vpack.c.bf16 %v3115_v58, %v3103_v13  ;;  %v9499_v4 = vpack.c.bf16 %v2578_v39, %v2566_v38  ;;  %v9505_v38 = vpack.c.bf16 %v11162_v54, %v11158_v21  ;;  %v3567_v54 = vld [vmem:[#allocation6 + $0x190] sm:$0xff] }
  0xdb   : > { %v2584_v46 = vand.u32 4294901760, %v2583_v31  ;;  %v2596_v11 = vand.u32 4294901760, %v2595_v16  ;;  %v9547_v7 = vpack.c.bf16 %v3121_v32, %v3109_v40  ;;  %v3133_v31 = vand.u32 4294901760, %v3132_v62 }
  0xdc   : > { %9488 = vmatpush1.bf16.msra.mxu1 %v11077_v48  ;;  %1901 = vmatmul.mubr.f32.vlgmr.msra.gmra.mrb[0].mxu0 %v10948_v52  ;;  %v3138_v48 = vsub.f32 %v11206_v29, %v12626_v24  ;;  %v11307_v24 = vpack.c.bf16 %v3029_v53, %v3025_v50  ;;  %v2590_v53 = vand.u32 4294901760, %v2589_v57  ;;  %v2602_v34 = vand.u32 4294901760, %v2601_v12  ;;  %v3568_v57 = vld [vmem:[#allocation6 + $0x198] sm:$0xff] }
  0xdd   : > { %9538 = vmatprep.subr.bf16.mxu1 %v11167_v0  ;;  %9492 = vmatpush1.bf16.msra.mxu0 %v11171_v27  ;;  %v9501_v13 = vpack.c.bf16 %v2596_v11, %v2584_v46  ;;  %v9553_v32 = vpack.c.bf16 %v11169_v26, %v11164_v19  ;;  %v9509_v11 = vpack.c.bf16 %v11195_v49, %v11190_v3  ;;  %v3584_v46 = vand.u32 4294901760, %v3566_v6 }
  0xde   : > { %9494 = vmatprep.subr.bf16.mxu0 %v11193_v28  ;;  %2544 = vmatprep.mubr.f32.mxu0 %v10515_v9  ;;  %v3139_v50 = vand.u32 4294901760, %v3138_v48  ;;  %v9503_v58 = vpack.c.bf16 %v2602_v34, %v2590_v53  ;;  %v9557_v40 = vpack.c.bf16 %v11206_v29, %v11204_v35  ;;  %v3570_v48 = vld [vmem:[#allocation6 + $0x1a8] sm:$0xff]  ;;  %v9521_v12 = vpack.c.bf16 %v2570_v15, %v2558_v59  ;;  %v3571_v59 = vld [vmem:[#allocation6 + $0x1b0] sm:$0xff]  ;;  %v9279_v34 = vld [vmem:[%s10712_s8 + $0x18] sm:$0xff] }
  0xdf   : > { %2444 = vmatmul.mubr.f32.vlgmr.msra.gmra.mrb[0].mxu1 %v10948_v52  ;;  %v3144_v52 = vsub.f32 %v11260_v56, %v3143_v61  ;;  %v3588_v62 = vand.u32 4294901760, %v3570_v48  ;;  %v9569_v21 = vpack.c.bf16 %v3113_v36, %v3101_v33  ;;  %v9523_v15 = vpack.c.bf16 %v2576_v43, %v2564_v42 }
  0xe0   : > { %9540 = vmatpush1.bf16.msra.mxu1 %v11181_v22  ;;  %3087 = vmatprep.mubr.f32.mxu1 %v10515_v9  ;;  %v9549_v25 = vpack.c.bf16 %v3139_v50, %v3127_v14  ;;  %v3569_v14 = vld [vmem:[#allocation6 + $0x1a0] sm:$0xff]  ;;  %v4127_v50 = vand.u32 4294901760, %v3568_v57  ;;  %v12687_v26 = vand.u32 4294901760, %v11190_v3  ;;  %v12688_v33 = vand.u32 4294901760, %v11195_v49  ;;  %v3578_v3 = vld [vmem:[#allocation6 + $0x1e8] sm:$0xff] }
  0xe1   : > { %9542 = vmatprep.subr.bf16.mxu1 %v11202_v30  ;;  %9496 = vmatpush1.bf16.msra.mxu0 %v11216_v45  ;;  %v3145_v16 = vand.u32 4294901760, %v3144_v52  ;;  %v3565_v52 = vld [vmem:[#allocation6 + $0x180] sm:$0xff]  ;;  %v3590_v43 = vand.u32 4294901760, %v3569_v14  ;;  %v9575_v49 = vpack.c.bf16 %v3143_v61, %v3131_v17  ;;  %v3582_v20 = vsel %vm271_vm0, %v9279_v34, 0 }
  0xe2   : > { %9498 = vmatprep.subr.bf16.mxu0 %v9497_v23  ;;  %v3572_v23 = vld [vmem:[#allocation6 + $0x1b8] sm:$0xff]  ;;  %v9525_v36 = vpack.c.bf16 %v12688_v33, %v12687_v26 }
  0xe3   : > { %v9551_v39 = vpack.c.bf16 %v3145_v16, %v3133_v31  ;;  %v4131_v53 = vand.u32 4294901760, %v3572_v23  ;;  %v11386_v31 = vpack.c.bf16 %v3588_v62, %v3584_v46  ;;  %v4133_v16 = vand.u32 4294901760, %v3571_v59 }
  0xe4   : > { %9544 = vmatpush1.bf16.msra.mxu1 %v11307_v24  ;;  %2550 = vmatmul.mubr.f32.vlgmr.msra.gmra.mrb[0].mxu0 %v2549_v5 }
  0xe5   : > { %9546 = vmatprep.subr.bf16.mxu1 %v9545_v51  ;;  %9500 = vmatpush1.bf16.msra.mxu0 %v9499_v4  ;;  %v9507_v51 = vpack.c.bf16 %v11176_v1, %v11174_v47  ;;  %v9511_v4 = vpack.c.bf16 %v11226_v18, %v11218_v63  ;;  %v12690_v47 = vand.u32 4294901760, %v11206_v29  ;;  %v12691_v1 = vand.u32 4294901760, %v11218_v63  ;;  %v3576_v29 = vld [vmem:[#allocation6 + $0x1d8] sm:$0xff] }
  0xe6   : > { %9502 = vmatprep.subr.bf16.mxu0 %v9501_v13  ;;  %2660 = vmatprep.mubr.f32.mxu0 %v10515_v9  ;;  %v12689_v13 = vand.u32 4294901760, %v11204_v35  ;;  %v4129_v35 = vand.u32 4294901760, %v3567_v54  ;;  %v11390_v63 = vsub.f32 %v3566_v6, %v3584_v46  ;;  %v11397_v56 = vpack.c.bf16 %v4131_v53, %v4127_v50 }
  0xe7   : > { %3093 = vmatmul.mubr.f32.vlgmr.msra.gmra.mrb[0].mxu1 %v2549_v5  ;;  %v9555_v5 = vpack.c.bf16 %v11185_v2, %v11183_v60  ;;  %v12692_v60 = vand.u32 4294901760, %v11226_v18  ;;  %v11392_v18 = vsub.f32 %v3570_v48, %v3588_v62  ;;  %v11399_v17 = vsub.f32 %v3572_v23, %v4131_v53 }
  0xe8   : > { %9548 = vmatpush1.bf16.msra.mxu1 %v9547_v7  ;;  %3203 = vmatprep.mubr.f32.mxu1 %v10515_v9  ;;  %v9573_v7 = vpack.c.bf16 %v12690_v47, %v12689_v13  ;;  %v11411_v6 = vpack.c.bf16 %v4133_v16, %v4129_v35  ;;  %v11413_v48 = vsub.f32 %v3567_v54, %v4129_v35  ;;  %v3670_v62 = vand.u32 4294901760, %v11390_v63 }
  0xe9   : > { %9550 = vmatprep.subr.bf16.mxu1 %v9549_v25  ;;  %9504 = vmatpush1.bf16.msra.mxu0 %v9503_v58  ;;  %v9527_v42 = vpack.c.bf16 %v12692_v60, %v12691_v1  ;;  %v3580_v25 = vld [vmem:[#allocation6 + $0x1f8] sm:$0xff]  ;;  %v11394_v58 = vsub.f32 %v3568_v57, %v4127_v50  ;;  %v11415_v57 = vand.u32 4294901760, %v3582_v20  ;;  %v4225_v26 = vand.u32 4294901760, %v11399_v17 }
  0xea   : > { %9506 = vmatprep.subr.bf16.mxu0 %v9505_v38  ;;  %v3596_v38 = vand.u32 4294901760, %v3578_v3  ;;  %v3671_v13 = vsub.f32 %v11390_v63, %v3670_v62  ;;  %v4219_v60 = vand.u32 4294901760, %v11413_v48 }
  0xec   : > { %9552 = vmatpush1.bf16.msra.mxu1 %v9551_v39  ;;  %2662 = vmatmul.mubr.f32.vlgmr.msra.gmra.mrb[0].mxu0 %v11187_v44  ;;  %v3573_v39 = vld [vmem:[#allocation6 + $0x1c0] sm:$0xff]  ;;  %v3672_v35 = vand.u32 4294901760, %v3671_v13 }
  0xed   : > { %9554 = vmatprep.subr.bf16.mxu1 %v9553_v32  ;;  %9508 = vmatpush1.bf16.msra.mxu0 %v9507_v51  ;;  %v3577_v32 = vld [vmem:[#allocation6 + $0x1e0] sm:$0xff]  ;;  %v3594_v23 = vand.u32 4294901760, %v3573_v39 }
  0xee   : > { %9510 = vmatprep.subr.bf16.mxu0 %v9509_v11  ;;  %2748 = vmatprep.mubr.f32.mxu0 %v10515_v9  ;;  %v3598_v46 = vand.u32 4294901760, %v3577_v32 }
  0xef   : > { %3205 = vmatmul.mubr.f32.vlgmr.msra.gmra.mrb[0].mxu1 %v11187_v44  ;;  %v11454_v47 = vsub.f32 %v3573_v39, %v3594_v23 }
  0xf0   : > { %9556 = vmatpush1.bf16.msra.mxu1 %v9555_v5  ;;  %3291 = vmatprep.mubr.f32.mxu1 %v10515_v9  ;;  %v4135_v5 = vand.u32 4294901760, %v3576_v29  ;;  %v11446_v53 = vpack.c.bf16 %v3598_v46, %v3594_v23 }
  0xf1   : > { %9558 = vmatprep.subr.bf16.mxu1 %v9557_v40  ;;  %9512 = vmatpush1.bf16.msra.mxu0 %v9511_v4  ;;  %v4139_v40 = vand.u32 4294901760, %v3580_v25  ;;  %v11406_v4 = vld [vmem:[#allocation6 + $0x1d0] sm:$0xff] }
  0xf2   : > { %9514 = vmatprep.subr.bf16.mxu0 %v11156_v8  ;;  %v4137_v50 = vand.u32 4294901760, %v11406_v4 }
  0xf3   : > { %v11431_v54 = vpack.c.bf16 %v4139_v40, %v4135_v5 }
  0xf4   : > { %9560 = vmatpush1.bf16.msra.mxu1 %v9559_v41  ;;  %2751 = vmatmul.mubr.f32.vlgmr.msra.gmra.mrb[0].mxu0 %v11210_v55  ;;  %v11409_v41 = vsub.f32 %v3569_v14, %v3590_v43  ;;  %v11425_v14 = vsub.f32 %v3578_v3, %v3596_v38  ;;  %v11461_v1 = vsub.f32 %v11406_v4, %v4137_v50 }
  0xf5   : > { %9562 = vmatprep.subr.bf16.mxu1 %v11167_v0  ;;  %9516 = vmatpush1.bf16.msra.mxu0 %v11171_v27 }
  0xf6   : > { %9518 = vmatprep.subr.bf16.mxu0 %v11193_v28  ;;  %2829 = vmatprep.mubr.f32.mxu0 %v10515_v9  ;;  %v4243_v13 = vand.u32 4294901760, %v11461_v1 }
  0xf7   : > { %3294 = vmatmul.mubr.f32.vlgmr.msra.gmra.mrb[0].mxu1 %v11210_v55  ;;  %v12686_v55 = vand.u32 4294901760, %v11185_v2  ;;  %v3586_v2 = vand.u32 4294901760, %v3565_v52 }
  0xf8   : > { %9564 = vmatpush1.bf16.msra.mxu1 %v11181_v22  ;;  %3372 = vmatprep.mubr.f32.mxu1 %v10515_v9 }
  0xf9   : > { %9566 = vmatprep.subr.bf16.mxu1 %v11202_v30  ;;  %9520 = vmatpush1.bf16.msra.mxu0 %v11216_v45  ;;  %v9571_v19 = vpack.c.bf16 %v12686_v55, %v3107_v37  ;;  %v3574_v37 = vld [vmem:[#allocation6 + $0x1c8] sm:$0xff]  ;;  %v11402_v51 = vpack.c.bf16 %v3590_v43, %v3586_v2  ;;  %v11404_v11 = vsub.f32 %v3565_v52, %v3586_v2  ;;  %v4213_v55 = vand.u32 4294901760, %v11394_v58 }
  0xfa   : > { %9522 = vmatprep.subr.bf16.mxu0 %v9521_v12  ;;  %v3592_v61 = vand.u32 4294901760, %v3574_v37  ;;  %v11418_v12 = vsub.f32 %v3571_v59, %v4133_v16  ;;  %v11433_v59 = vsub.f32 %v3576_v29, %v4135_v5  ;;  %v12634_v2 = vand.u32 4294901760, %v11425_v14 }
  0xfb   : > { %v3676_v33 = vand.u32 4294901760, %v11404_v11 }
  0xfc   : > { %9568 = vmatpush1.bf16.msra.mxu1 %v11307_v24  ;;  %2833 = vmatmul.mubr.f32.vlgmr.msra.gmra.mrb[0].mxu0 %v11246_v10  ;;  %v11423_v52 = vsub.f32 %v3574_v37, %v3592_v61  ;;  %v12638_v16 = vand.u32 4294901760, %v11418_v12  ;;  %v12632_v29 = vand.u32 4294901760, %v11433_v59 }
  0xfd   : > { %9570 = vmatprep.subr.bf16.mxu1 %v9569_v21  ;;  %9524 = vmatpush1.bf16.msra.mxu0 %v9523_v15  ;;  %v11427_v21 = vld [vmem:[#allocation6 + $0x1f0] sm:$0xff]  ;;  %v3682_v15 = vand.u32 4294901760, %v11392_v18  ;;  %v3677_v37 = vsub.f32 %v11404_v11, %v3676_v33 }
  0xfe   : > { %9526 = vmatprep.subr.bf16.mxu0 %v9525_v36  ;;  %2927 = vmatprep.mubr.f32.mxu0 %v10515_v9  ;;  %v3688_v36 = vand.u32 4294901760, %v11409_v41  ;;  %v4141_v34 = vand.u32 4294901760, %v11427_v21 }
  0xff   : > { %3376 = vmatmul.mubr.f32.vlgmr.msra.gmra.mrb[0].mxu1 %v11246_v10  ;;  %v11421_v10 = vpack.c.bf16 %v3596_v38, %v3592_v61 }
 0x100   : > { %9572 = vmatpush1.bf16.msra.mxu1 %v9571_v19  ;;  %3470 = vmatprep.mubr.f32.mxu1 %v10515_v9  ;;  %v11438_v19 = vsub.f32 %v3582_v20, %v11415_v57  ;;  %v3689_v3 = vsub.f32 %v11409_v41, %v3688_v36  ;;  %v12636_v20 = vand.u32 4294901760, %v11454_v47 }
 0x101   : > { %9574 = vmatprep.subr.bf16.mxu1 %v9573_v7  ;;  %9528 = vmatpush1.bf16.msra.mxu0 %v9527_v42  ;;  %v11456_v7 = vsub.f32 %v3577_v32, %v3598_v46  ;;  %v12635_v42 = vand.u32 4294901760, %v11423_v52  ;;  %v4232_v46 = vsub.f32 %v11418_v12, %v12638_v16 }
 0x102   : > { %9530 = vmatprep.subr.bf16.mxu0 %v11156_v8  ;;  %v11444_v8 = vsub.f32 %v3580_v25, %v4139_v40  ;;  %v11476_v43 = vand.u32 4294901760, %v11438_v19  ;;  %v4220_v25 = vsub.f32 %v11413_v48, %v4219_v60  ;;  %v3678_v40 = vand.u32 4294901760, %v3677_v37 }
 0x103   : > { %v12637_v61 = vand.u32 4294901760, %v11456_v7  ;;  %v3690_v23 = vand.u32 4294901760, %v3689_v3  ;;  %v4233_v16 = vand.u32 4294901760, %v4232_v46 }
 0x104   : > { %9576 = vmatpush1.bf16.msra.mxu1 %v9575_v49  ;;  %2929 = vmatmul.mubr.f32.vlgmr.msra.gmra.mrb[0].mxu0 %v11187_v44  ;;  %v11490_v49 = vsub.f32 %v11427_v21, %v4141_v34  ;;  %v3660_v32 = vsub.f32 %v11438_v19, %v11476_v43  ;;  %v4238_v21 = vsub.f32 %v11433_v59, %v12632_v29 }
 0x105   : > { %9578 = vmatprep.subr.bf16.mxu1 %v11167_v0  ;;  %9532 = vmatpush1.bf16.msra.mxu0 %v11171_v27  ;;  %v3683_v0 = vsub.f32 %v11392_v18, %v3682_v15  ;;  %v4214_v27 = vsub.f32 %v11394_v58, %v4213_v55 }
 0x106   : > { %9534 = vmatprep.subr.bf16.mxu0 %v11193_v28  ;;  %3007 = vmatprep.mubr.f32.mxu0 %v10515_v9  ;;  %v4226_v28 = vsub.f32 %v11399_v17, %v4225_v26  ;;  %v4239_v4 = vand.u32 4294901760, %v4238_v21  ;;  %v9655_v46 = vpack.c.bf16 %v11490_v49, %v11461_v1  ;;  %v4678_v21 = vld [vmem:[#allocation6 + $0x208] sm:$0xff] }
 0x107   : > { %3472 = vmatmul.mubr.f32.vlgmr.msra.gmra.mrb[0].mxu1 %v11187_v44  ;;  %v3684_v38 = vand.u32 4294901760, %v3683_v0  ;;  %v4215_v39 = vand.u32 4294901760, %v4214_v27  ;;  %v4255_v0 = vand.u32 4294901760, %v11490_v49  ;;  %v3701_v27 = vsub.f32 %v11454_v47, %v12636_v20 }
 0x108   : > { %9580 = vmatpush1.bf16.msra.mxu1 %v11181_v22  ;;  %3550 = vmatprep.mubr.f32.mxu1 %v10515_v9  ;;  %v12633_v22 = vand.u32 4294901760, %v11444_v8  ;;  %v4227_v5 = vand.u32 4294901760, %v4226_v28  ;;  %v3713_v28 = vsub.f32 %v11456_v7, %v12637_v61  ;;  %v4221_v20 = vand.u32 4294901760, %v4220_v25 }
 0x109   : > { %9582 = vmatprep.subr.bf16.mxu1 %v11202_v30  ;;  %9536 = vmatpush1.bf16.msra.mxu0 %v11216_v45  ;;  %v3695_v30 = vsub.f32 %v11423_v52, %v12635_v42  ;;  %v3707_v45 = vsub.f32 %v11425_v14, %v12634_v2  ;;  %v9593_v37 = vpack.c.bf16 %v3684_v38, %v3672_v35  ;;  %v3661_v2 = vand.u32 4294901760, %v3660_v32 }
 0x10a   : > { %9586 = vmatprep.subr.bf16.mxu0 %v11386_v31  ;;  %v9641_v42 = vpack.c.bf16 %v4227_v5, %v4215_v39  ;;  %v9595_v61 = vpack.c.bf16 %v3690_v23, %v3678_v40  ;;  %v4244_v35 = vsub.f32 %v11461_v1, %v4243_v13  ;;  %v3714_v25 = vand.u32 4294901760, %v3713_v28  ;;  %v4684_v28 = vld [vmem:[#allocation6 + $0x238] sm:$0xff] }
 0x10b   : > { %v3696_v3 = vand.u32 4294901760, %v3695_v30  ;;  %v3708_v29 = vand.u32 4294901760, %v3707_v45  ;;  %v9643_v39 = vpack.c.bf16 %v4233_v16, %v4221_v20  ;;  %v9601_v40 = vpack.c.bf16 %v11392_v18, %v11390_v63 }
 0x10c   : > { %9584 = vmatpush1.bf16.msra.mxu1 %v11307_v24  ;;  %3009 = vmatmul.mubr.f32.vlgmr.msra.gmra.mrb[0].mxu0 %v11187_v44  ;;  %v4250_v24 = vsub.f32 %v11444_v8, %v12633_v22  ;;  %v11537_v22 = vpack.c.bf16 %v4141_v34, %v4137_v50  ;;  %v3702_v34 = vand.u32 4294901760, %v3701_v27  ;;  %v4245_v30 = vand.u32 4294901760, %v4244_v35  ;;  %v4680_v27 = vld [vmem:[#allocation6 + $0x218] sm:$0xff]  ;;  %v4677_v35 = vld [vmem:[#allocation6 + $0x200] sm:$0xff] }
 0x10d   : > { %9634 = vmatprep.subr.bf16.mxu1 %v11397_v56  ;;  %9588 = vmatpush1.bf16.msra.mxu0 %v11402_v51  ;;  %v9597_v38 = vpack.c.bf16 %v3708_v29, %v3696_v3  ;;  %v9649_v16 = vpack.c.bf16 %v11399_v17, %v11394_v58  ;;  %v9605_v29 = vpack.c.bf16 %v11425_v14, %v11423_v52  ;;  %v4696_v3 = vand.u32 4294901760, %v4678_v21 }
 0x10e   : > { %9590 = vmatprep.subr.bf16.mxu0 %v11421_v10  ;;  %3656 = vmatprep.mubr.f32.mxu0 %v10515_v9  ;;  %v4251_v50 = vand.u32 4294901760, %v4250_v24  ;;  %v9599_v5 = vpack.c.bf16 %v3714_v25, %v3702_v34  ;;  %v9653_v20 = vpack.c.bf16 %v11444_v8, %v11433_v59  ;;  %v4682_v24 = vld [vmem:[#allocation6 + $0x228] sm:$0xff]  ;;  %v9619_v63 = vpack.c.bf16 %v3688_v36, %v3676_v33  ;;  %v9280_v25 = vld [vmem:[%s10712_s8 + $0x20] sm:$0xff] }
 0x10f   : > { %3552 = vmatmul.mubr.f32.vlgmr.msra.gmra.mrb[0].mxu1 %v11187_v44  ;;  %v4256_v44 = vsub.f32 %v11490_v49, %v4255_v0  ;;  %v5239_v18 = vand.u32 4294901760, %v4680_v27  ;;  %v12693_v58 = vand.u32 4294901760, %v11418_v12  ;;  %v12694_v17 = vand.u32 4294901760, %v11423_v52  ;;  %v4686_v33 = vld [vmem:[#allocation6 + $0x248] sm:$0xff] }
 0x110   : > { %9636 = vmatpush1.bf16.msra.mxu1 %v11411_v6  ;;  %4199 = vmatprep.mubr.f32.mxu1 %v10515_v9  ;;  %v9645_v32 = vpack.c.bf16 %v4251_v50, %v4239_v4  ;;  %v4700_v4 = vand.u32 4294901760, %v4682_v24  ;;  %v9665_v50 = vpack.c.bf16 %v4225_v26, %v4213_v55  ;;  %v4690_v36 = vld [vmem:[#allocation6 + $0x268] sm:$0xff]  ;;  %v9671_v52 = vpack.c.bf16 %v4255_v0, %v4243_v13 }
 0x111   : > { %9638 = vmatprep.subr.bf16.mxu1 %v11431_v54  ;;  %9592 = vmatpush1.bf16.msra.mxu0 %v11446_v53  ;;  %v4257_v45 = vand.u32 4294901760, %v4256_v44  ;;  %v4681_v44 = vld [vmem:[#allocation6 + $0x220] sm:$0xff]  ;;  %v9667_v34 = vpack.c.bf16 %v12693_v58, %v4219_v60  ;;  %v4708_v1 = vand.u32 4294901760, %v4690_v36  ;;  %v4694_v49 = vsel %vm271_vm0, %v9280_v25, 0 }
 0x112   : > { %9594 = vmatprep.subr.bf16.mxu0 %v9593_v37  ;;  %v9617_v37 = vpack.c.bf16 %v3682_v15, %v3670_v62  ;;  %v5243_v62 = vand.u32 4294901760, %v4684_v28  ;;  %v4679_v15 = vld [vmem:[#allocation6 + $0x210] sm:$0xff]  ;;  %v4702_v26 = vand.u32 4294901760, %v4681_v44  ;;  %v11627_v13 = vsub.f32 %v4680_v27, %v5239_v18 }
 0x113   : > { %v9647_v23 = vpack.c.bf16 %v4257_v45, %v4245_v30  ;;  %v11618_v45 = vpack.c.bf16 %v4700_v4, %v4696_v3 }
 0x114   : > { %9640 = vmatpush1.bf16.msra.mxu1 %v11537_v22  ;;  %3662 = vmatmul.mubr.f32.vlgmr.msra.gmra.mrb[0].mxu0 %v3661_v2  ;;  %v11629_v0 = vsub.f32 %v4684_v28, %v5243_v62  ;;  %v11647_v28 = vand.u32 4294901760, %v4694_v49 }
 0x115   : > { %9642 = vmatprep.subr.bf16.mxu1 %v9641_v42  ;;  %9596 = vmatpush1.bf16.msra.mxu0 %v9595_v61  ;;  %v9603_v42 = vpack.c.bf16 %v11409_v41, %v11404_v11  ;;  %v9607_v61 = vpack.c.bf16 %v11456_v7, %v11454_v47  ;;  %v12695_v11 = vand.u32 4294901760, %v11425_v14  ;;  %v4698_v41 = vand.u32 4294901760, %v4677_v35 }
 0x116   : > { %9598 = vmatprep.subr.bf16.mxu0 %v9597_v38  ;;  %3772 = vmatprep.mubr.f32.mxu0 %v10515_v9  ;;  %v12696_v38 = vand.u32 4294901760, %v11433_v59  ;;  %v11616_v14 = vsub.f32 %v4678_v21, %v4696_v3  ;;  %v5241_v59 = vand.u32 4294901760, %v4679_v15  ;;  %v5337_v58 = vand.u32 4294901760, %v11629_v0 }
 0x117   : > { %4205 = vmatmul.mubr.f32.vlgmr.msra.gmra.mrb[0].mxu1 %v3661_v2  ;;  %v9651_v2 = vpack.c.bf16 %v11418_v12, %v11413_v48  ;;  %v9621_v55 = vpack.c.bf16 %v12695_v11, %v12694_v17  ;;  %v12698_v48 = vand.u32 4294901760, %v11454_v47  ;;  %v12699_v12 = vand.u32 4294901760, %v11456_v7 }
 0x118   : > { %9644 = vmatpush1.bf16.msra.mxu1 %v9643_v39  ;;  %4315 = vmatprep.mubr.f32.mxu1 %v10515_v9  ;;  %v12697_v39 = vand.u32 4294901760, %v11444_v8  ;;  %v4688_v8 = vld [vmem:[#allocation6 + $0x258] sm:$0xff]  ;;  %v11624_v47 = vpack.c.bf16 %v5243_v62, %v5239_v18  ;;  %v4704_v7 = vand.u32 4294901760, %v4686_v33  ;;  %v11671_v17 = vsub.f32 %v4694_v49, %v11647_v28 }
 0x119   : > { %9646 = vmatprep.subr.bf16.mxu1 %v9645_v32  ;;  %9600 = vmatpush1.bf16.msra.mxu0 %v9599_v5  ;;  %v9623_v60 = vpack.c.bf16 %v12699_v12, %v12698_v48  ;;  %v11620_v32 = vsub.f32 %v4682_v24, %v4700_v4  ;;  %v11643_v24 = vsub.f32 %v4679_v15, %v5241_v59 }
 0x11a   : > { %9602 = vmatprep.subr.bf16.mxu0 %v9601_v40  ;;  %v9669_v30 = vpack.c.bf16 %v12697_v39, %v12696_v38  ;;  %v4692_v40 = vld [vmem:[#allocation6 + $0x278] sm:$0xff]  ;;  %v11655_v4 = vsub.f32 %v4690_v36, %v4708_v1  ;;  %v11708_v48 = vand.u32 4294901760, %v11671_v17 }
 0x11b   : > { %v4794_v18 = vand.u32 4294901760, %v11620_v32 }
 0x11c   : > { %9648 = vmatpush1.bf16.msra.mxu1 %v9647_v23  ;;  %3774 = vmatmul.mubr.f32.vlgmr.msra.gmra.mrb[0].mxu0 %v11415_v57  ;;  %v11631_v23 = vpack.c.bf16 %v4702_v26, %v4698_v41 }
 0x11d   : > { %9650 = vmatprep.subr.bf16.mxu1 %v9649_v16  ;;  %9604 = vmatpush1.bf16.msra.mxu0 %v9603_v42  ;;  %v4685_v16 = vld [vmem:[#allocation6 + $0x240] sm:$0xff]  ;;  %v4795_v38 = vsub.f32 %v11620_v32, %v4794_v18 }
 0x11e   : > { %9606 = vmatprep.subr.bf16.mxu0 %v9605_v29  ;;  %3860 = vmatprep.mubr.f32.mxu0 %v10515_v9  ;;  %v4689_v42 = vld [vmem:[#allocation6 + $0x260] sm:$0xff]  ;;  %v11634_v29 = vsub.f32 %v4677_v35, %v4698_v41  ;;  %v4706_v3 = vand.u32 4294901760, %v4685_v16 }
 0x11f   : > { %4317 = vmatmul.mubr.f32.vlgmr.msra.gmra.mrb[0].mxu1 %v11415_v57  ;;  %v4710_v35 = vand.u32 4294901760, %v4689_v42 }
 0x120   : > { %9652 = vmatpush1.bf16.msra.mxu1 %v9651_v2  ;;  %4403 = vmatprep.mubr.f32.mxu1 %v10515_v9  ;;  %v11636_v2 = vsub.f32 %v4681_v44, %v4702_v26  ;;  %v4782_v44 = vand.u32 4294901760, %v11616_v14  ;;  %v4788_v11 = vand.u32 4294901760, %v11634_v29  ;;  %v11678_v41 = vsub.f32 %v4685_v16, %v4706_v3 }
 0x121   : > { %9654 = vmatprep.subr.bf16.mxu1 %v9653_v20  ;;  %9608 = vmatpush1.bf16.msra.mxu0 %v9607_v61  ;;  %v5247_v20 = vand.u32 4294901760, %v4688_v8  ;;  %v5251_v61 = vand.u32 4294901760, %v4692_v40  ;;  %v11686_v36 = vsub.f32 %v4689_v42, %v4710_v35 }
 0x122   : > { %9610 = vmatprep.subr.bf16.mxu0 %v11386_v31 }
 0x123   : > { %v11662_v62 = vpack.c.bf16 %v5251_v61, %v5247_v20  ;;  %v11664_v15 = vsub.f32 %v4688_v8, %v5247_v20 }
 0x124   : > { %9656 = vmatpush1.bf16.msra.mxu1 %v9655_v46  ;;  %3863 = vmatmul.mubr.f32.vlgmr.msra.gmra.mrb[0].mxu0 %v11438_v19  ;;  %v11638_v46 = vld [vmem:[#allocation6 + $0x250] sm:$0xff] }
 0x125   : > { %9658 = vmatprep.subr.bf16.mxu1 %v11397_v56  ;;  %9612 = vmatpush1.bf16.msra.mxu0 %v11402_v51  ;;  %v12639_v8 = vand.u32 4294901760, %v11664_v15 }
 0x126   : > { %9614 = vmatprep.subr.bf16.mxu0 %v11421_v10  ;;  %3941 = vmatprep.mubr.f32.mxu0 %v10515_v9 }
 0x127   : > { %4406 = vmatmul.mubr.f32.vlgmr.msra.gmra.mrb[0].mxu1 %v11438_v19  ;;  %v4683_v19 = vld [vmem:[#allocation6 + $0x230] sm:$0xff] }
 0x128   : > { %9660 = vmatpush1.bf16.msra.mxu1 %v11411_v6  ;;  %4484 = vmatprep.mubr.f32.mxu1 %v10515_v9  ;;  %v5245_v5 = vand.u32 4294901760, %v4683_v19 }
 0x129   : > { %9662 = vmatprep.subr.bf16.mxu1 %v11431_v54  ;;  %9616 = vmatpush1.bf16.msra.mxu0 %v11446_v53 }
 0x12a   : > { %9618 = vmatprep.subr.bf16.mxu0 %v9617_v37  ;;  %v11641_v21 = vpack.c.bf16 %v5245_v5, %v5241_v59  ;;  %v11645_v27 = vsub.f32 %v4683_v19, %v5245_v5  ;;  %v11650_v37 = vpack.c.bf16 %v4708_v1, %v4704_v7  ;;  %v5325_v19 = vand.u32 4294901760, %v11627_v13 }
 0x12b   : > { %v12643_v1 = vand.u32 4294901760, %v11678_v41 }
 0x12c   : > { %9664 = vmatpush1.bf16.msra.mxu1 %v11537_v22  ;;  %3945 = vmatmul.mubr.f32.vlgmr.msra.gmra.mrb[0].mxu0 %v11476_v43  ;;  %v12645_v5 = vand.u32 4294901760, %v11645_v27 }
 0x12d   : > { %9666 = vmatprep.subr.bf16.mxu1 %v9665_v50  ;;  %9620 = vmatpush1.bf16.msra.mxu0 %v9619_v63  ;;  %v11657_v50 = vld [vmem:[#allocation6 + $0x270] sm:$0xff]  ;;  %v5249_v63 = vand.u32 4294901760, %v11638_v46 }
 0x12e   : > { %9622 = vmatprep.subr.bf16.mxu0 %v9621_v55  ;;  %4039 = vmatprep.mubr.f32.mxu0 %v10515_v9  ;;  %v4800_v55 = vand.u32 4294901760, %v11636_v2  ;;  %v5253_v26 = vand.u32 4294901760, %v11657_v50 }
 0x12f   : > { %4488 = vmatmul.mubr.f32.vlgmr.msra.gmra.mrb[0].mxu1 %v11476_v43  ;;  %v11653_v43 = vsub.f32 %v4686_v33, %v4704_v7  ;;  %v4783_v33 = vsub.f32 %v11616_v14, %v4782_v44  ;;  %v11691_v25 = vsub.f32 %v11638_v46, %v5249_v63 }
 0x130   : > { %9668 = vmatpush1.bf16.msra.mxu1 %v9667_v34  ;;  %4582 = vmatprep.mubr.f32.mxu1 %v10515_v9  ;;  %v11668_v34 = vsub.f32 %v4692_v40, %v5251_v61  ;;  %v4801_v12 = vsub.f32 %v11636_v2, %v4800_v55  ;;  %v4796_v40 = vand.u32 4294901760, %v4795_v38 }
 0x131   : > { %9670 = vmatprep.subr.bf16.mxu1 %v9669_v30  ;;  %9624 = vmatpush1.bf16.msra.mxu0 %v9623_v60  ;;  %v12642_v39 = vand.u32 4294901760, %v11653_v43  ;;  %v12641_v30 = vand.u32 4294901760, %v11655_v4  ;;  %v5331_v60 = vand.u32 4294901760, %v11643_v24  ;;  %v4784_v59 = vand.u32 4294901760, %v4783_v33 }
 0x132   : > { %9626 = vmatprep.subr.bf16.mxu0 %v11386_v31  ;;  %v11676_v31 = vpack.c.bf16 %v4710_v35, %v4706_v3  ;;  %v12640_v7 = vand.u32 4294901760, %v11668_v34  ;;  %v4802_v61 = vand.u32 4294901760, %v4801_v12  ;;  %v5344_v35 = vsub.f32 %v11645_v27, %v12645_v5 }
 0x133   : > { %v4807_v42 = vsub.f32 %v11653_v43, %v12642_v39  ;;  %v5332_v3 = vsub.f32 %v11643_v24, %v5331_v60  ;;  %v5355_v33 = vand.u32 4294901760, %v11691_v25 }
 0x134   : > { %9672 = vmatpush1.bf16.msra.mxu1 %v9671_v52  ;;  %4041 = vmatmul.mubr.f32.vlgmr.msra.gmra.mrb[0].mxu0 %v11415_v57  ;;  %v11720_v52 = vsub.f32 %v11657_v50, %v5253_v26  ;;  %v5350_v50 = vsub.f32 %v11664_v15, %v12639_v8  ;;  %v5345_v5 = vand.u32 4294901760, %v5344_v35 }
 0x135   : > { %9674 = vmatprep.subr.bf16.mxu1 %v11397_v56  ;;  %9628 = vmatpush1.bf16.msra.mxu0 %v11402_v51  ;;  %v5326_v56 = vsub.f32 %v11627_v13, %v5325_v19  ;;  %v5338_v51 = vsub.f32 %v11629_v0, %v5337_v58  ;;  %v4808_v12 = vand.u32 4294901760, %v4807_v42 }
 0x136   : > { %9630 = vmatprep.subr.bf16.mxu0 %v11421_v10  ;;  %4119 = vmatprep.mubr.f32.mxu0 %v10515_v9  ;;  %v4789_v10 = vsub.f32 %v11634_v29, %v4788_v11  ;;  %v5367_v38 = vand.u32 4294901760, %v11720_v52  ;;  %v5351_v46 = vand.u32 4294901760, %v5350_v50  ;;  %v9751_v35 = vpack.c.bf16 %v11720_v52, %v11691_v25  ;;  %v5790_v50 = vld [vmem:[#allocation6 + $0x288] sm:$0xff] }
 0x137   : > { %4584 = vmatmul.mubr.f32.vlgmr.msra.gmra.mrb[0].mxu1 %v11415_v57  ;;  %v5327_v49 = vand.u32 4294901760, %v5326_v56  ;;  %v5339_v16 = vand.u32 4294901760, %v5338_v51  ;;  %v4813_v56 = vsub.f32 %v11678_v41, %v12643_v1  ;;  %v5333_v1 = vand.u32 4294901760, %v5332_v3 }
 0x138   : > { %9676 = vmatpush1.bf16.msra.mxu1 %v11411_v6  ;;  %4662 = vmatprep.mubr.f32.mxu1 %v10515_v9  ;;  %v12644_v6 = vand.u32 4294901760, %v11686_v36  ;;  %v4790_v20 = vand.u32 4294901760, %v4789_v10  ;;  %v9689_v10 = vpack.c.bf16 %v4796_v40, %v4784_v59  ;;  %v5356_v59 = vsub.f32 %v11691_v25, %v5355_v33 }
 0x139   : > { %9678 = vmatprep.subr.bf16.mxu1 %v11431_v54  ;;  %9632 = vmatpush1.bf16.msra.mxu0 %v11446_v53  ;;  %v4819_v54 = vsub.f32 %v11655_v4, %v12641_v30  ;;  %v4772_v53 = vsub.f32 %v11671_v17, %v11708_v48  ;;  %v9737_v39 = vpack.c.bf16 %v5339_v16, %v5327_v49 }
 0x13a   : > { %9682 = vmatprep.subr.bf16.mxu0 %v11618_v45  ;;  %v4825_v51 = vsub.f32 %v11686_v36, %v12644_v6  ;;  %v9691_v6 = vpack.c.bf16 %v4802_v61, %v4790_v20  ;;  %v9739_v16 = vpack.c.bf16 %v5345_v5, %v5333_v1  ;;  %v5357_v42 = vand.u32 4294901760, %v5356_v59 }
 0x13b   : > { %v4820_v8 = vand.u32 4294901760, %v4819_v54  ;;  %v4773_v30 = vand.u32 4294901760, %v4772_v53  ;;  %v9697_v61 = vpack.c.bf16 %v11620_v32, %v11616_v14  ;;  %v9745_v5 = vpack.c.bf16 %v11629_v0, %v11627_v13 }
 0x13c   : > { %9680 = vmatpush1.bf16.msra.mxu1 %v11537_v22  ;;  %4121 = vmatmul.mubr.f32.vlgmr.msra.gmra.mrb[0].mxu0 %v11415_v57  ;;  %v5362_v22 = vsub.f32 %v11668_v34, %v12640_v7  ;;  %v11767_v7 = vpack.c.bf16 %v5253_v26, %v5249_v63  ;;  %v4814_v26 = vand.u32 4294901760, %v4813_v56  ;;  %v4826_v40 = vand.u32 4294901760, %v4825_v51  ;;  %v5792_v56 = vld [vmem:[#allocation6 + $0x298] sm:$0xff] }
 0x13d   : > { %9730 = vmatprep.subr.bf16.mxu1 %v11624_v47  ;;  %9684 = vmatpush1.bf16.msra.mxu0 %v11631_v23  ;;  %v9693_v49 = vpack.c.bf16 %v4820_v8, %v4808_v12  ;;  %v9701_v8 = vpack.c.bf16 %v11655_v4, %v11653_v43  ;;  %v9749_v1 = vpack.c.bf16 %v11668_v34, %v11664_v15  ;;  %v5789_v12 = vld [vmem:[#allocation6 + $0x280] sm:$0xff]  ;;  %v5808_v59 = vand.u32 4294901760, %v5790_v50 }
 0x13e   : > { %9686 = vmatprep.subr.bf16.mxu0 %v11650_v37  ;;  %4768 = vmatprep.mubr.f32.mxu0 %v10515_v9  ;;  %v5363_v63 = vand.u32 4294901760, %v5362_v22  ;;  %v9695_v20 = vpack.c.bf16 %v4826_v40, %v4814_v26  ;;  %v5794_v22 = vld [vmem:[#allocation6 + $0x2a8] sm:$0xff]  ;;  %v9713_v51 = vpack.c.bf16 %v4794_v18, %v4782_v44  ;;  %v9761_v14 = vpack.c.bf16 %v5337_v58, %v5325_v19  ;;  %v5791_v18 = vld [vmem:[#allocation6 + $0x290] sm:$0xff] }
 0x13f   : > { %4664 = vmatmul.mubr.f32.vlgmr.msra.gmra.mrb[0].mxu1 %v11415_v57  ;;  %v5368_v57 = vsub.f32 %v11720_v52, %v5367_v38  ;;  %v9715_v32 = vpack.c.bf16 %v4800_v55, %v4788_v11  ;;  %v6351_v44 = vand.u32 4294901760, %v5792_v56  ;;  %v12701_v0 = vand.u32 4294901760, %v11653_v43  ;;  %v5798_v11 = vld [vmem:[#allocation6 + $0x2c8] sm:$0xff] }
 0x140   : > { %9732 = vmatpush1.bf16.msra.mxu1 %v11641_v21  ;;  %5311 = vmatprep.mubr.f32.mxu1 %v10515_v9  ;;  %v9741_v53 = vpack.c.bf16 %v5363_v63, %v5351_v46  ;;  %v5793_v46 = vld [vmem:[#allocation6 + $0x2a0] sm:$0xff]  ;;  %v12700_v63 = vand.u32 4294901760, %v11645_v27  ;;  %v12702_v19 = vand.u32 4294901760, %v11655_v4  ;;  %v9281_v55 = vld [vmem:[%s10712_s8 + $0x28] sm:$0xff]  ;;  %v12703_v26 = vand.u32 4294901760, %v11664_v15 }
 0x141   : > { %9734 = vmatprep.subr.bf16.mxu1 %v11662_v62  ;;  %9688 = vmatpush1.bf16.msra.mxu0 %v11676_v31  ;;  %v5369_v54 = vand.u32 4294901760, %v5368_v57  ;;  %v5812_v57 = vand.u32 4294901760, %v5794_v22  ;;  %v12704_v40 = vand.u32 4294901760, %v11668_v34  ;;  %v9767_v43 = vpack.c.bf16 %v5367_v38, %v5355_v33  ;;  %v5800_v34 = vld [vmem:[#allocation6 + $0x2d8] sm:$0xff] }
 0x142   : > { %9690 = vmatprep.subr.bf16.mxu0 %v9689_v10  ;;  %v5796_v10 = vld [vmem:[#allocation6 + $0x2b8] sm:$0xff]  ;;  %v9763_v13 = vpack.c.bf16 %v12700_v63, %v5331_v60  ;;  %v5814_v4 = vand.u32 4294901760, %v5793_v46  ;;  %v6353_v15 = vand.u32 4294901760, %v5791_v18  ;;  %v5816_v25 = vand.u32 4294901760, %v5798_v11 }
 0x143   : > { %v9743_v3 = vpack.c.bf16 %v5369_v54, %v5357_v42  ;;  %v6355_v58 = vand.u32 4294901760, %v5796_v10  ;;  %v11846_v42 = vpack.c.bf16 %v5812_v57, %v5808_v59  ;;  %v11848_v54 = vsub.f32 %v5790_v50, %v5808_v59 }
 0x144   : > { %9736 = vmatpush1.bf16.msra.mxu1 %v11767_v7  ;;  %4774 = vmatmul.mubr.f32.vlgmr.msra.gmra.mrb[0].mxu0 %v4773_v30  ;;  %v5806_v52 = vsel %vm271_vm0, %v9281_v55, 0 }
 0x145   : > { %9738 = vmatprep.subr.bf16.mxu1 %v9737_v39  ;;  %9692 = vmatpush1.bf16.msra.mxu0 %v9691_v6  ;;  %v9699_v39 = vpack.c.bf16 %v11636_v2, %v11634_v29  ;;  %v9703_v6 = vpack.c.bf16 %v11686_v36, %v11678_v41  ;;  %v9717_v29 = vpack.c.bf16 %v12702_v19, %v12701_v0  ;;  %v5810_v2 = vand.u32 4294901760, %v5789_v12 }
 0x146   : > { %9694 = vmatprep.subr.bf16.mxu0 %v9693_v49  ;;  %4884 = vmatprep.mubr.f32.mxu0 %v10515_v9  ;;  %v9765_v49 = vpack.c.bf16 %v12704_v40, %v12703_v26  ;;  %v11857_v33 = vpack.c.bf16 %v6355_v58, %v6351_v44  ;;  %v11859_v38 = vsub.f32 %v5796_v10, %v6355_v58 }
 0x147   : > { %5317 = vmatmul.mubr.f32.vlgmr.msra.gmra.mrb[0].mxu1 %v4773_v30  ;;  %v9747_v30 = vpack.c.bf16 %v11645_v27, %v11643_v24  ;;  %v12705_v24 = vand.u32 4294901760, %v11678_v41  ;;  %v12706_v27 = vand.u32 4294901760, %v11686_v36  ;;  %v11852_v41 = vsub.f32 %v5794_v22, %v5812_v57 }
 0x148   : > { %9740 = vmatpush1.bf16.msra.mxu1 %v9739_v16  ;;  %5427 = vmatprep.mubr.f32.mxu1 %v10515_v9  ;;  %v5802_v16 = vld [vmem:[#allocation6 + $0x2e8] sm:$0xff]  ;;  %v11854_v36 = vsub.f32 %v5792_v56, %v6351_v44  ;;  %v11873_v22 = vsub.f32 %v5791_v18, %v6353_v15  ;;  %v11880_v10 = vsub.f32 %v5798_v11, %v5816_v25  ;;  %v5894_v57 = vand.u32 4294901760, %v11848_v54 }
 0x149   : > { %9742 = vmatprep.subr.bf16.mxu1 %v9741_v53  ;;  %9696 = vmatpush1.bf16.msra.mxu0 %v9695_v20  ;;  %v9719_v60 = vpack.c.bf16 %v12706_v27, %v12705_v24  ;;  %v5804_v20 = vld [vmem:[#allocation6 + $0x2f8] sm:$0xff]  ;;  %v5906_v44 = vand.u32 4294901760, %v11852_v41 }
 0x14a   : > { %9698 = vmatprep.subr.bf16.mxu0 %v9697_v61  ;;  %v11861_v61 = vsub.f32 %v5789_v12, %v5810_v2  ;;  %v6437_v63 = vand.u32 4294901760, %v11854_v36  ;;  %v5895_v55 = vsub.f32 %v11848_v54, %v5894_v57  ;;  %v12649_v24 = vand.u32 4294901760, %v11880_v10 }
 0x14c   : > { %9744 = vmatpush1.bf16.msra.mxu1 %v9743_v3  ;;  %4886 = vmatmul.mubr.f32.vlgmr.msra.gmra.mrb[0].mxu0 %v11647_v28  ;;  %v5820_v3 = vand.u32 4294901760, %v5802_v16 }
 0x14d   : > { %9746 = vmatprep.subr.bf16.mxu1 %v9745_v5  ;;  %9700 = vmatpush1.bf16.msra.mxu0 %v9699_v39  ;;  %v5797_v5 = vld [vmem:[#allocation6 + $0x2c0] sm:$0xff] }
 0x14e   : > { %9702 = vmatprep.subr.bf16.mxu0 %v9701_v8  ;;  %4972 = vmatprep.mubr.f32.mxu0 %v10515_v9  ;;  %v5801_v39 = vld [vmem:[#allocation6 + $0x2e0] sm:$0xff]  ;;  %v11864_v8 = vpack.c.bf16 %v5814_v4, %v5810_v2  ;;  %v5818_v12 = vand.u32 4294901760, %v5797_v5 }
 0x14f   : > { %5429 = vmatmul.mubr.f32.vlgmr.msra.gmra.mrb[0].mxu1 %v11647_v28  ;;  %v5822_v59 = vand.u32 4294901760, %v5801_v39 }
 0x150   : > { %9748 = vmatpush1.bf16.msra.mxu1 %v9747_v30  ;;  %5515 = vmatprep.mubr.f32.mxu1 %v10515_v9  ;;  %v11866_v30 = vsub.f32 %v5793_v46, %v5814_v4  ;;  %v11885_v46 = vsub.f32 %v5802_v16, %v5820_v3  ;;  %v11908_v2 = vsub.f32 %v5797_v5, %v5818_v12  ;;  %v6443_v4 = vand.u32 4294901760, %v11873_v22 }
 0x151   : > { %9750 = vmatprep.subr.bf16.mxu1 %v9749_v1  ;;  %9704 = vmatpush1.bf16.msra.mxu0 %v9703_v6  ;;  %v6359_v1 = vand.u32 4294901760, %v5800_v34  ;;  %v6363_v6 = vand.u32 4294901760, %v5804_v20  ;;  %v11916_v26 = vsub.f32 %v5801_v39, %v5822_v59  ;;  %v5919_v39 = vsub.f32 %v11880_v10, %v12649_v24 }
 0x152   : > { %9706 = vmatprep.subr.bf16.mxu0 %v11618_v45  ;;  %v5912_v58 = vand.u32 4294901760, %v11866_v30  ;;  %v12648_v27 = vand.u32 4294901760, %v11885_v46 }
 0x153   : > { %v11892_v18 = vpack.c.bf16 %v6363_v6, %v6359_v1  ;;  %v11898_v0 = vsub.f32 %v5804_v20, %v6363_v6 }
 0x154   : > { %9752 = vmatpush1.bf16.msra.mxu1 %v9751_v35  ;;  %4975 = vmatmul.mubr.f32.vlgmr.msra.gmra.mrb[0].mxu0 %v11671_v17  ;;  %v11868_v35 = vld [vmem:[#allocation6 + $0x2d0] sm:$0xff] }
 0x155   : > { %9754 = vmatprep.subr.bf16.mxu1 %v11624_v47  ;;  %9708 = vmatpush1.bf16.msra.mxu0 %v11631_v23 }
 0x156   : > { %9710 = vmatprep.subr.bf16.mxu0 %v11650_v37  ;;  %5053 = vmatprep.mubr.f32.mxu0 %v10515_v9 }
 0x157   : > { %5518 = vmatmul.mubr.f32.vlgmr.msra.gmra.mrb[0].mxu1 %v11671_v17  ;;  %v5795_v17 = vld [vmem:[#allocation6 + $0x2b0] sm:$0xff] }
 0x158   : > { %9756 = vmatpush1.bf16.msra.mxu1 %v11641_v21  ;;  %5596 = vmatprep.mubr.f32.mxu1 %v10515_v9  ;;  %v6357_v53 = vand.u32 4294901760, %v5795_v17 }
 0x159   : > { %9758 = vmatprep.subr.bf16.mxu1 %v11662_v62  ;;  %9712 = vmatpush1.bf16.msra.mxu0 %v11676_v31 }
 0x15a   : > { %9714 = vmatprep.subr.bf16.mxu0 %v9713_v51  ;;  %v11871_v50 = vpack.c.bf16 %v6357_v53, %v6353_v15  ;;  %v11875_v56 = vsub.f32 %v5795_v17, %v6357_v53  ;;  %v11877_v51 = vand.u32 4294901760, %v5806_v52  ;;  %v11894_v17 = vsub.f32 %v5800_v34, %v6359_v1 }
 0x15b   : > { %v5896_v15 = vand.u32 4294901760, %v5895_v55 }
 0x15c   : > { %9760 = vmatpush1.bf16.msra.mxu1 %v11767_v7  ;;  %5057 = vmatmul.mubr.f32.vlgmr.msra.gmra.mrb[0].mxu0 %v11708_v48  ;;  %v11901_v19 = vsub.f32 %v5806_v52, %v11877_v51  ;;  %v12652_v53 = vand.u32 4294901760, %v11875_v56  ;;  %v12646_v34 = vand.u32 4294901760, %v11894_v17  ;;  %v12650_v52 = vand.u32 4294901760, %v11908_v2 }
 0x15d   : > { %9762 = vmatprep.subr.bf16.mxu1 %v9761_v14  ;;  %9716 = vmatpush1.bf16.msra.mxu0 %v9715_v32  ;;  %v11887_v14 = vld [vmem:[#allocation6 + $0x2f0] sm:$0xff]  ;;  %v6361_v32 = vand.u32 4294901760, %v11868_v35 }
 0x15e   : > { %9718 = vmatprep.subr.bf16.mxu0 %v9717_v29  ;;  %5151 = vmatprep.mubr.f32.mxu0 %v10515_v9  ;;  %v5900_v29 = vand.u32 4294901760, %v11861_v61  ;;  %v6365_v11 = vand.u32 4294901760, %v11887_v14 }
 0x15f   : > { %5600 = vmatmul.mubr.f32.vlgmr.msra.gmra.mrb[0].mxu1 %v11708_v48  ;;  %v11883_v48 = vpack.c.bf16 %v5820_v3, %v5816_v25  ;;  %v11921_v40 = vsub.f32 %v11868_v35, %v6361_v32  ;;  %v12647_v25 = vand.u32 4294901760, %v11898_v0 }
 0x160   : > { %9764 = vmatpush1.bf16.msra.mxu1 %v9763_v13  ;;  %5694 = vmatprep.mubr.f32.mxu1 %v10515_v9  ;;  %v6449_v13 = vand.u32 4294901760, %v11859_v38  ;;  %v11950_v16 = vsub.f32 %v11887_v14, %v6365_v11  ;;  %v6462_v14 = vsub.f32 %v11894_v17, %v12646_v34 }
 0x161   : > { %9766 = vmatprep.subr.bf16.mxu1 %v9765_v49  ;;  %9720 = vmatpush1.bf16.msra.mxu0 %v9719_v60  ;;  %v5907_v49 = vsub.f32 %v11852_v41, %v5906_v44  ;;  %v11938_v60 = vand.u32 4294901760, %v11901_v19  ;;  %v6467_v55 = vand.u32 4294901760, %v11921_v40 }
 0x162   : > { %9722 = vmatprep.subr.bf16.mxu0 %v11618_v45  ;;  %v11906_v45 = vpack.c.bf16 %v5822_v59, %v5818_v12  ;;  %v6444_v12 = vsub.f32 %v11873_v22, %v6443_v4  ;;  %v6456_v59 = vsub.f32 %v11875_v56, %v12652_v53  ;;  %v6463_v35 = vand.u32 4294901760, %v6462_v14  ;;  %v6902_v14 = vld [vmem:[#allocation6 + $0x308] sm:$0xff] }
 0x163   : > { %v5908_v20 = vand.u32 4294901760, %v5907_v49  ;;  %v6479_v49 = vand.u32 4294901760, %v11950_v16 }
 0x164   : > { %9768 = vmatpush1.bf16.msra.mxu1 %v9767_v43  ;;  %5153 = vmatmul.mubr.f32.vlgmr.msra.gmra.mrb[0].mxu0 %v11647_v28  ;;  %v5913_v43 = vsub.f32 %v11866_v30, %v5912_v58  ;;  %v6457_v53 = vand.u32 4294901760, %v6456_v59  ;;  %v9847_v59 = vpack.c.bf16 %v11950_v16, %v11921_v40 }
 0x165   : > { %9770 = vmatprep.subr.bf16.mxu1 %v11624_v47  ;;  %9724 = vmatpush1.bf16.msra.mxu0 %v11631_v23  ;;  %v6438_v47 = vsub.f32 %v11854_v36, %v6437_v63  ;;  %v6450_v23 = vsub.f32 %v11859_v38, %v6449_v13 }
 0x166   : > { %9726 = vmatprep.subr.bf16.mxu0 %v11650_v37  ;;  %5231 = vmatprep.mubr.f32.mxu0 %v10515_v9  ;;  %v5901_v37 = vsub.f32 %v11861_v61, %v5900_v29  ;;  %v5914_v6 = vand.u32 4294901760, %v5913_v43  ;;  %v5920_v43 = vand.u32 4294901760, %v5919_v39 }
 0x167   : > { %5696 = vmatmul.mubr.f32.vlgmr.msra.gmra.mrb[0].mxu1 %v11647_v28  ;;  %v6439_v3 = vand.u32 4294901760, %v6438_v47  ;;  %v6451_v5 = vand.u32 4294901760, %v6450_v23  ;;  %v5925_v47 = vsub.f32 %v11908_v2, %v12650_v52  ;;  %v6445_v52 = vand.u32 4294901760, %v6444_v12 }
 0x168   : > { %9772 = vmatpush1.bf16.msra.mxu1 %v11641_v21  ;;  %5774 = vmatprep.mubr.f32.mxu1 %v10515_v9  ;;  %v12651_v21 = vand.u32 4294901760, %v11916_v26  ;;  %v5902_v1 = vand.u32 4294901760, %v5901_v37  ;;  %v9785_v37 = vpack.c.bf16 %v5908_v20, %v5896_v15  ;;  %v6468_v15 = vsub.f32 %v11921_v40, %v6467_v55 }
 0x169   : > { %9774 = vmatprep.subr.bf16.mxu1 %v11662_v62  ;;  %9728 = vmatpush1.bf16.msra.mxu0 %v11676_v31  ;;  %v5931_v62 = vsub.f32 %v11885_v46, %v12648_v27  ;;  %v5884_v31 = vsub.f32 %v11901_v19, %v11938_v60  ;;  %v9833_v24 = vpack.c.bf16 %v6451_v5, %v6439_v3 }
 0x16a   : > { %9778 = vmatprep.subr.bf16.mxu0 %v11846_v42  ;;  %v5937_v23 = vsub.f32 %v11916_v26, %v12651_v21  ;;  %v9787_v21 = vpack.c.bf16 %v5914_v6, %v5902_v1  ;;  %v9835_v5 = vpack.c.bf16 %v6457_v53, %v6445_v52  ;;  %v6469_v39 = vand.u32 4294901760, %v6468_v15  ;;  %v6908_v15 = vld [vmem:[#allocation6 + $0x338] sm:$0xff] }
 0x16b   : > { %v5932_v34 = vand.u32 4294901760, %v5931_v62  ;;  %v5885_v27 = vand.u32 4294901760, %v5884_v31  ;;  %v9793_v6 = vpack.c.bf16 %v11852_v41, %v11848_v54  ;;  %v9841_v53 = vpack.c.bf16 %v11859_v38, %v11854_v36 }
 0x16c   : > { %9776 = vmatpush1.bf16.msra.mxu1 %v11767_v7  ;;  %5233 = vmatmul.mubr.f32.vlgmr.msra.gmra.mrb[0].mxu0 %v11647_v28  ;;  %v6474_v7 = vsub.f32 %v11898_v0, %v12647_v25  ;;  %v11997_v25 = vpack.c.bf16 %v6365_v11, %v6361_v32  ;;  %v5926_v11 = vand.u32 4294901760, %v5925_v47  ;;  %v5938_v20 = vand.u32 4294901760, %v5937_v23  ;;  %v6904_v47 = vld [vmem:[#allocation6 + $0x318] sm:$0xff] }
 0x16d   : > { %9826 = vmatprep.subr.bf16.mxu1 %v11857_v33  ;;  %9780 = vmatpush1.bf16.msra.mxu0 %v11864_v8  ;;  %v9789_v3 = vpack.c.bf16 %v5932_v34, %v5920_v43  ;;  %v9797_v34 = vpack.c.bf16 %v11885_v46, %v11880_v10  ;;  %v9845_v52 = vpack.c.bf16 %v11898_v0, %v11894_v17  ;;  %v12708_v36 = vand.u32 4294901760, %v11880_v10 }
 0x16e   : > { %9782 = vmatprep.subr.bf16.mxu0 %v11883_v48  ;;  %5880 = vmatprep.mubr.f32.mxu0 %v10515_v9  ;;  %v6475_v32 = vand.u32 4294901760, %v6474_v7  ;;  %v9791_v1 = vpack.c.bf16 %v5938_v20, %v5926_v11  ;;  %v6906_v7 = vld [vmem:[#allocation6 + $0x328] sm:$0xff]  ;;  %v9809_v23 = vpack.c.bf16 %v5906_v44, %v5894_v57  ;;  %v9857_v54 = vpack.c.bf16 %v6449_v13, %v6437_v63  ;;  %v6907_v11 = vld [vmem:[#allocation6 + $0x330] sm:$0xff] }
 0x16f   : > { %5776 = vmatmul.mubr.f32.vlgmr.msra.gmra.mrb[0].mxu1 %v11647_v28  ;;  %v6480_v28 = vsub.f32 %v11950_v16, %v6479_v49  ;;  %v6924_v43 = vand.u32 4294901760, %v6906_v7  ;;  %v9811_v41 = vpack.c.bf16 %v5912_v58, %v5900_v29  ;;  %v12707_v57 = vand.u32 4294901760, %v11875_v56  ;;  %v6910_v29 = vld [vmem:[#allocation6 + $0x348] sm:$0xff]  ;;  %v9282_v58 = vld [vmem:[%s10712_s8 + $0x30] sm:$0xff] }
 0x170   : > { %9828 = vmatpush1.bf16.msra.mxu1 %v11871_v50  ;;  %6423 = vmatprep.mubr.f32.mxu1 %v10515_v9  ;;  %v9837_v31 = vpack.c.bf16 %v6475_v32, %v6463_v35  ;;  %v6905_v35 = vld [vmem:[#allocation6 + $0x320] sm:$0xff]  ;;  %v6903_v32 = vld [vmem:[#allocation6 + $0x310] sm:$0xff]  ;;  %v12709_v38 = vand.u32 4294901760, %v11885_v46  ;;  %v7467_v63 = vand.u32 4294901760, %v6908_v15  ;;  %v9863_v46 = vpack.c.bf16 %v6479_v49, %v6467_v55 }
 0x171   : > { %9830 = vmatprep.subr.bf16.mxu1 %v11892_v18  ;;  %9784 = vmatpush1.bf16.msra.mxu0 %v11906_v45  ;;  %v6481_v62 = vand.u32 4294901760, %v6480_v28  ;;  %v6901_v28 = vld [vmem:[#allocation6 + $0x300] sm:$0xff]  ;;  %v9859_v44 = vpack.c.bf16 %v12707_v57, %v6443_v4  ;;  %v6926_v13 = vand.u32 4294901760, %v6905_v35  ;;  %v12711_v4 = vand.u32 4294901760, %v11898_v0  ;;  %v6912_v0 = vld [vmem:[#allocation6 + $0x358] sm:$0xff] }
 0x172   : > { %9786 = vmatprep.subr.bf16.mxu0 %v9785_v37  ;;  %v6920_v37 = vand.u32 4294901760, %v6902_v14  ;;  %v6918_v16 = vsel %vm271_vm0, %v9282_v58, 0  ;;  %v12089_v49 = vsub.f32 %v6908_v15, %v7467_v63 }
 0x173   : > { %v9839_v12 = vpack.c.bf16 %v6481_v62, %v6469_v39 }
 0x174   : > { %9832 = vmatpush1.bf16.msra.mxu1 %v11997_v25  ;;  %5886 = vmatmul.mubr.f32.vlgmr.msra.gmra.mrb[0].mxu0 %v5885_v27  ;;  %v12076_v39 = vpack.c.bf16 %v6924_v43, %v6920_v37  ;;  %v12078_v62 = vsub.f32 %v6902_v14, %v6920_v37 }
 0x175   : > { %9834 = vmatprep.subr.bf16.mxu1 %v9833_v24  ;;  %9788 = vmatpush1.bf16.msra.mxu0 %v9787_v21  ;;  %v9795_v24 = vpack.c.bf16 %v11866_v30, %v11861_v61  ;;  %v9799_v21 = vpack.c.bf16 %v11916_v26, %v11908_v2  ;;  %v9813_v61 = vpack.c.bf16 %v12709_v38, %v12708_v36  ;;  %v6922_v30 = vand.u32 4294901760, %v6901_v28 }
 0x176   : > { %9790 = vmatprep.subr.bf16.mxu0 %v9789_v3  ;;  %5996 = vmatprep.mubr.f32.mxu0 %v10515_v9  ;;  %v12712_v3 = vand.u32 4294901760, %v11908_v2  ;;  %v7561_v38 = vand.u32 4294901760, %v12089_v49 }
 0x177   : > { %6429 = vmatmul.mubr.f32.vlgmr.msra.gmra.mrb[0].mxu1 %v5885_v27  ;;  %v9843_v27 = vpack.c.bf16 %v11875_v56, %v11873_v22  ;;  %v6914_v22 = vld [vmem:[#allocation6 + $0x368] sm:$0xff]  ;;  %v12710_v56 = vand.u32 4294901760, %v11894_v17  ;;  %v7465_v17 = vand.u32 4294901760, %v6903_v32 }
 0x178   : > { %9836 = vmatpush1.bf16.msra.mxu1 %v9835_v5  ;;  %6539 = vmatprep.mubr.f32.mxu1 %v10515_v9  ;;  %v12713_v5 = vand.u32 4294901760, %v11916_v26  ;;  %v6928_v26 = vand.u32 4294901760, %v6910_v29  ;;  %v6932_v40 = vand.u32 4294901760, %v6914_v22 }
 0x179   : > { %9838 = vmatprep.subr.bf16.mxu1 %v9837_v31  ;;  %9792 = vmatpush1.bf16.msra.mxu0 %v9791_v1  ;;  %v9861_v20 = vpack.c.bf16 %v12711_v4, %v12710_v56  ;;  %v12080_v31 = vsub.f32 %v6906_v7, %v6924_v43  ;;  %v7469_v1 = vand.u32 4294901760, %v6907_v11  ;;  %v12103_v7 = vsub.f32 %v6903_v32, %v7465_v17 }
 0x17a   : > { %9794 = vmatprep.subr.bf16.mxu0 %v9793_v6  ;;  %v9815_v10 = vpack.c.bf16 %v12713_v5, %v12712_v3  ;;  %v6916_v6 = vld [vmem:[#allocation6 + $0x378] sm:$0xff]  ;;  %v12110_v37 = vpack.c.bf16 %v6932_v40, %v6928_v26 }
 0x17b   : > { %v12101_v14 = vpack.c.bf16 %v7469_v1, %v7465_v17  ;;  %v7018_v57 = vand.u32 4294901760, %v12080_v31 }
 0x17c   : > { %9840 = vmatpush1.bf16.msra.mxu1 %v9839_v12  ;;  %5998 = vmatmul.mubr.f32.vlgmr.msra.gmra.mrb[0].mxu0 %v11877_v51  ;;  %v12091_v12 = vpack.c.bf16 %v6926_v13, %v6922_v30 }
 0x17d   : > { %9842 = vmatprep.subr.bf16.mxu1 %v9841_v53  ;;  %9796 = vmatpush1.bf16.msra.mxu0 %v9795_v24  ;;  %v6909_v53 = vld [vmem:[#allocation6 + $0x340] sm:$0xff]  ;;  %v7019_v56 = vsub.f32 %v12080_v31, %v7018_v57 }
 0x17e   : > { %9798 = vmatprep.subr.bf16.mxu0 %v9797_v34  ;;  %6084 = vmatprep.mubr.f32.mxu0 %v10515_v9  ;;  %v6913_v24 = vld [vmem:[#allocation6 + $0x360] sm:$0xff]  ;;  %v12094_v34 = vsub.f32 %v6901_v28, %v6922_v30  ;;  %v6930_v43 = vand.u32 4294901760, %v6909_v53  ;;  %v7006_v28 = vand.u32 4294901760, %v12078_v62 }
 0x17f   : > { %6541 = vmatmul.mubr.f32.vlgmr.msra.gmra.mrb[0].mxu1 %v11877_v51  ;;  %v6934_v15 = vand.u32 4294901760, %v6913_v24 }
 0x180   : > { %9844 = vmatpush1.bf16.msra.mxu1 %v9843_v27  ;;  %6627 = vmatprep.mubr.f32.mxu1 %v10515_v9  ;;  %v12096_v27 = vsub.f32 %v6905_v35, %v6926_v13  ;;  %v12115_v35 = vsub.f32 %v6914_v22, %v6932_v40  ;;  %v12138_v30 = vsub.f32 %v6909_v53, %v6930_v43 }
 0x181   : > { %9846 = vmatprep.subr.bf16.mxu1 %v9845_v52  ;;  %9800 = vmatpush1.bf16.msra.mxu0 %v9799_v21  ;;  %v7471_v52 = vand.u32 4294901760, %v6912_v0  ;;  %v7475_v21 = vand.u32 4294901760, %v6916_v6  ;;  %v12146_v22 = vsub.f32 %v6913_v24, %v6934_v15 }
 0x182   : > { %9802 = vmatprep.subr.bf16.mxu0 %v11846_v42  ;;  %v12657_v40 = vand.u32 4294901760, %v12138_v30 }
 0x183   : > { %v12126_v32 = vsub.f32 %v6916_v6, %v7475_v21  ;;  %v7020_v6 = vand.u32 4294901760, %v7019_v56 }
 0x184   : > { %9848 = vmatpush1.bf16.msra.mxu1 %v9847_v59  ;;  %6087 = vmatmul.mubr.f32.vlgmr.msra.gmra.mrb[0].mxu0 %v11901_v19  ;;  %v12098_v59 = vld [vmem:[#allocation6 + $0x350] sm:$0xff] }
 0x185   : > { %9850 = vmatprep.subr.bf16.mxu1 %v11857_v33  ;;  %9804 = vmatpush1.bf16.msra.mxu0 %v11864_v8 }
 0x186   : > { %9806 = vmatprep.subr.bf16.mxu0 %v11883_v48  ;;  %6165 = vmatprep.mubr.f32.mxu0 %v10515_v9 }
 0x187   : > { %6630 = vmatmul.mubr.f32.vlgmr.msra.gmra.mrb[0].mxu1 %v11901_v19  ;;  %v7463_v19 = vand.u32 4294901760, %v6904_v47 }
 0x188   : > { %9852 = vmatpush1.bf16.msra.mxu1 %v11871_v50  ;;  %6708 = vmatprep.mubr.f32.mxu1 %v10515_v9 }
 0x189   : > { %9854 = vmatprep.subr.bf16.mxu1 %v11892_v18  ;;  %9808 = vmatpush1.bf16.msra.mxu0 %v11906_v45  ;;  %v12084_v2 = vsub.f32 %v6904_v47, %v7463_v19  ;;  %v12087_v55 = vpack.c.bf16 %v7467_v63, %v7463_v19  ;;  %v12105_v47 = vsub.f32 %v6907_v11, %v7469_v1  ;;  %v7024_v63 = vand.u32 4294901760, %v12096_v27 }
 0x18a   : > { %9810 = vmatprep.subr.bf16.mxu0 %v9809_v23  ;;  %v12107_v23 = vand.u32 4294901760, %v6918_v16  ;;  %v12124_v19 = vsub.f32 %v6912_v0, %v7471_v52 }
 0x18b   : > { %v7549_v11 = vand.u32 4294901760, %v12084_v2  ;;  %v12659_v1 = vand.u32 4294901760, %v12105_v47 }
 0x18c   : > { %9856 = vmatpush1.bf16.msra.mxu1 %v11997_v25  ;;  %6169 = vmatmul.mubr.f32.vlgmr.msra.gmra.mrb[0].mxu0 %v11938_v60  ;;  %v12130_v36 = vsub.f32 %v6918_v16, %v12107_v23  ;;  %v12653_v0 = vand.u32 4294901760, %v12124_v19 }
 0x18d   : > { %9858 = vmatprep.subr.bf16.mxu1 %v9857_v54  ;;  %9812 = vmatpush1.bf16.msra.mxu0 %v9811_v41  ;;  %v12117_v54 = vld [vmem:[#allocation6 + $0x370] sm:$0xff]  ;;  %v7473_v41 = vand.u32 4294901760, %v12098_v59 }
 0x18e   : > { %9814 = vmatprep.subr.bf16.mxu0 %v9813_v61  ;;  %6263 = vmatprep.mubr.f32.mxu0 %v10515_v9  ;;  %v7012_v61 = vand.u32 4294901760, %v12094_v34  ;;  %v7477_v13 = vand.u32 4294901760, %v12117_v54  ;;  %v12166_v3 = vand.u32 4294901760, %v12130_v36 }
 0x18f   : > { %6712 = vmatmul.mubr.f32.vlgmr.msra.gmra.mrb[0].mxu1 %v11938_v60  ;;  %v12113_v60 = vsub.f32 %v6910_v29, %v6928_v26  ;;  %v7007_v29 = vsub.f32 %v12078_v62, %v7006_v28  ;;  %v12151_v58 = vsub.f32 %v12098_v59, %v7473_v41  ;;  %v12654_v26 = vand.u32 4294901760, %v12126_v32 }
 0x190   : > { %9860 = vmatpush1.bf16.msra.mxu1 %v9859_v44  ;;  %6806 = vmatprep.mubr.f32.mxu1 %v10515_v9  ;;  %v12122_v44 = vpack.c.bf16 %v7475_v21, %v7471_v52  ;;  %v7013_v5 = vsub.f32 %v12094_v34, %v7012_v61  ;;  %v6996_v24 = vsub.f32 %v12130_v36, %v12166_v3 }
 0x191   : > { %9862 = vmatprep.subr.bf16.mxu1 %v9861_v20  ;;  %9816 = vmatpush1.bf16.msra.mxu0 %v9815_v10  ;;  %v12656_v4 = vand.u32 4294901760, %v12113_v60  ;;  %v12655_v20 = vand.u32 4294901760, %v12115_v35  ;;  %v7025_v10 = vsub.f32 %v12096_v27, %v7024_v63  ;;  %v7008_v17 = vand.u32 4294901760, %v7007_v29 }
 0x192   : > { %9818 = vmatprep.subr.bf16.mxu0 %v11846_v42  ;;  %v12136_v42 = vpack.c.bf16 %v6934_v15, %v6930_v43  ;;  %v7014_v21 = vand.u32 4294901760, %v7013_v5  ;;  %v7568_v15 = vsub.f32 %v12105_v47, %v12659_v1  ;;  %v7579_v29 = vand.u32 4294901760, %v12151_v58 }
 0x193   : > { %v7026_v43 = vand.u32 4294901760, %v7025_v10  ;;  %v9881_v5 = vpack.c.bf16 %v7020_v6, %v7008_v17 }
 0x194   : > { %9864 = vmatpush1.bf16.msra.mxu1 %v9863_v46  ;;  %6265 = vmatmul.mubr.f32.vlgmr.msra.gmra.mrb[0].mxu0 %v11877_v51  ;;  %v12180_v46 = vsub.f32 %v12117_v54, %v7477_v13  ;;  %v7574_v54 = vsub.f32 %v12124_v19, %v12653_v0  ;;  %v7569_v1 = vand.u32 4294901760, %v7568_v15  ;;  %v7580_v17 = vsub.f32 %v12151_v58, %v7579_v29 }
 0x195   : > { %9866 = vmatprep.subr.bf16.mxu1 %v11857_v33  ;;  %9820 = vmatpush1.bf16.msra.mxu0 %v11864_v8  ;;  %v7550_v33 = vsub.f32 %v12084_v2, %v7549_v11  ;;  %v7555_v8 = vand.u32 4294901760, %v12103_v7 }
 0x196   : > { %9822 = vmatprep.subr.bf16.mxu0 %v11883_v48  ;;  %6343 = vmatprep.mubr.f32.mxu0 %v10515_v9  ;;  %v7562_v48 = vsub.f32 %v12089_v49, %v7561_v38  ;;  %v7591_v56 = vand.u32 4294901760, %v12180_v46  ;;  %v7575_v59 = vand.u32 4294901760, %v7574_v54  ;;  %v9943_v15 = vpack.c.bf16 %v12180_v46, %v12151_v58  ;;  %v8014_v54 = vld [vmem:[#allocation6 + $0x388] sm:$0xff] }
 0x197   : > { %6808 = vmatmul.mubr.f32.vlgmr.msra.gmra.mrb[0].mxu1 %v11877_v51  ;;  %v7551_v16 = vand.u32 4294901760, %v7550_v33  ;;  %v7556_v53 = vsub.f32 %v12103_v7, %v7555_v8  ;;  %v7037_v33 = vsub.f32 %v12138_v30, %v12657_v40 }
 0x198   : > { %9868 = vmatpush1.bf16.msra.mxu1 %v11871_v50  ;;  %6886 = vmatprep.mubr.f32.mxu1 %v10515_v9  ;;  %v12658_v50 = vand.u32 4294901760, %v12146_v22  ;;  %v7563_v52 = vand.u32 4294901760, %v7562_v48 }
 0x199   : > { %9870 = vmatprep.subr.bf16.mxu1 %v11892_v18  ;;  %9824 = vmatpush1.bf16.msra.mxu0 %v11906_v45  ;;  %v7031_v18 = vsub.f32 %v12113_v60, %v12656_v4  ;;  %v7043_v45 = vsub.f32 %v12115_v35, %v12655_v20  ;;  %v6997_v20 = vand.u32 4294901760, %v6996_v24  ;;  %v7557_v40 = vand.u32 4294901760, %v7556_v53 }
 0x19a   : > { %9874 = vmatprep.subr.bf16.mxu0 %v12076_v39  ;;  %v7049_v48 = vsub.f32 %v12146_v22, %v12658_v50  ;;  %v9929_v4 = vpack.c.bf16 %v7563_v52, %v7551_v16  ;;  %v9883_v50 = vpack.c.bf16 %v7026_v43, %v7014_v21  ;;  %v9889_v21 = vpack.c.bf16 %v12080_v31, %v12078_v62 }
 0x19b   : > { %v7032_v10 = vand.u32 4294901760, %v7031_v18  ;;  %v7044_v0 = vand.u32 4294901760, %v7043_v45  ;;  %v9931_v53 = vpack.c.bf16 %v7569_v1, %v7557_v40  ;;  %v7581_v18 = vand.u32 4294901760, %v7580_v17 }
 0x19c   : > { %9872 = vmatpush1.bf16.msra.mxu1 %v11997_v25  ;;  %6345 = vmatmul.mubr.f32.vlgmr.msra.gmra.mrb[0].mxu0 %v11877_v51  ;;  %v7586_v25 = vsub.f32 %v12126_v32, %v12654_v26  ;;  %v12227_v26 = vpack.c.bf16 %v7477_v13, %v7473_v41  ;;  %v7038_v13 = vand.u32 4294901760, %v7037_v33  ;;  %v7050_v6 = vand.u32 4294901760, %v7049_v48  ;;  %v8016_v33 = vld [vmem:[#allocation6 + $0x398] sm:$0xff] }
 0x19d   : > { %9922 = vmatprep.subr.bf16.mxu1 %v12087_v55  ;;  %9876 = vmatpush1.bf16.msra.mxu0 %v12091_v12  ;;  %v9885_v16 = vpack.c.bf16 %v7044_v0, %v7032_v10  ;;  %v9937_v1 = vpack.c.bf16 %v12089_v49, %v12084_v2  ;;  %v9893_v0 = vpack.c.bf16 %v12115_v35, %v12113_v60  ;;  %v8020_v48 = vld [vmem:[#allocation6 + $0x3b8] sm:$0xff]  ;;  %v8032_v10 = vand.u32 4294901760, %v8014_v54 }
 0x19e   : > { %9878 = vmatprep.subr.bf16.mxu0 %v12110_v37  ;;  %6992 = vmatprep.mubr.f32.mxu0 %v10515_v9  ;;  %v7587_v41 = vand.u32 4294901760, %v7586_v25  ;;  %v9887_v52 = vpack.c.bf16 %v7050_v6, %v7038_v13  ;;  %v9941_v40 = vpack.c.bf16 %v12126_v32, %v12124_v19  ;;  %v8018_v25 = vld [vmem:[#allocation6 + $0x3a8] sm:$0xff]  ;;  %v9907_v62 = vpack.c.bf16 %v7024_v63, %v7012_v61  ;;  %v8019_v13 = vld [vmem:[#allocation6 + $0x3b0] sm:$0xff]  ;;  %v9283_v6 = vld [vmem:[%s10712_s8 + $0x38] sm:$0xff] }
 0x19f   : > { %6888 = vmatmul.mubr.f32.vlgmr.msra.gmra.mrb[0].mxu1 %v11877_v51  ;;  %v7592_v51 = vsub.f32 %v12180_v46, %v7591_v56  ;;  %v8036_v17 = vand.u32 4294901760, %v8018_v25  ;;  %v8575_v31 = vand.u32 4294901760, %v8016_v33  ;;  %v12714_v2 = vand.u32 4294901760, %v12105_v47  ;;  %v8022_v61 = vld [vmem:[#allocation6 + $0x3c8] sm:$0xff] }
 0x1a0   : > { %9924 = vmatpush1.bf16.msra.mxu1 %v12101_v14  ;;  %7535 = vmatprep.mubr.f32.mxu1 %v10515_v9  ;;  %v9933_v24 = vpack.c.bf16 %v7587_v41, %v7575_v59  ;;  %v8017_v59 = vld [vmem:[#allocation6 + $0x3a0] sm:$0xff]  ;;  %v9953_v41 = vpack.c.bf16 %v7561_v38, %v7549_v11  ;;  %v12715_v49 = vand.u32 4294901760, %v12113_v60  ;;  %v8026_v63 = vld [vmem:[#allocation6 + $0x3e8] sm:$0xff]  ;;  %v9959_v60 = vpack.c.bf16 %v7591_v56, %v7579_v29 }
 0x1a1   : > { %9926 = vmatprep.subr.bf16.mxu1 %v12122_v44  ;;  %9880 = vmatpush1.bf16.msra.mxu0 %v12136_v42  ;;  %v7593_v45 = vand.u32 4294901760, %v7592_v51  ;;  %v8013_v51 = vld [vmem:[#allocation6 + $0x380] sm:$0xff]  ;;  %v8038_v38 = vand.u32 4294901760, %v8017_v59  ;;  %v8044_v58 = vand.u32 4294901760, %v8026_v63  ;;  %v8030_v46 = vsel %vm271_vm0, %v9283_v6, 0 }
 0x1a2   : > { %9882 = vmatprep.subr.bf16.mxu0 %v9881_v5  ;;  %v9905_v5 = vpack.c.bf16 %v7018_v57, %v7006_v28  ;;  %v8579_v28 = vand.u32 4294901760, %v8020_v48  ;;  %v8015_v57 = vld [vmem:[#allocation6 + $0x390] sm:$0xff]  ;;  %v12317_v29 = vsub.f32 %v8016_v33, %v8575_v31 }
 0x1a3   : > { %v9935_v43 = vpack.c.bf16 %v7593_v45, %v7581_v18  ;;  %v12308_v45 = vsub.f32 %v8014_v54, %v8032_v10 }
 0x1a4   : > { %9928 = vmatpush1.bf16.msra.mxu1 %v12227_v26  ;;  %6998 = vmatmul.mubr.f32.vlgmr.msra.gmra.mrb[0].mxu0 %v6997_v20  ;;  %v12319_v56 = vsub.f32 %v8020_v48, %v8579_v28  ;;  %v12337_v48 = vand.u32 4294901760, %v8030_v46 }
 0x1a5   : > { %9930 = vmatprep.subr.bf16.mxu1 %v9929_v4  ;;  %9884 = vmatpush1.bf16.msra.mxu0 %v9883_v50  ;;  %v9891_v4 = vpack.c.bf16 %v12096_v27, %v12094_v34  ;;  %v9895_v50 = vpack.c.bf16 %v12146_v22, %v12138_v30  ;;  %v12716_v34 = vand.u32 4294901760, %v12115_v35  ;;  %v8034_v27 = vand.u32 4294901760, %v8013_v51 }
 0x1a6   : > { %9886 = vmatprep.subr.bf16.mxu0 %v9885_v16  ;;  %7108 = vmatprep.mubr.f32.mxu0 %v10515_v9  ;;  %v12717_v16 = vand.u32 4294901760, %v12124_v19  ;;  %v12306_v35 = vpack.c.bf16 %v8036_v17, %v8032_v10  ;;  %v8577_v19 = vand.u32 4294901760, %v8015_v57 }
 0x1a7   : > { %7541 = vmatmul.mubr.f32.vlgmr.msra.gmra.mrb[0].mxu1 %v6997_v20  ;;  %v9939_v20 = vpack.c.bf16 %v12105_v47, %v12103_v7  ;;  %v9909_v11 = vpack.c.bf16 %v12716_v34, %v12715_v49  ;;  %v12719_v7 = vand.u32 4294901760, %v12138_v30  ;;  %v12720_v47 = vand.u32 4294901760, %v12146_v22 }
 0x1a8   : > { %9932 = vmatpush1.bf16.msra.mxu1 %v9931_v53  ;;  %7651 = vmatprep.mubr.f32.mxu1 %v10515_v9  ;;  %v12718_v53 = vand.u32 4294901760, %v12126_v32  ;;  %v8024_v32 = vld [vmem:[#allocation6 + $0x3d8] sm:$0xff]  ;;  %v12314_v30 = vpack.c.bf16 %v8579_v28, %v8575_v31  ;;  %v8040_v22 = vand.u32 4294901760, %v8022_v61  ;;  %v12361_v49 = vsub.f32 %v8030_v46, %v12337_v48 }
 0x1a9   : > { %9934 = vmatprep.subr.bf16.mxu1 %v9933_v24  ;;  %9888 = vmatpush1.bf16.msra.mxu0 %v9887_v52  ;;  %v12310_v24 = vsub.f32 %v8018_v25, %v8036_v17  ;;  %v8581_v52 = vand.u32 4294901760, %v8019_v13  ;;  %v12333_v25 = vsub.f32 %v8015_v57, %v8577_v19 }
 0x1aa   : > { %9890 = vmatprep.subr.bf16.mxu0 %v9889_v21  ;;  %v9957_v18 = vpack.c.bf16 %v12718_v53, %v12717_v16  ;;  %v8028_v21 = vld [vmem:[#allocation6 + $0x3f8] sm:$0xff] }
 0x1ab   : > { %v12331_v54 = vpack.c.bf16 %v8581_v52, %v8577_v19  ;;  %v12335_v33 = vsub.f32 %v8019_v13, %v8581_v52  ;;  %v8130_v31 = vand.u32 4294901760, %v12310_v24  ;;  %v8661_v13 = vand.u32 4294901760, %v12317_v29 }
 0x1ac   : > { %9936 = vmatpush1.bf16.msra.mxu1 %v9935_v43  ;;  %7110 = vmatmul.mubr.f32.vlgmr.msra.gmra.mrb[0].mxu0 %v12107_v23  ;;  %v12321_v43 = vpack.c.bf16 %v8038_v38, %v8034_v27 }
 0x1ad   : > { %9938 = vmatprep.subr.bf16.mxu1 %v9937_v1  ;;  %9892 = vmatpush1.bf16.msra.mxu0 %v9891_v4  ;;  %v8021_v1 = vld [vmem:[#allocation6 + $0x3c0] sm:$0xff]  ;;  %v8131_v16 = vsub.f32 %v12310_v24, %v8130_v31  ;;  %v12662_v52 = vand.u32 4294901760, %v12335_v33 }
 0x1ae   : > { %9894 = vmatprep.subr.bf16.mxu0 %v9893_v0  ;;  %7196 = vmatprep.mubr.f32.mxu0 %v10515_v9  ;;  %v8025_v4 = vld [vmem:[#allocation6 + $0x3e0] sm:$0xff]  ;;  %v12324_v0 = vsub.f32 %v8013_v51, %v8034_v27  ;;  %v8042_v10 = vand.u32 4294901760, %v8021_v1  ;;  %v8118_v51 = vand.u32 4294901760, %v12308_v45 }
 0x1af   : > { %7653 = vmatmul.mubr.f32.vlgmr.msra.gmra.mrb[0].mxu1 %v12107_v23  ;;  %v8046_v17 = vand.u32 4294901760, %v8025_v4 }
 0x1b0   : > { %9940 = vmatpush1.bf16.msra.mxu1 %v9939_v20  ;;  %7739 = vmatprep.mubr.f32.mxu1 %v10515_v9  ;;  %v12326_v20 = vsub.f32 %v8017_v59, %v8038_v38  ;;  %v12345_v59 = vsub.f32 %v8026_v63, %v8044_v58  ;;  %v8124_v34 = vand.u32 4294901760, %v12324_v0  ;;  %v12368_v27 = vsub.f32 %v8021_v1, %v8042_v10 }
 0x1b1   : > { %9942 = vmatprep.subr.bf16.mxu1 %v9941_v40  ;;  %9896 = vmatpush1.bf16.msra.mxu0 %v9895_v50  ;;  %v8583_v40 = vand.u32 4294901760, %v8024_v32  ;;  %v8587_v50 = vand.u32 4294901760, %v8028_v21  ;;  %v12376_v63 = vsub.f32 %v8025_v4, %v8046_v17 }
 0x1b2   : > { %9898 = vmatprep.subr.bf16.mxu0 %v12076_v39 }
 0x1b3   : > { %v12352_v28 = vpack.c.bf16 %v8587_v50, %v8583_v40  ;;  %v12354_v57 = vsub.f32 %v8024_v32, %v8583_v40 }
 0x1b4   : > { %9944 = vmatpush1.bf16.msra.mxu1 %v9943_v15  ;;  %7199 = vmatmul.mubr.f32.vlgmr.msra.gmra.mrb[0].mxu0 %v12130_v36  ;;  %v12328_v15 = vld [vmem:[#allocation6 + $0x3d0] sm:$0xff] }
 0x1b5   : > { %9946 = vmatprep.subr.bf16.mxu1 %v12087_v55  ;;  %9900 = vmatpush1.bf16.msra.mxu0 %v12091_v12  ;;  %v12660_v32 = vand.u32 4294901760, %v12354_v57 }
 0x1b6   : > { %9902 = vmatprep.subr.bf16.mxu0 %v12110_v37  ;;  %7277 = vmatprep.mubr.f32.mxu0 %v10515_v9 }
 0x1b7   : > { %7742 = vmatmul.mubr.f32.vlgmr.msra.gmra.mrb[0].mxu1 %v12130_v36  ;;  %v9955_v36 = vpack.c.bf16 %v12714_v2, %v7555_v8  ;;  %v9911_v8 = vpack.c.bf16 %v12720_v47, %v12719_v7  ;;  %v8673_v2 = vand.u32 4294901760, %v12319_v56  ;;  %v12398_v7 = vand.u32 4294901760, %v12361_v49 }
 0x1b8   : > { %9948 = vmatpush1.bf16.msra.mxu1 %v12101_v14  ;;  %7820 = vmatprep.mubr.f32.mxu1 %v10515_v9 }
 0x1b9   : > { %9950 = vmatprep.subr.bf16.mxu1 %v12122_v44  ;;  %9904 = vmatpush1.bf16.msra.mxu0 %v12136_v42 }
 0x1ba   : > { %9906 = vmatprep.subr.bf16.mxu0 %v9905_v5  ;;  %v12340_v5 = vpack.c.bf16 %v8044_v58, %v8040_v22  ;;  %v12664_v58 = vand.u32 4294901760, %v12368_v27 }
 0x1bc   : > { %9952 = vmatpush1.bf16.msra.mxu1 %v12227_v26  ;;  %7281 = vmatmul.mubr.f32.vlgmr.msra.gmra.mrb[0].mxu0 %v12166_v3 }
 0x1bd   : > { %9954 = vmatprep.subr.bf16.mxu1 %v9953_v41  ;;  %9908 = vmatpush1.bf16.msra.mxu0 %v9907_v62  ;;  %v12347_v41 = vld [vmem:[#allocation6 + $0x3f0] sm:$0xff]  ;;  %v8585_v62 = vand.u32 4294901760, %v12328_v15 }
 0x1be   : > { %9910 = vmatprep.subr.bf16.mxu0 %v9909_v11  ;;  %7375 = vmatprep.mubr.f32.mxu0 %v10515_v9  ;;  %v8136_v11 = vand.u32 4294901760, %v12326_v20  ;;  %v8589_v38 = vand.u32 4294901760, %v12347_v41 }
 0x1bf   : > { %7824 = vmatmul.mubr.f32.vlgmr.msra.gmra.mrb[0].mxu1 %v12166_v3  ;;  %v12343_v3 = vsub.f32 %v8022_v61, %v8040_v22  ;;  %v8119_v61 = vsub.f32 %v12308_v45, %v8118_v51  ;;  %v12381_v6 = vsub.f32 %v12328_v15, %v8585_v62 }
 0x1c0   : > { %9956 = vmatpush1.bf16.msra.mxu1 %v9955_v36  ;;  %7918 = vmatprep.mubr.f32.mxu1 %v10515_v9  ;;  %v12358_v36 = vsub.f32 %v8028_v21, %v8587_v50  ;;  %v8137_v47 = vsub.f32 %v12326_v20, %v8136_v11  ;;  %v8132_v21 = vand.u32 4294901760, %v8131_v16 }
 0x1c1   : > { %9958 = vmatprep.subr.bf16.mxu1 %v9957_v18  ;;  %9912 = vmatpush1.bf16.msra.mxu0 %v9911_v8  ;;  %v8142_v53 = vand.u32 4294901760, %v12343_v3  ;;  %v12666_v18 = vand.u32 4294901760, %v12345_v59  ;;  %v12663_v8 = vand.u32 4294901760, %v12333_v25  ;;  %v8120_v19 = vand.u32 4294901760, %v8119_v61 }
 0x1c2   : > { %9914 = vmatprep.subr.bf16.mxu0 %v12076_v39  ;;  %v12366_v39 = vpack.c.bf16 %v8046_v17, %v8042_v10  ;;  %v12661_v22 = vand.u32 4294901760, %v12358_v36  ;;  %v8138_v50 = vand.u32 4294901760, %v8137_v47  ;;  %v8680_v17 = vsub.f32 %v12335_v33, %v12662_v52 }
 0x1c3   : > { %v8143_v4 = vsub.f32 %v12343_v3, %v8142_v53  ;;  %v8668_v10 = vsub.f32 %v12333_v25, %v12663_v8  ;;  %v8691_v61 = vand.u32 4294901760, %v12381_v6 }
 0x1c4   : > { %9960 = vmatpush1.bf16.msra.mxu1 %v9959_v60  ;;  %7377 = vmatmul.mubr.f32.vlgmr.msra.gmra.mrb[0].mxu0 %v12107_v23  ;;  %v12410_v60 = vsub.f32 %v12347_v41, %v8589_v38  ;;  %v8686_v41 = vsub.f32 %v12354_v57, %v12660_v32 }
 0x1c5   : > { %9962 = vmatprep.subr.bf16.mxu1 %v12087_v55  ;;  %9916 = vmatpush1.bf16.msra.mxu0 %v12091_v12  ;;  %v8662_v55 = vsub.f32 %v12317_v29, %v8661_v13  ;;  %v8674_v12 = vsub.f32 %v12319_v56, %v8673_v2  ;;  %v8144_v47 = vand.u32 4294901760, %v8143_v4 }
 0x1c6   : > { %9918 = vmatprep.subr.bf16.mxu0 %v12110_v37  ;;  %7455 = vmatprep.mubr.f32.mxu0 %v10515_v9  ;;  %v8125_v37 = vsub.f32 %v12324_v0, %v8124_v34  ;;  %v8703_v16 = vand.u32 4294901760, %v12410_v60  ;;  %v8687_v15 = vand.u32 4294901760, %v8686_v41  ;;  %v10001_v41 = vpack.c.bf16 %v8130_v31, %v8118_v51 }
 0x1c7   : > { %7920 = vmatmul.mubr.f32.vlgmr.msra.gmra.mrb[0].mxu1 %v12107_v23  ;;  %v8663_v46 = vand.u32 4294901760, %v8662_v55  ;;  %v8675_v1 = vand.u32 4294901760, %v8674_v12  ;;  %v8149_v55 = vsub.f32 %v12368_v27, %v12664_v58  ;;  %v8669_v58 = vand.u32 4294901760, %v8668_v10 }
 0x1c8   : > { %9964 = vmatpush1.bf16.msra.mxu1 %v12101_v14  ;;  %7998 = vmatprep.mubr.f32.mxu1 %v10515_v9  ;;  %v12665_v14 = vand.u32 4294901760, %v12376_v63  ;;  %v8126_v40 = vand.u32 4294901760, %v8125_v37  ;;  %v9977_v37 = vpack.c.bf16 %v8132_v21, %v8120_v19  ;;  %v8692_v19 = vsub.f32 %v12381_v6, %v8691_v61 }
 0x1c9   : > { %9966 = vmatprep.subr.bf16.mxu1 %v12122_v44  ;;  %9920 = vmatpush1.bf16.msra.mxu0 %v12136_v42  ;;  %v8155_v44 = vsub.f32 %v12345_v59, %v12666_v18  ;;  %v8108_v42 = vsub.f32 %v12361_v49, %v12398_v7  ;;  %v10025_v8 = vpack.c.bf16 %v8675_v1, %v8663_v46  ;;  %v8681_v18 = vand.u32 4294901760, %v8680_v17 }
 0x1ca   : > { %9970 = vmatprep.subr.bf16.mxu0 %v12306_v35  ;;  %v8161_v12 = vsub.f32 %v12376_v63, %v12665_v14  ;;  %v9979_v14 = vpack.c.bf16 %v8138_v50, %v8126_v40  ;;  %v8693_v4 = vand.u32 4294901760, %v8692_v19  ;;  %v9985_v50 = vpack.c.bf16 %v12310_v24, %v12308_v45 }
 0x1cb   : > { %v8156_v32 = vand.u32 4294901760, %v8155_v44  ;;  %v8109_v52 = vand.u32 4294901760, %v8108_v42  ;;  %v10027_v1 = vpack.c.bf16 %v8681_v18, %v8669_v58  ;;  %v10033_v18 = vpack.c.bf16 %v12319_v56, %v12317_v29 }
 0x1cc   : > { %9968 = vmatpush1.bf16.msra.mxu1 %v12227_v26  ;;  %7457 = vmatmul.mubr.f32.vlgmr.msra.gmra.mrb[0].mxu0 %v12107_v23  ;;  %v8698_v26 = vsub.f32 %v12358_v36, %v12661_v22  ;;  %v12457_v22 = vpack.c.bf16 %v8589_v38, %v8585_v62  ;;  %v8150_v38 = vand.u32 4294901760, %v8149_v55  ;;  %v8162_v21 = vand.u32 4294901760, %v8161_v12 }
 0x1cd   : > { %10018 = vmatprep.subr.bf16.mxu1 %v12314_v30  ;;  %9972 = vmatpush1.bf16.msra.mxu0 %v12321_v43  ;;  %v9981_v46 = vpack.c.bf16 %v8156_v32, %v8144_v47  ;;  %v9989_v32 = vpack.c.bf16 %v12345_v59, %v12343_v3  ;;  %v10037_v58 = vpack.c.bf16 %v12358_v36, %v12354_v57  ;;  %v12721_v24 = vand.u32 4294901760, %v12345_v59 }
 0x1ce   : > { %9974 = vmatprep.subr.bf16.mxu0 %v12340_v5  ;;  %8104 = vmatprep.mubr.f32.mxu0 %v10515_v9  ;;  %v8699_v62 = vand.u32 4294901760, %v8698_v26  ;;  %v9983_v40 = vpack.c.bf16 %v8162_v21, %v8150_v38  ;;  %v10039_v17 = vpack.c.bf16 %v12410_v60, %v12381_v6  ;;  %v10049_v26 = vpack.c.bf16 %v8673_v2, %v8661_v13 }
 0x1cf   : > { %8000 = vmatmul.mubr.f32.vlgmr.msra.gmra.mrb[0].mxu1 %v12107_v23  ;;  %v8704_v23 = vsub.f32 %v12410_v60, %v8703_v16  ;;  %v10003_v45 = vpack.c.bf16 %v8136_v11, %v8124_v34  ;;  %v10005_v51 = vpack.c.bf16 %v12721_v24, %v8142_v53  ;;  %v12722_v29 = vand.u32 4294901760, %v12333_v25 }
 0x1d0   : > { %10020 = vmatpush1.bf16.msra.mxu1 %v12331_v54  ;;  %8647 = vmatprep.mubr.f32.mxu1 %v10515_v9  ;;  %v10029_v42 = vpack.c.bf16 %v8699_v62, %v8687_v15  ;;  %v12723_v56 = vand.u32 4294901760, %v12335_v33  ;;  %v12726_v3 = vand.u32 4294901760, %v12368_v27  ;;  %v12727_v59 = vand.u32 4294901760, %v12376_v63 }
 0x1d1   : > { %10022 = vmatprep.subr.bf16.mxu1 %v12352_v28  ;;  %9976 = vmatpush1.bf16.msra.mxu0 %v12366_v39  ;;  %v8705_v44 = vand.u32 4294901760, %v8704_v23 }
 0x1d2   : > { %9978 = vmatprep.subr.bf16.mxu0 %v9977_v37  ;;  %v10051_v31 = vpack.c.bf16 %v12723_v56, %v12722_v29  ;;  %v10007_v2 = vpack.c.bf16 %v12727_v59, %v12726_v3 }
 0x1d3   : > { %v10031_v10 = vpack.c.bf16 %v8705_v44, %v8693_v4 }
 0x1d4   : > { %10024 = vmatpush1.bf16.msra.mxu1 %v12457_v22  ;;  %8110 = vmatmul.mubr.f32.vlgmr.msra.gmra.mrb[0].mxu0 %v8109_v52 }
 0x1d5   : > { %10026 = vmatprep.subr.bf16.mxu1 %v10025_v8  ;;  %9980 = vmatpush1.bf16.msra.mxu0 %v9979_v14  ;;  %v9987_v8 = vpack.c.bf16 %v12326_v20, %v12324_v0  ;;  %v9991_v14 = vpack.c.bf16 %v12376_v63, %v12368_v27  ;;  %v12724_v0 = vand.u32 4294901760, %v12354_v57  ;;  %v12725_v20 = vand.u32 4294901760, %v12358_v36 }
 0x1d6   : > { %9982 = vmatprep.subr.bf16.mxu0 %v9981_v46  ;;  %8220 = vmatprep.mubr.f32.mxu0 %v10515_v9 }
 0x1d7   : > { %8653 = vmatmul.mubr.f32.vlgmr.msra.gmra.mrb[0].mxu1 %v8109_v52  ;;  %v10035_v52 = vpack.c.bf16 %v12335_v33, %v12333_v25  ;;  %v10053_v13 = vpack.c.bf16 %v12725_v20, %v12724_v0  ;;  %v10055_v25 = vpack.c.bf16 %v8703_v16, %v8691_v61 }
 0x1d8   : > { %10028 = vmatpush1.bf16.msra.mxu1 %v10027_v1  ;;  %8763 = vmatprep.mubr.f32.mxu1 %v10515_v9 }
 0x1d9   : > { %10030 = vmatprep.subr.bf16.mxu1 %v10029_v42  ;;  %9984 = vmatpush1.bf16.msra.mxu0 %v9983_v40 }
 0x1da   : > { %9986 = vmatprep.subr.bf16.mxu0 %v9985_v50 }
 0x1dc   : > { %10032 = vmatpush1.bf16.msra.mxu1 %v10031_v10  ;;  %8222 = vmatmul.mubr.f32.vlgmr.msra.gmra.mrb[0].mxu0 %v12337_v48 }
 0x1dd   : > { %10034 = vmatprep.subr.bf16.mxu1 %v10033_v18  ;;  %9988 = vmatpush1.bf16.msra.mxu0 %v9987_v8 }
 0x1de   : > { %9990 = vmatprep.subr.bf16.mxu0 %v9989_v32  ;;  %8308 = vmatprep.mubr.f32.mxu0 %v10515_v9 }
 0x1df   : > { %8765 = vmatmul.mubr.f32.vlgmr.msra.gmra.mrb[0].mxu1 %v12337_v48 }
 0x1e0   : > { %10036 = vmatpush1.bf16.msra.mxu1 %v10035_v52  ;;  %8851 = vmatprep.mubr.f32.mxu1 %v10515_v9 }
 0x1e1   : > { %10038 = vmatprep.subr.bf16.mxu1 %v10037_v58  ;;  %9992 = vmatpush1.bf16.msra.mxu0 %v9991_v14 }
 0x1e2   : > { %9994 = vmatprep.subr.bf16.mxu0 %v12306_v35 }
 0x1e4   : > { %10040 = vmatpush1.bf16.msra.mxu1 %v10039_v17  ;;  %8311 = vmatmul.mubr.f32.vlgmr.msra.gmra.mrb[0].mxu0 %v12361_v49 }
 0x1e5   : > { %10042 = vmatprep.subr.bf16.mxu1 %v12314_v30  ;;  %9996 = vmatpush1.bf16.msra.mxu0 %v12321_v43 }
 0x1e6   : > { %9998 = vmatprep.subr.bf16.mxu0 %v12340_v5  ;;  %8389 = vmatprep.mubr.f32.mxu0 %v10515_v9 }
 0x1e7   : > { %8854 = vmatmul.mubr.f32.vlgmr.msra.gmra.mrb[0].mxu1 %v12361_v49 }
 0x1e8   : > { %10044 = vmatpush1.bf16.msra.mxu1 %v12331_v54  ;;  %8932 = vmatprep.mubr.f32.mxu1 %v10515_v9 }
 0x1e9   : > { %10046 = vmatprep.subr.bf16.mxu1 %v12352_v28  ;;  %10000 = vmatpush1.bf16.msra.mxu0 %v12366_v39 }
 0x1ea   : > { %10002 = vmatprep.subr.bf16.mxu0 %v10001_v41 }
 0x1ec   : > { %10048 = vmatpush1.bf16.msra.mxu1 %v12457_v22  ;;  %8393 = vmatmul.mubr.f32.vlgmr.msra.gmra.mrb[0].mxu0 %v12398_v7 }
 0x1ed   : > { %10050 = vmatprep.subr.bf16.mxu1 %v10049_v26  ;;  %10004 = vmatpush1.bf16.msra.mxu0 %v10003_v45 }
 0x1ee   : > { %10006 = vmatprep.subr.bf16.mxu0 %v10005_v51  ;;  %8487 = vmatprep.mubr.f32.mxu0 %v10515_v9 }
 0x1ef   : > { %8936 = vmatmul.mubr.f32.vlgmr.msra.gmra.mrb[0].mxu1 %v12398_v7 }
 0x1f0   : > { %10052 = vmatpush1.bf16.msra.mxu1 %v10051_v31  ;;  %9030 = vmatprep.mubr.f32.mxu1 %v10515_v9 }
 0x1f1   : > { %10054 = vmatprep.subr.bf16.mxu1 %v10053_v13  ;;  %10008 = vmatpush1.bf16.msra.mxu0 %v10007_v2 }
 0x1f2   : > { %10010 = vmatprep.subr.bf16.mxu0 %v12306_v35  ;;  %v9123_v35 = vstv %s9122_s20 }
 0x1f4   : > { %10056 = vmatpush1.bf16.msra.mxu1 %v10055_v25  ;;  %8489 = vmatmul.mubr.f32.vlgmr.msra.gmra.mrb[0].mxu0 %v12337_v48 }
 0x1f5   : > { %10058 = vmatprep.subr.bf16.mxu1 %v12314_v30  ;;  %10012 = vmatpush1.bf16.msra.mxu0 %v12321_v43  ;;  %v9127_v30 = vstv %s9284_s22 }
 0x1f6   : > { %10014 = vmatprep.subr.bf16.mxu0 %v12340_v5  ;;  %8567 = vmatprep.mubr.f32.mxu0 %v10515_v9 }
 0x1f7   : > { %9032 = vmatmul.mubr.f32.vlgmr.msra.gmra.mrb[0].mxu1 %v12337_v48 }
 0x1f8   : > { %10060 = vmatpush1.bf16.msra.mxu1 %v12331_v54  ;;  %9110 = vmatprep.mubr.f32.mxu1 %v10515_v9  ;;  %v9132_v54 = vstv %s9286_s24 }
 0x1f9   : > { %10062 = vmatprep.subr.bf16.mxu1 %v12352_v28  ;;  %10016 = vmatpush1.bf16.msra.mxu0 %v12366_v39  ;;  %v9137_v28 = vstv %s9288_s19 }
 0x1fc   : > { %10064 = vmatpush1.bf16.msra.mxu1 %v12457_v22  ;;  %8569 = vmatmul.mubr.f32.vlgmr.msra.gmra.mrb[0].mxu0 %v12337_v48 }
 0x1ff   : > { %9112 = vmatmul.mubr.f32.vlgmr.msra.gmra.mrb[0].mxu1 %v12337_v48 }
 0x2cf   : > { %v8570_v43 = vpop.f32.mrb[0].mxu0 }
 0x2d0   : > { %v9124_v9 = vadd.f32 %v9123_v35, %v8570_v43  ;;  %v8572_v33 = vpop.f32.mrb[1].mxu0 }
 0x2d1   : > { %v9128_v5 = vadd.f32 %v9127_v30, %v8572_v33 }
 0x2d2   : > { %9125 = vst [vmem:[%s234_s25] sm:$0xff] %v9124_v9  ;;  %v9113_v48 = vpop.f32.mrb[0].mxu1 }
 0x2d3   : > { %v9133_v57 = vadd.f32 %v9132_v54, %v9113_v48  ;;  %9285 = vst [vmem:[%s234_s25 + $0x8] sm:$0xff] %v9128_v5  ;;  %v9115_v36 = vpop.f32.mrb[1].mxu1 }
 0x2d4   : > { %v9138_v49 = vadd.f32 %v9137_v28, %v9115_v36 }
 0x2d5   : > { %9287 = vst [vmem:[%s234_s25 + $0x10] sm:$0xff] %v9133_v57 }
 0x2d6   : > { %9289 = vst [vmem:[%s234_s25 + $0x18] sm:$0xff] %v9138_v49 }
 0x2d7   : > { %10429 = shalt.err (!%p10426_p4)
}
 0x2d8   : > { %s10430_s8 = scalar_lea.hbm %s12561_s21, 512  ;;  %s10434_s24 = scalar_lea.hbm %s12613_s3, 1024 }
 0x2d9   : > { %p10431_p8 = scmp.ne.s32.totalorder %s12561_s21, %s10430_s8  ;;  %p10435_p2 = scmp.lt.u32.totalorder %s12561_s21, %s12613_s3 }
 0x2da   : > { %p10436_p6 = scmp.lt.u32.totalorder %s10434_s24, %s10430_s8  ;;  %p10438_p3 = scmp.lt.u32.totalorder %s10430_s8, %s12561_s21 }
 0x2db   : > { %p10432_p13 = pnand %p10431_p8, %p10653_p12 }
 0x2dc   : > { %p10437_p11 = por %p10436_p6, %p10435_p2 }
 0x2dd   : > { %p10433_p0 = pneg %p10432_p13 }
 0x2de   : > { %p10439_p5 = por %p10438_p3, %p10437_p11 }
 0x2e0   : > { %p10440_p7 = pnand %p10439_p5, %p10433_p0 }
 0x2e2   : > { %10443 = shalt.err (!%p10440_p7)
}
 0x2e3   : > { %s10517_s25 = smov 128   ;;  %s10518_s7 = smov 8  }
 0x2e4   : > { %10263 = dma.vmem_to_hbm [thread:$0]  (%p10653_p12), %s12556_s27, 512, %s12561_s21, %s9142_s15, %s10517_s25, %s10517_s25, %s10518_s7  }
 0x2e5 PF: > { %s9171_s10 = sand.u32 1, %s10486_s12   ;;  %p12728_p9 = scmp.ne.s32.totalorder %s12670_s23, 0 }
 0x2e6   : > { %p12729_p10 = scmp.ge.s32.totalorder %s10506_s17, 2  ;;  %s9172_s11 = scalar_lea.sflag [#allocation4], %s9171_s10 }
 0x2e8   : > { %p10277_p1 = pnand %p12729_p10, %p12728_p9 }
 0x2ea   : > { %10481 = dma.done.wait (!%p10277_p1), %s9172_s11, 512  }
 0x2eb   : > { %10483 = vsyncadd (!%p10277_p1), %s9172_s11, 4294966784  ;;  %s21_s17 = sadd.s32 1, %s10506_s17   ;;  %s12730_s12 = smov %s10490_s13 }
 0x2ec   : > { %p18_p4 = scmp.ge.s32.totalorder %s21_s17, 4   ;;  %s12731_s13 = smov %s10494_s14 }
 0x2ed   : > { %s12732_s14 = smov %s10662_s9  ;;  %s12733_s15 = smov %s10502_s16 }
 0x2ee   : > { %s12734_s16 = smov %s12736_s26  ;;  %20 = sbr.rel (!%p18_p4) target bundleno = 8 (0x8), region = 103 }
 0x2f5   :  { %9177 = vsyncpa [#allocation3], 1 }
 0x2f6   :  { %9179 = vsyncpa [#allocation3 + $0x1], 1 }
 0x2f7   :  { %9180 = vsyncpa [#allocation7], 1 }
 0x2f8   :  { %9181 = vsyncpa [#allocation4], 1 }
 0x2f9   :  { %9183 = vsyncpa [#allocation4 + $0x1], 1 }
 0x2fa   :  { %9184 = vsyncpa [#allocation5], 1 }
 0x2fb   :  { %9186 = vsyncpa [#allocation5 + $0x1], 1 }

</bundles_post_ra>
